<compile_context>
chip_gen: v7x
topology: tpu7x:2x2x1
jax: 0.10.0
libtpu: 0.0.40
codegen_flags: <defaults>
</compile_context>

<pallas_src>
import jax
import jax.numpy as jnp
from jax.experimental import pallas as pl
from jax.experimental.pallas import tpu as pltpu


# ----------------------------------------------------------------------------
# Fused kernel:  4x Conv1d -> 2-layer LSTM -> Linear(H,1)+Sigmoid
# ----------------------------------------------------------------------------
def _make_fused_kernel(*, B, L, K, H, T, NF, L4):
    def kernel(x_ref,
               cw0_ref, cb0_ref, cw1_ref, cb1_ref, cw2_ref, cb2_ref, cw3_ref, cb3_ref,
               wih0_ref, b0_ref, whh0_ref, w1cat_ref, b1_ref,
               wlin_ref, blin_ref, h0_ref, c0_ref,
               out_ref, hn_ref, cn_ref):
        # -------- stage 1: conv stack on a flattened-batch, channels-major layout --------
        # act[c, b*L + l] = x[b, c, l].  Per-batch blocks keep a fixed stride L, so the
        # (K-1) columns at each batch boundary are garbage that valid outputs never read.
        act = jnp.concatenate([x_ref[b] for b in range(B)], axis=1)            # (C, B*L)
        width = B * L
        for w_ref, b_ref in ((cw0_ref, cb0_ref), (cw1_ref, cb1_ref),
                             (cw2_ref, cb2_ref), (cw3_ref, cb3_ref)):
            wout = width - (K - 1)
            # one (F,Cin)x(Cin, wout) MXU dot per tap, batch folded into lanes
            acc = jnp.dot(w_ref[0], act[:, 0:wout],
                          preferred_element_type=jnp.float32)
            for k in range(1, K):
                acc = acc + jnp.dot(w_ref[k], act[:, k:k + wout],
                                    preferred_element_type=jnp.float32)
            act = acc + b_ref[...]                        # bias broadcast ONCE per layer
            width = wout
        # act: (F, width); valid columns for batch b are [b*L, b*L + L4)

        # -------- stage 2: torch-style .view(B, -1, n_filters) + hoisted X @ W_ih^(0) ----
        rows = []
        for b in range(B):
            cb = act[:, b * L: b * L + L4]                # (F, L4)  == conv_out[b] (NCL)
            # raw contiguous reshape == torch .view; identity when NF == L4 (this config)
            rows.append(cb if NF == L4 else cb.reshape(T, NF))
        xall = jnp.concatenate(rows, axis=0)              # (B*T, NF), row index = b*T + t
        proj = jnp.dot(xall, wih0_ref[...],
                       preferred_element_type=jnp.float32) + b0_ref[...]       # (B*T, 4H)

        # -------- stage 3: 2-layer LSTM, fully unrolled over T (gate order i,f,g,o) ------
        whh0 = whh0_ref[...]                              # (H, 4H)
        w1c = w1cat_ref[...]                              # (2H, 4H) = [W_ih1^T ; W_hh1^T]
        b1v = b1_ref[...]                                 # (1, 4H)
        h0c, c0c = h0_ref[0], c0_ref[0]                   # (B, H) each
        h1c, c1c = h0_ref[1], c0_ref[1]

        def cell_update(g, c_prev):
            # full-width transcendentals on the EUP, then gate selection
            sg = jax.nn.sigmoid(g)                        # (B, 4H): [i | f | . | o]
            tg = jnp.tanh(g)                              # (B, 4H): [. | . | g | .]
            c_new = sg[:, H:2 * H] * c_prev + sg[:, 0:H] * tg[:, 2 * H:3 * H]
            h_new = sg[:, 3 * H:4 * H] * jnp.tanh(c_new)
            return h_new, c_new

        for t in range(T):                                # static, fully unrolled
            xp = jnp.concatenate(
                [proj[b * T + t: b * T + t + 1, :] for b in range(B)], axis=0)  # (B, 4H)
            # layer 0: input projection already hoisted, only h @ W_hh on the critical path
            g0 = xp + jnp.dot(h0c, whh0, preferred_element_type=jnp.float32)
            h0c, c0c = cell_update(g0, c0c)
            # layer 1: single fused dot for [x1 | h1] @ [W_ih1^T ; W_hh1^T]
            g1 = jnp.dot(jnp.concatenate([h0c, h1c], axis=1), w1c,
                         preferred_element_type=jnp.float32) + b1v
            h1c, c1c = cell_update(g1, c1c)

        hn_ref[0] = h0c
        hn_ref[1] = h1c
        cn_ref[0] = c0c
        cn_ref[1] = c1c

        # -------- stage 4: head Linear(H,1) + Sigmoid as an epilogue ---------------------
        z = jnp.sum(h1c * wlin_ref[...], axis=1, keepdims=True) + blin_ref[...]  # (B, 1)
        out_ref[...] = jax.nn.sigmoid(z)

    return kernel


# ----------------------------------------------------------------------------
# Wrapper (single pallas_call, everything whole-array resident in VMEM)
# ----------------------------------------------------------------------------
def deepconvlstm_forward(packed, x, hidden, batch_size, cfg):
    B, C, L = cfg["batch_size"], cfg["n_channels"], cfg["len_seq"]
    F, K, H = cfg["n_filters"], cfg["filter_size"], cfg["n_hidden"]
    L4 = L - 4 * (K - 1)                                  # conv output length
    NF = F
    T = (F * L4) // NF                                    # LSTM sequence length after .view
    # NOTE: like the reference module, `batch_size` only affects the final .view whose
    # [:, -1, :] reduces to "last-timestep hidden of layer 1" (benign).
    del batch_size

    x = jnp.asarray(x, jnp.float32).reshape(B, C, L)      # x.view(-1, n_channels, len_seq)
    h0, c0 = hidden

    kernel = _make_fused_kernel(B=B, L=L, K=K, H=H, T=T, NF=NF, L4=L4)
    vmem = pl.BlockSpec(memory_space=pltpu.MemorySpace.VMEM)

    out, hn, cn = pl.pallas_call(
        kernel,
        out_shape=(jax.ShapeDtypeStruct((B, 1), jnp.float32),
                   jax.ShapeDtypeStruct((2, B, H), jnp.float32),
                   jax.ShapeDtypeStruct((2, B, H), jnp.float32)),
        in_specs=[vmem] * 18,
        out_specs=(vmem, vmem, vmem),
    )(x,
      packed["cw"][0], packed["cb"][0], packed["cw"][1], packed["cb"][1],
      packed["cw"][2], packed["cb"][2], packed["cw"][3], packed["cb"][3],
      packed["wih0"], packed["b0"], packed["whh0"],
      packed["w1cat"], packed["b1"],
      packed["wlin"], packed["blin"],
      h0, c0)
    return out, (hn, cn)


# ----------------------------------------------------------------------------
# PyTorch-style parameters (raw) + one-time packing into kernel layout
# ----------------------------------------------------------------------------
def init_params(key, cfg):
    C, F, H, K = cfg["n_channels"], cfg["n_filters"], cfg["n_hidden"], cfg["filter_size"]
    keys = iter(jax.random.split(key, 32))

    def u(shape, fan_in):
        b = 1.0 / (fan_in ** 0.5)
        return jax.random.uniform(next(keys), shape, jnp.float32, -b, b)

    convs = []
    cin = C
    for _ in range(4):
        convs.append((u((F, cin, K), cin * K), u((F,), cin * K)))
        cin = F
    raw = dict(convs=convs)
    raw["wih0"], raw["whh0"] = u((4 * H, F), H), u((4 * H, H), H)
    raw["bih0"], raw["bhh0"] = u((4 * H,), H), u((4 * H,), H)
    raw["wih1"], raw["whh1"] = u((4 * H, H), H), u((4 * H, H), H)
    raw["bih1"], raw["bhh1"] = u((4 * H,), H), u((4 * H,), H)
    raw["wlin"], raw["blin"] = u((1, H), H), u((1,), H)
    return raw


def pack_params(raw, cfg):
    F, H = cfg["n_filters"], cfg["n_hidden"]
    cw = [jnp.transpose(w, (2, 0, 1)) for (w, _) in raw["convs"]]   # (K, F, Cin) per layer
    cb = [b.reshape(F, 1) for (_, b) in raw["convs"]]
    return dict(
        cw=cw, cb=cb,
        wih0=raw["wih0"].T,                                         # (NF, 4H)
        whh0=raw["whh0"].T,                                         # (H, 4H)
        b0=(raw["bih0"] + raw["bhh0"]).reshape(1, 4 * H),
        w1cat=jnp.concatenate([raw["wih1"].T, raw["whh1"].T], axis=0),   # (2H, 4H)
        b1=(raw["bih1"] + raw["bhh1"]).reshape(1, 4 * H),
        wlin=raw["wlin"],                                            # (1, H)
        blin=raw["blin"].reshape(1, 1),
    )


# ----------------------------------------------------------------------------
# Pure-JAX reference (mirrors the PyTorch module) for a numerical sanity check
# ----------------------------------------------------------------------------
def torch_reference_forward(raw, x, hidden, cfg):
    B, C, L = cfg["batch_size"], cfg["n_channels"], cfg["len_seq"]
    F, K, H = cfg["n_filters"], cfg["filter_size"], cfg["n_hidden"]
    a = jnp.asarray(x, jnp.float32).reshape(-1, C, L)
    for (w, b) in raw["convs"]:
        Lout = a.shape[2] - K + 1
        out = jnp.zeros((a.shape[0], F, Lout), jnp.float32)
        for k in range(K):
            out = out + jnp.einsum("bcl,fc->bfl", a[:, :, k:k + Lout], w[:, :, k])
        a = out + b[None, :, None]
    xl = a.reshape(B, -1, F)                                        # torch .view
    T = xl.shape[1]
    h0, c0 = hidden
    hs, cs = [h0[0], h0[1]], [c0[0], c0[1]]
    layers = [(raw["wih0"], raw["whh0"], raw["bih0"], raw["bhh0"]),
              (raw["wih1"], raw["whh1"], raw["bih1"], raw["bhh1"])]
    last = None
    for t in range(T):
        inp = xl[:, t, :]
        for li, (wih, whh, bih, bhh) in enumerate(layers):
            g = inp @ wih.T + bih + hs[li] @ whh.T + bhh
            i = jax.nn.sigmoid(g[:, :H]); f = jax.nn.sigmoid(g[:, H:2 * H])
            gg = jnp.tanh(g[:, 2 * H:3 * H]); o = jax.nn.sigmoid(g[:, 3 * H:])
            cs[li] = f * cs[li] + i * gg
            hs[li] = o * jnp.tanh(cs[li])
            inp = hs[li]
        last = inp
    out = jax.nn.sigmoid(last @ raw["wlin"].T + raw["blin"])
    return out, (jnp.stack(hs, 0), jnp.stack(cs, 0))


# ----------------------------------------------------------------------------
if __name__ == "__main__":
    cfg = dict(n_channels=4, len_seq=32, batch_size=2,
               n_filters=16, n_hidden=32, n_layers=2, filter_size=5)
    B, C, L, H = cfg["batch_size"], cfg["n_channels"], cfg["len_seq"], cfg["n_hidden"]

    key = jax.random.PRNGKey(0)
    pkey, xkey = jax.random.split(key)
    raw = init_params(pkey, cfg)
    packed = pack_params(raw, cfg)

    x = jax.random.normal(xkey, (B, C, L), jnp.float32)
    # init_hidden(batch_size): zeros of (n_layers, B, n_hidden)
    h0 = jnp.zeros((cfg["n_layers"], B, H), jnp.float32)
    c0 = jnp.zeros((cfg["n_layers"], B, H), jnp.float32)

    fwd = jax.jit(lambda p, xx, h, c: deepconvlstm_forward(p, xx, (h, c), B, cfg))
    out, (hn, cn) = fwd(packed, x, h0, c0)
    jax.block_until_ready((out, hn, cn))

    assert out.shape == (B, 1)
    assert hn.shape == (cfg["n_layers"], B, H)
    assert cn.shape == (cfg["n_layers"], B, H)
    assert bool(jnp.all(jnp.isfinite(out)))

    # numerical check against the pure-JAX (PyTorch-faithful) reference
    out_r, (hn_r, cn_r) = torch_reference_forward(raw, x, (h0, c0), cfg)
    tol = 2e-2  # allows for TPU matmul (bf16-pass) rounding differences
    assert bool(jnp.allclose(out, out_r, atol=tol, rtol=tol))
    assert bool(jnp.allclose(hn, hn_r, atol=tol, rtol=tol))
    assert bool(jnp.allclose(cn, cn_r, atol=tol, rtol=tol))

    print("KERNEL_OK")
</pallas_src>

<mosaic_0001>
module attributes {stable_mosaic.version = 11 : i64} {
  func.func @kernel(%arg0: memref<2x4x32xf32, #tpu.memory_space<vmem>>, %arg1: memref<5x16x4xf32, #tpu.memory_space<vmem>>, %arg2: memref<16x1xf32, #tpu.memory_space<vmem>>, %arg3: memref<5x16x16xf32, #tpu.memory_space<vmem>>, %arg4: memref<16x1xf32, #tpu.memory_space<vmem>>, %arg5: memref<5x16x16xf32, #tpu.memory_space<vmem>>, %arg6: memref<16x1xf32, #tpu.memory_space<vmem>>, %arg7: memref<5x16x16xf32, #tpu.memory_space<vmem>>, %arg8: memref<16x1xf32, #tpu.memory_space<vmem>>, %arg9: memref<16x128xf32, #tpu.memory_space<vmem>>, %arg10: memref<1x128xf32, #tpu.memory_space<vmem>>, %arg11: memref<32x128xf32, #tpu.memory_space<vmem>>, %arg12: memref<64x128xf32, #tpu.memory_space<vmem>>, %arg13: memref<1x128xf32, #tpu.memory_space<vmem>>, %arg14: memref<1x32xf32, #tpu.memory_space<vmem>>, %arg15: memref<1x1xf32, #tpu.memory_space<vmem>>, %arg16: memref<2x2x32xf32, #tpu.memory_space<vmem>>, %arg17: memref<2x2x32xf32, #tpu.memory_space<vmem>>, %arg18: memref<2x1xf32, #tpu.memory_space<vmem>>, %arg19: memref<2x2x32xf32, #tpu.memory_space<vmem>>, %arg20: memref<2x2x32xf32, #tpu.memory_space<vmem>>) attributes {dimension_semantics = [], scalar_prefetch = 0 : i64, scratch_operands = 0 : i64, tpu.core_type = #tpu.core_type<tc>} {
    %c0 = arith.constant 0 : index
    %c0_0 = arith.constant 0 : index
    %c0_1 = arith.constant 0 : index
    %0 = vector.load %arg0[%c0, %c0_0, %c0_1] : memref<2x4x32xf32, #tpu.memory_space<vmem>>, vector<1x4x32xf32>
    %1 = vector.shape_cast %0 : vector<1x4x32xf32> to vector<4x32xf32>
    %c1 = arith.constant 1 : index
    %c0_2 = arith.constant 0 : index
    %c0_3 = arith.constant 0 : index
    %2 = vector.load %arg0[%c1, %c0_2, %c0_3] : memref<2x4x32xf32, #tpu.memory_space<vmem>>, vector<1x4x32xf32>
    %3 = vector.shape_cast %2 : vector<1x4x32xf32> to vector<4x32xf32>
    %4 = tpu.concatenate %1, %3 in 1 : vector<4x32xf32>, vector<4x32xf32> -> vector<4x64xf32>
    %c0_4 = arith.constant 0 : index
    %c0_5 = arith.constant 0 : index
    %c0_6 = arith.constant 0 : index
    %5 = vector.load %arg1[%c0_4, %c0_5, %c0_6] : memref<5x16x4xf32, #tpu.memory_space<vmem>>, vector<1x16x4xf32>
    %6 = vector.shape_cast %5 : vector<1x16x4xf32> to vector<16x4xf32>
    %7 = vector.extract_strided_slice %4 {offsets = [0, 0], sizes = [4, 60], strides = [1, 1]} : vector<4x64xf32> to vector<4x60xf32>
    %cst = arith.constant dense<0.000000e+00> : vector<16x60xf32>
    %8 = tpu.matmul %6, %7, %cst {dimension_numbers = #tpu.dot_dimension_numbers<[1], [0], [0], [1], [0, 0, 1, 1], [], []>} : vector<16x4xf32>, vector<4x60xf32>, vector<16x60xf32> -> vector<16x60xf32>
    %c1_7 = arith.constant 1 : index
    %c0_8 = arith.constant 0 : index
    %c0_9 = arith.constant 0 : index
    %9 = vector.load %arg1[%c1_7, %c0_8, %c0_9] : memref<5x16x4xf32, #tpu.memory_space<vmem>>, vector<1x16x4xf32>
    %10 = vector.shape_cast %9 : vector<1x16x4xf32> to vector<16x4xf32>
    %11 = vector.extract_strided_slice %4 {offsets = [0, 1], sizes = [4, 60], strides = [1, 1]} : vector<4x64xf32> to vector<4x60xf32>
    %cst_10 = arith.constant dense<0.000000e+00> : vector<16x60xf32>
    %12 = tpu.matmul %10, %11, %cst_10 {dimension_numbers = #tpu.dot_dimension_numbers<[1], [0], [0], [1], [0, 0, 1, 1], [], []>} : vector<16x4xf32>, vector<4x60xf32>, vector<16x60xf32> -> vector<16x60xf32>
    %13 = arith.addf %8, %12 : vector<16x60xf32>
    %c2 = arith.constant 2 : index
    %c0_11 = arith.constant 0 : index
    %c0_12 = arith.constant 0 : index
    %14 = vector.load %arg1[%c2, %c0_11, %c0_12] : memref<5x16x4xf32, #tpu.memory_space<vmem>>, vector<1x16x4xf32>
    %15 = vector.shape_cast %14 : vector<1x16x4xf32> to vector<16x4xf32>
    %16 = vector.extract_strided_slice %4 {offsets = [0, 2], sizes = [4, 60], strides = [1, 1]} : vector<4x64xf32> to vector<4x60xf32>
    %cst_13 = arith.constant dense<0.000000e+00> : vector<16x60xf32>
    %17 = tpu.matmul %15, %16, %cst_13 {dimension_numbers = #tpu.dot_dimension_numbers<[1], [0], [0], [1], [0, 0, 1, 1], [], []>} : vector<16x4xf32>, vector<4x60xf32>, vector<16x60xf32> -> vector<16x60xf32>
    %18 = arith.addf %13, %17 : vector<16x60xf32>
    %c3 = arith.constant 3 : index
    %c0_14 = arith.constant 0 : index
    %c0_15 = arith.constant 0 : index
    %19 = vector.load %arg1[%c3, %c0_14, %c0_15] : memref<5x16x4xf32, #tpu.memory_space<vmem>>, vector<1x16x4xf32>
    %20 = vector.shape_cast %19 : vector<1x16x4xf32> to vector<16x4xf32>
    %21 = vector.extract_strided_slice %4 {offsets = [0, 3], sizes = [4, 60], strides = [1, 1]} : vector<4x64xf32> to vector<4x60xf32>
    %cst_16 = arith.constant dense<0.000000e+00> : vector<16x60xf32>
    %22 = tpu.matmul %20, %21, %cst_16 {dimension_numbers = #tpu.dot_dimension_numbers<[1], [0], [0], [1], [0, 0, 1, 1], [], []>} : vector<16x4xf32>, vector<4x60xf32>, vector<16x60xf32> -> vector<16x60xf32>
    %23 = arith.addf %18, %22 : vector<16x60xf32>
    %c4 = arith.constant 4 : index
    %c0_17 = arith.constant 0 : index
    %c0_18 = arith.constant 0 : index
    %24 = vector.load %arg1[%c4, %c0_17, %c0_18] : memref<5x16x4xf32, #tpu.memory_space<vmem>>, vector<1x16x4xf32>
    %25 = vector.shape_cast %24 : vector<1x16x4xf32> to vector<16x4xf32>
    %26 = vector.extract_strided_slice %4 {offsets = [0, 4], sizes = [4, 60], strides = [1, 1]} : vector<4x64xf32> to vector<4x60xf32>
    %cst_19 = arith.constant dense<0.000000e+00> : vector<16x60xf32>
    %27 = tpu.matmul %25, %26, %cst_19 {dimension_numbers = #tpu.dot_dimension_numbers<[1], [0], [0], [1], [0, 0, 1, 1], [], []>} : vector<16x4xf32>, vector<4x60xf32>, vector<16x60xf32> -> vector<16x60xf32>
    %28 = arith.addf %23, %27 : vector<16x60xf32>
    %c0_20 = arith.constant 0 : index
    %c0_21 = arith.constant 0 : index
    %29 = vector.load %arg2[%c0_20, %c0_21] : memref<16x1xf32, #tpu.memory_space<vmem>>, vector<16x1xf32>
    %30 = vector.broadcast %29 : vector<16x1xf32> to vector<16x60xf32>
    %31 = arith.addf %28, %30 : vector<16x60xf32>
    %c0_22 = arith.constant 0 : index
    %c0_23 = arith.constant 0 : index
    %c0_24 = arith.constant 0 : index
    %32 = vector.load %arg3[%c0_22, %c0_23, %c0_24] : memref<5x16x16xf32, #tpu.memory_space<vmem>>, vector<1x16x16xf32>
    %33 = vector.shape_cast %32 : vector<1x16x16xf32> to vector<16x16xf32>
    %34 = vector.extract_strided_slice %31 {offsets = [0, 0], sizes = [16, 56], strides = [1, 1]} : vector<16x60xf32> to vector<16x56xf32>
    %cst_25 = arith.constant dense<0.000000e+00> : vector<16x56xf32>
    %35 = tpu.matmul %33, %34, %cst_25 {dimension_numbers = #tpu.dot_dimension_numbers<[1], [0], [0], [1], [0, 0, 1, 1], [], []>} : vector<16x16xf32>, vector<16x56xf32>, vector<16x56xf32> -> vector<16x56xf32>
    %c1_26 = arith.constant 1 : index
    %c0_27 = arith.constant 0 : index
    %c0_28 = arith.constant 0 : index
    %36 = vector.load %arg3[%c1_26, %c0_27, %c0_28] : memref<5x16x16xf32, #tpu.memory_space<vmem>>, vector<1x16x16xf32>
    %37 = vector.shape_cast %36 : vector<1x16x16xf32> to vector<16x16xf32>
    %38 = vector.extract_strided_slice %31 {offsets = [0, 1], sizes = [16, 56], strides = [1, 1]} : vector<16x60xf32> to vector<16x56xf32>
    %cst_29 = arith.constant dense<0.000000e+00> : vector<16x56xf32>
    %39 = tpu.matmul %37, %38, %cst_29 {dimension_numbers = #tpu.dot_dimension_numbers<[1], [0], [0], [1], [0, 0, 1, 1], [], []>} : vector<16x16xf32>, vector<16x56xf32>, vector<16x56xf32> -> vector<16x56xf32>
    %40 = arith.addf %35, %39 : vector<16x56xf32>
    %c2_30 = arith.constant 2 : index
    %c0_31 = arith.constant 0 : index
    %c0_32 = arith.constant 0 : index
    %41 = vector.load %arg3[%c2_30, %c0_31, %c0_32] : memref<5x16x16xf32, #tpu.memory_space<vmem>>, vector<1x16x16xf32>
    %42 = vector.shape_cast %41 : vector<1x16x16xf32> to vector<16x16xf32>
    %43 = vector.extract_strided_slice %31 {offsets = [0, 2], sizes = [16, 56], strides = [1, 1]} : vector<16x60xf32> to vector<16x56xf32>
    %cst_33 = arith.constant dense<0.000000e+00> : vector<16x56xf32>
    %44 = tpu.matmul %42, %43, %cst_33 {dimension_numbers = #tpu.dot_dimension_numbers<[1], [0], [0], [1], [0, 0, 1, 1], [], []>} : vector<16x16xf32>, vector<16x56xf32>, vector<16x56xf32> -> vector<16x56xf32>
    %45 = arith.addf %40, %44 : vector<16x56xf32>
    %c3_34 = arith.constant 3 : index
    %c0_35 = arith.constant 0 : index
    %c0_36 = arith.constant 0 : index
    %46 = vector.load %arg3[%c3_34, %c0_35, %c0_36] : memref<5x16x16xf32, #tpu.memory_space<vmem>>, vector<1x16x16xf32>
    %47 = vector.shape_cast %46 : vector<1x16x16xf32> to vector<16x16xf32>
    %48 = vector.extract_strided_slice %31 {offsets = [0, 3], sizes = [16, 56], strides = [1, 1]} : vector<16x60xf32> to vector<16x56xf32>
    %cst_37 = arith.constant dense<0.000000e+00> : vector<16x56xf32>
    %49 = tpu.matmul %47, %48, %cst_37 {dimension_numbers = #tpu.dot_dimension_numbers<[1], [0], [0], [1], [0, 0, 1, 1], [], []>} : vector<16x16xf32>, vector<16x56xf32>, vector<16x56xf32> -> vector<16x56xf32>
    %50 = arith.addf %45, %49 : vector<16x56xf32>
    %c4_38 = arith.constant 4 : index
    %c0_39 = arith.constant 0 : index
    %c0_40 = arith.constant 0 : index
    %51 = vector.load %arg3[%c4_38, %c0_39, %c0_40] : memref<5x16x16xf32, #tpu.memory_space<vmem>>, vector<1x16x16xf32>
    %52 = vector.shape_cast %51 : vector<1x16x16xf32> to vector<16x16xf32>
    %53 = vector.extract_strided_slice %31 {offsets = [0, 4], sizes = [16, 56], strides = [1, 1]} : vector<16x60xf32> to vector<16x56xf32>
    %cst_41 = arith.constant dense<0.000000e+00> : vector<16x56xf32>
    %54 = tpu.matmul %52, %53, %cst_41 {dimension_numbers = #tpu.dot_dimension_numbers<[1], [0], [0], [1], [0, 0, 1, 1], [], []>} : vector<16x16xf32>, vector<16x56xf32>, vector<16x56xf32> -> vector<16x56xf32>
    %55 = arith.addf %50, %54 : vector<16x56xf32>
    %c0_42 = arith.constant 0 : index
    %c0_43 = arith.constant 0 : index
    %56 = vector.load %arg4[%c0_42, %c0_43] : memref<16x1xf32, #tpu.memory_space<vmem>>, vector<16x1xf32>
    %57 = vector.broadcast %56 : vector<16x1xf32> to vector<16x56xf32>
    %58 = arith.addf %55, %57 : vector<16x56xf32>
    %c0_44 = arith.constant 0 : index
    %c0_45 = arith.constant 0 : index
    %c0_46 = arith.constant 0 : index
    %59 = vector.load %arg5[%c0_44, %c0_45, %c0_46] : memref<5x16x16xf32, #tpu.memory_space<vmem>>, vector<1x16x16xf32>
    %60 = vector.shape_cast %59 : vector<1x16x16xf32> to vector<16x16xf32>
    %61 = vector.extract_strided_slice %58 {offsets = [0, 0], sizes = [16, 52], strides = [1, 1]} : vector<16x56xf32> to vector<16x52xf32>
    %cst_47 = arith.constant dense<0.000000e+00> : vector<16x52xf32>
    %62 = tpu.matmul %60, %61, %cst_47 {dimension_numbers = #tpu.dot_dimension_numbers<[1], [0], [0], [1], [0, 0, 1, 1], [], []>} : vector<16x16xf32>, vector<16x52xf32>, vector<16x52xf32> -> vector<16x52xf32>
    %c1_48 = arith.constant 1 : index
    %c0_49 = arith.constant 0 : index
    %c0_50 = arith.constant 0 : index
    %63 = vector.load %arg5[%c1_48, %c0_49, %c0_50] : memref<5x16x16xf32, #tpu.memory_space<vmem>>, vector<1x16x16xf32>
    %64 = vector.shape_cast %63 : vector<1x16x16xf32> to vector<16x16xf32>
    %65 = vector.extract_strided_slice %58 {offsets = [0, 1], sizes = [16, 52], strides = [1, 1]} : vector<16x56xf32> to vector<16x52xf32>
    %cst_51 = arith.constant dense<0.000000e+00> : vector<16x52xf32>
    %66 = tpu.matmul %64, %65, %cst_51 {dimension_numbers = #tpu.dot_dimension_numbers<[1], [0], [0], [1], [0, 0, 1, 1], [], []>} : vector<16x16xf32>, vector<16x52xf32>, vector<16x52xf32> -> vector<16x52xf32>
    %67 = arith.addf %62, %66 : vector<16x52xf32>
    %c2_52 = arith.constant 2 : index
    %c0_53 = arith.constant 0 : index
    %c0_54 = arith.constant 0 : index
    %68 = vector.load %arg5[%c2_52, %c0_53, %c0_54] : memref<5x16x16xf32, #tpu.memory_space<vmem>>, vector<1x16x16xf32>
    %69 = vector.shape_cast %68 : vector<1x16x16xf32> to vector<16x16xf32>
    %70 = vector.extract_strided_slice %58 {offsets = [0, 2], sizes = [16, 52], strides = [1, 1]} : vector<16x56xf32> to vector<16x52xf32>
    %cst_55 = arith.constant dense<0.000000e+00> : vector<16x52xf32>
    %71 = tpu.matmul %69, %70, %cst_55 {dimension_numbers = #tpu.dot_dimension_numbers<[1], [0], [0], [1], [0, 0, 1, 1], [], []>} : vector<16x16xf32>, vector<16x52xf32>, vector<16x52xf32> -> vector<16x52xf32>
    %72 = arith.addf %67, %71 : vector<16x52xf32>
    %c3_56 = arith.constant 3 : index
    %c0_57 = arith.constant 0 : index
    %c0_58 = arith.constant 0 : index
    %73 = vector.load %arg5[%c3_56, %c0_57, %c0_58] : memref<5x16x16xf32, #tpu.memory_space<vmem>>, vector<1x16x16xf32>
    %74 = vector.shape_cast %73 : vector<1x16x16xf32> to vector<16x16xf32>
    %75 = vector.extract_strided_slice %58 {offsets = [0, 3], sizes = [16, 52], strides = [1, 1]} : vector<16x56xf32> to vector<16x52xf32>
    %cst_59 = arith.constant dense<0.000000e+00> : vector<16x52xf32>
    %76 = tpu.matmul %74, %75, %cst_59 {dimension_numbers = #tpu.dot_dimension_numbers<[1], [0], [0], [1], [0, 0, 1, 1], [], []>} : vector<16x16xf32>, vector<16x52xf32>, vector<16x52xf32> -> vector<16x52xf32>
    %77 = arith.addf %72, %76 : vector<16x52xf32>
    %c4_60 = arith.constant 4 : index
    %c0_61 = arith.constant 0 : index
    %c0_62 = arith.constant 0 : index
    %78 = vector.load %arg5[%c4_60, %c0_61, %c0_62] : memref<5x16x16xf32, #tpu.memory_space<vmem>>, vector<1x16x16xf32>
    %79 = vector.shape_cast %78 : vector<1x16x16xf32> to vector<16x16xf32>
    %80 = vector.extract_strided_slice %58 {offsets = [0, 4], sizes = [16, 52], strides = [1, 1]} : vector<16x56xf32> to vector<16x52xf32>
    %cst_63 = arith.constant dense<0.000000e+00> : vector<16x52xf32>
    %81 = tpu.matmul %79, %80, %cst_63 {dimension_numbers = #tpu.dot_dimension_numbers<[1], [0], [0], [1], [0, 0, 1, 1], [], []>} : vector<16x16xf32>, vector<16x52xf32>, vector<16x52xf32> -> vector<16x52xf32>
    %82 = arith.addf %77, %81 : vector<16x52xf32>
    %c0_64 = arith.constant 0 : index
    %c0_65 = arith.constant 0 : index
    %83 = vector.load %arg6[%c0_64, %c0_65] : memref<16x1xf32, #tpu.memory_space<vmem>>, vector<16x1xf32>
    %84 = vector.broadcast %83 : vector<16x1xf32> to vector<16x52xf32>
    %85 = arith.addf %82, %84 : vector<16x52xf32>
    %c0_66 = arith.constant 0 : index
    %c0_67 = arith.constant 0 : index
    %c0_68 = arith.constant 0 : index
    %86 = vector.load %arg7[%c0_66, %c0_67, %c0_68] : memref<5x16x16xf32, #tpu.memory_space<vmem>>, vector<1x16x16xf32>
    %87 = vector.shape_cast %86 : vector<1x16x16xf32> to vector<16x16xf32>
    %88 = vector.extract_strided_slice %85 {offsets = [0, 0], sizes = [16, 48], strides = [1, 1]} : vector<16x52xf32> to vector<16x48xf32>
    %cst_69 = arith.constant dense<0.000000e+00> : vector<16x48xf32>
    %89 = tpu.matmul %87, %88, %cst_69 {dimension_numbers = #tpu.dot_dimension_numbers<[1], [0], [0], [1], [0, 0, 1, 1], [], []>} : vector<16x16xf32>, vector<16x48xf32>, vector<16x48xf32> -> vector<16x48xf32>
    %c1_70 = arith.constant 1 : index
    %c0_71 = arith.constant 0 : index
    %c0_72 = arith.constant 0 : index
    %90 = vector.load %arg7[%c1_70, %c0_71, %c0_72] : memref<5x16x16xf32, #tpu.memory_space<vmem>>, vector<1x16x16xf32>
    %91 = vector.shape_cast %90 : vector<1x16x16xf32> to vector<16x16xf32>
    %92 = vector.extract_strided_slice %85 {offsets = [0, 1], sizes = [16, 48], strides = [1, 1]} : vector<16x52xf32> to vector<16x48xf32>
    %cst_73 = arith.constant dense<0.000000e+00> : vector<16x48xf32>
    %93 = tpu.matmul %91, %92, %cst_73 {dimension_numbers = #tpu.dot_dimension_numbers<[1], [0], [0], [1], [0, 0, 1, 1], [], []>} : vector<16x16xf32>, vector<16x48xf32>, vector<16x48xf32> -> vector<16x48xf32>
    %94 = arith.addf %89, %93 : vector<16x48xf32>
    %c2_74 = arith.constant 2 : index
    %c0_75 = arith.constant 0 : index
    %c0_76 = arith.constant 0 : index
    %95 = vector.load %arg7[%c2_74, %c0_75, %c0_76] : memref<5x16x16xf32, #tpu.memory_space<vmem>>, vector<1x16x16xf32>
    %96 = vector.shape_cast %95 : vector<1x16x16xf32> to vector<16x16xf32>
    %97 = vector.extract_strided_slice %85 {offsets = [0, 2], sizes = [16, 48], strides = [1, 1]} : vector<16x52xf32> to vector<16x48xf32>
    %cst_77 = arith.constant dense<0.000000e+00> : vector<16x48xf32>
    %98 = tpu.matmul %96, %97, %cst_77 {dimension_numbers = #tpu.dot_dimension_numbers<[1], [0], [0], [1], [0, 0, 1, 1], [], []>} : vector<16x16xf32>, vector<16x48xf32>, vector<16x48xf32> -> vector<16x48xf32>
    %99 = arith.addf %94, %98 : vector<16x48xf32>
    %c3_78 = arith.constant 3 : index
    %c0_79 = arith.constant 0 : index
    %c0_80 = arith.constant 0 : index
    %100 = vector.load %arg7[%c3_78, %c0_79, %c0_80] : memref<5x16x16xf32, #tpu.memory_space<vmem>>, vector<1x16x16xf32>
    %101 = vector.shape_cast %100 : vector<1x16x16xf32> to vector<16x16xf32>
    %102 = vector.extract_strided_slice %85 {offsets = [0, 3], sizes = [16, 48], strides = [1, 1]} : vector<16x52xf32> to vector<16x48xf32>
    %cst_81 = arith.constant dense<0.000000e+00> : vector<16x48xf32>
    %103 = tpu.matmul %101, %102, %cst_81 {dimension_numbers = #tpu.dot_dimension_numbers<[1], [0], [0], [1], [0, 0, 1, 1], [], []>} : vector<16x16xf32>, vector<16x48xf32>, vector<16x48xf32> -> vector<16x48xf32>
    %104 = arith.addf %99, %103 : vector<16x48xf32>
    %c4_82 = arith.constant 4 : index
    %c0_83 = arith.constant 0 : index
    %c0_84 = arith.constant 0 : index
    %105 = vector.load %arg7[%c4_82, %c0_83, %c0_84] : memref<5x16x16xf32, #tpu.memory_space<vmem>>, vector<1x16x16xf32>
    %106 = vector.shape_cast %105 : vector<1x16x16xf32> to vector<16x16xf32>
    %107 = vector.extract_strided_slice %85 {offsets = [0, 4], sizes = [16, 48], strides = [1, 1]} : vector<16x52xf32> to vector<16x48xf32>
    %cst_85 = arith.constant dense<0.000000e+00> : vector<16x48xf32>
    %108 = tpu.matmul %106, %107, %cst_85 {dimension_numbers = #tpu.dot_dimension_numbers<[1], [0], [0], [1], [0, 0, 1, 1], [], []>} : vector<16x16xf32>, vector<16x48xf32>, vector<16x48xf32> -> vector<16x48xf32>
    %109 = arith.addf %104, %108 : vector<16x48xf32>
    %c0_86 = arith.constant 0 : index
    %c0_87 = arith.constant 0 : index
    %110 = vector.load %arg8[%c0_86, %c0_87] : memref<16x1xf32, #tpu.memory_space<vmem>>, vector<16x1xf32>
    %111 = vector.broadcast %110 : vector<16x1xf32> to vector<16x48xf32>
    %112 = arith.addf %109, %111 : vector<16x48xf32>
    %113 = vector.extract_strided_slice %112 {offsets = [0, 0], sizes = [16, 16], strides = [1, 1]} : vector<16x48xf32> to vector<16x16xf32>
    %114 = vector.extract_strided_slice %112 {offsets = [0, 32], sizes = [16, 16], strides = [1, 1]} : vector<16x48xf32> to vector<16x16xf32>
    %115 = tpu.concatenate %113, %114 in 0 : vector<16x16xf32>, vector<16x16xf32> -> vector<32x16xf32>
    %c0_88 = arith.constant 0 : index
    %c0_89 = arith.constant 0 : index
    %116 = vector.load %arg9[%c0_88, %c0_89] : memref<16x128xf32, #tpu.memory_space<vmem>>, vector<16x128xf32>
    %cst_90 = arith.constant dense<0.000000e+00> : vector<32x128xf32>
    %117 = tpu.matmul %115, %116, %cst_90 {dimension_numbers = #tpu.dot_dimension_numbers<[1], [0], [0], [1], [0, 0, 1, 1], [], []>} : vector<32x16xf32>, vector<16x128xf32>, vector<32x128xf32> -> vector<32x128xf32>
    %c0_91 = arith.constant 0 : index
    %c0_92 = arith.constant 0 : index
    %118 = vector.load %arg10[%c0_91, %c0_92] : memref<1x128xf32, #tpu.memory_space<vmem>>, vector<1x128xf32>
    %119 = vector.broadcast %118 : vector<1x128xf32> to vector<32x128xf32>
    %120 = arith.addf %117, %119 : vector<32x128xf32>
    %c0_93 = arith.constant 0 : index
    %c0_94 = arith.constant 0 : index
    %121 = vector.load %arg11[%c0_93, %c0_94] : memref<32x128xf32, #tpu.memory_space<vmem>>, vector<32x128xf32>
    %c0_95 = arith.constant 0 : index
    %c0_96 = arith.constant 0 : index
    %122 = vector.load %arg12[%c0_95, %c0_96] : memref<64x128xf32, #tpu.memory_space<vmem>>, vector<64x128xf32>
    %c0_97 = arith.constant 0 : index
    %c0_98 = arith.constant 0 : index
    %123 = vector.load %arg13[%c0_97, %c0_98] : memref<1x128xf32, #tpu.memory_space<vmem>>, vector<1x128xf32>
    %c0_99 = arith.constant 0 : index
    %c0_100 = arith.constant 0 : index
    %c0_101 = arith.constant 0 : index
    %124 = vector.load %arg16[%c0_99, %c0_100, %c0_101] : memref<2x2x32xf32, #tpu.memory_space<vmem>>, vector<1x2x32xf32>
    %125 = vector.shape_cast %124 : vector<1x2x32xf32> to vector<2x32xf32>
    %c0_102 = arith.constant 0 : index
    %c0_103 = arith.constant 0 : index
    %c0_104 = arith.constant 0 : index
    %126 = vector.load %arg17[%c0_102, %c0_103, %c0_104] : memref<2x2x32xf32, #tpu.memory_space<vmem>>, vector<1x2x32xf32>
    %127 = vector.shape_cast %126 : vector<1x2x32xf32> to vector<2x32xf32>
    %c1_105 = arith.constant 1 : index
    %c0_106 = arith.constant 0 : index
    %c0_107 = arith.constant 0 : index
    %128 = vector.load %arg16[%c1_105, %c0_106, %c0_107] : memref<2x2x32xf32, #tpu.memory_space<vmem>>, vector<1x2x32xf32>
    %129 = vector.shape_cast %128 : vector<1x2x32xf32> to vector<2x32xf32>
    %c1_108 = arith.constant 1 : index
    %c0_109 = arith.constant 0 : index
    %c0_110 = arith.constant 0 : index
    %130 = vector.load %arg17[%c1_108, %c0_109, %c0_110] : memref<2x2x32xf32, #tpu.memory_space<vmem>>, vector<1x2x32xf32>
    %131 = vector.shape_cast %130 : vector<1x2x32xf32> to vector<2x32xf32>
    %132 = vector.extract_strided_slice %120 {offsets = [0, 0], sizes = [1, 128], strides = [1, 1]} : vector<32x128xf32> to vector<1x128xf32>
    %133 = vector.extract_strided_slice %120 {offsets = [16, 0], sizes = [1, 128], strides = [1, 1]} : vector<32x128xf32> to vector<1x128xf32>
    %134 = tpu.concatenate %132, %133 in 0 : vector<1x128xf32>, vector<1x128xf32> -> vector<2x128xf32>
    %cst_111 = arith.constant dense<0.000000e+00> : vector<2x128xf32>
    %135 = tpu.matmul %125, %121, %cst_111 {dimension_numbers = #tpu.dot_dimension_numbers<[1], [0], [0], [1], [0, 0, 1, 1], [], []>} : vector<2x32xf32>, vector<32x128xf32>, vector<2x128xf32> -> vector<2x128xf32>
    %136 = arith.addf %134, %135 : vector<2x128xf32>
    %137 = arith.negf %136 : vector<2x128xf32>
    %138 = math.exp %137 : vector<2x128xf32>
    %cst_112 = arith.constant 1.000000e+00 : f32
    %139 = vector.broadcast %cst_112 : f32 to vector<2x128xf32>
    %140 = arith.addf %139, %138 : vector<2x128xf32>
    %141 = arith.divf %139, %140 : vector<2x128xf32>
    %142 = math.tanh %136 : vector<2x128xf32>
    %143 = vector.extract_strided_slice %141 {offsets = [0, 32], sizes = [2, 32], strides = [1, 1]} : vector<2x128xf32> to vector<2x32xf32>
    %144 = arith.mulf %143, %127 : vector<2x32xf32>
    %145 = vector.extract_strided_slice %141 {offsets = [0, 0], sizes = [2, 32], strides = [1, 1]} : vector<2x128xf32> to vector<2x32xf32>
    %146 = vector.extract_strided_slice %142 {offsets = [0, 64], sizes = [2, 32], strides = [1, 1]} : vector<2x128xf32> to vector<2x32xf32>
    %147 = arith.mulf %145, %146 : vector<2x32xf32>
    %148 = arith.addf %144, %147 : vector<2x32xf32>
    %149 = vector.extract_strided_slice %141 {offsets = [0, 96], sizes = [2, 32], strides = [1, 1]} : vector<2x128xf32> to vector<2x32xf32>
    %150 = math.tanh %148 : vector<2x32xf32>
    %151 = arith.mulf %149, %150 : vector<2x32xf32>
    %152 = tpu.concatenate %151, %129 in 1 : vector<2x32xf32>, vector<2x32xf32> -> vector<2x64xf32>
    %cst_113 = arith.constant dense<0.000000e+00> : vector<2x128xf32>
    %153 = tpu.matmul %152, %122, %cst_113 {dimension_numbers = #tpu.dot_dimension_numbers<[1], [0], [0], [1], [0, 0, 1, 1], [], []>} : vector<2x64xf32>, vector<64x128xf32>, vector<2x128xf32> -> vector<2x128xf32>
    %154 = vector.broadcast %123 : vector<1x128xf32> to vector<2x128xf32>
    %155 = arith.addf %153, %154 : vector<2x128xf32>
    %156 = arith.negf %155 : vector<2x128xf32>
    %157 = math.exp %156 : vector<2x128xf32>
    %cst_114 = arith.constant 1.000000e+00 : f32
    %158 = vector.broadcast %cst_114 : f32 to vector<2x128xf32>
    %159 = arith.addf %158, %157 : vector<2x128xf32>
    %160 = arith.divf %158, %159 : vector<2x128xf32>
    %161 = math.tanh %155 : vector<2x128xf32>
    %162 = vector.extract_strided_slice %160 {offsets = [0, 32], sizes = [2, 32], strides = [1, 1]} : vector<2x128xf32> to vector<2x32xf32>
    %163 = arith.mulf %162, %131 : vector<2x32xf32>
    %164 = vector.extract_strided_slice %160 {offsets = [0, 0], sizes = [2, 32], strides = [1, 1]} : vector<2x128xf32> to vector<2x32xf32>
    %165 = vector.extract_strided_slice %161 {offsets = [0, 64], sizes = [2, 32], strides = [1, 1]} : vector<2x128xf32> to vector<2x32xf32>
    %166 = arith.mulf %164, %165 : vector<2x32xf32>
    %167 = arith.addf %163, %166 : vector<2x32xf32>
    %168 = vector.extract_strided_slice %160 {offsets = [0, 96], sizes = [2, 32], strides = [1, 1]} : vector<2x128xf32> to vector<2x32xf32>
    %169 = math.tanh %167 : vector<2x32xf32>
    %170 = arith.mulf %168, %169 : vector<2x32xf32>
    %171 = vector.extract_strided_slice %120 {offsets = [1, 0], sizes = [1, 128], strides = [1, 1]} : vector<32x128xf32> to vector<1x128xf32>
    %172 = vector.extract_strided_slice %120 {offsets = [17, 0], sizes = [1, 128], strides = [1, 1]} : vector<32x128xf32> to vector<1x128xf32>
    %173 = tpu.concatenate %171, %172 in 0 : vector<1x128xf32>, vector<1x128xf32> -> vector<2x128xf32>
    %cst_115 = arith.constant dense<0.000000e+00> : vector<2x128xf32>
    %174 = tpu.matmul %151, %121, %cst_115 {dimension_numbers = #tpu.dot_dimension_numbers<[1], [0], [0], [1], [0, 0, 1, 1], [], []>} : vector<2x32xf32>, vector<32x128xf32>, vector<2x128xf32> -> vector<2x128xf32>
    %175 = arith.addf %173, %174 : vector<2x128xf32>
    %176 = arith.negf %175 : vector<2x128xf32>
    %177 = math.exp %176 : vector<2x128xf32>
    %cst_116 = arith.constant 1.000000e+00 : f32
    %178 = vector.broadcast %cst_116 : f32 to vector<2x128xf32>
    %179 = arith.addf %178, %177 : vector<2x128xf32>
    %180 = arith.divf %178, %179 : vector<2x128xf32>
    %181 = math.tanh %175 : vector<2x128xf32>
    %182 = vector.extract_strided_slice %180 {offsets = [0, 32], sizes = [2, 32], strides = [1, 1]} : vector<2x128xf32> to vector<2x32xf32>
    %183 = arith.mulf %182, %148 : vector<2x32xf32>
    %184 = vector.extract_strided_slice %180 {offsets = [0, 0], sizes = [2, 32], strides = [1, 1]} : vector<2x128xf32> to vector<2x32xf32>
    %185 = vector.extract_strided_slice %181 {offsets = [0, 64], sizes = [2, 32], strides = [1, 1]} : vector<2x128xf32> to vector<2x32xf32>
    %186 = arith.mulf %184, %185 : vector<2x32xf32>
    %187 = arith.addf %183, %186 : vector<2x32xf32>
    %188 = vector.extract_strided_slice %180 {offsets = [0, 96], sizes = [2, 32], strides = [1, 1]} : vector<2x128xf32> to vector<2x32xf32>
    %189 = math.tanh %187 : vector<2x32xf32>
    %190 = arith.mulf %188, %189 : vector<2x32xf32>
    %191 = tpu.concatenate %190, %170 in 1 : vector<2x32xf32>, vector<2x32xf32> -> vector<2x64xf32>
    %cst_117 = arith.constant dense<0.000000e+00> : vector<2x128xf32>
    %192 = tpu.matmul %191, %122, %cst_117 {dimension_numbers = #tpu.dot_dimension_numbers<[1], [0], [0], [1], [0, 0, 1, 1], [], []>} : vector<2x64xf32>, vector<64x128xf32>, vector<2x128xf32> -> vector<2x128xf32>
    %193 = vector.broadcast %123 : vector<1x128xf32> to vector<2x128xf32>
    %194 = arith.addf %192, %193 : vector<2x128xf32>
    %195 = arith.negf %194 : vector<2x128xf32>
    %196 = math.exp %195 : vector<2x128xf32>
    %cst_118 = arith.constant 1.000000e+00 : f32
    %197 = vector.broadcast %cst_118 : f32 to vector<2x128xf32>
    %198 = arith.addf %197, %196 : vector<2x128xf32>
    %199 = arith.divf %197, %198 : vector<2x128xf32>
    %200 = math.tanh %194 : vector<2x128xf32>
    %201 = vector.extract_strided_slice %199 {offsets = [0, 32], sizes = [2, 32], strides = [1, 1]} : vector<2x128xf32> to vector<2x32xf32>
    %202 = arith.mulf %201, %167 : vector<2x32xf32>
    %203 = vector.extract_strided_slice %199 {offsets = [0, 0], sizes = [2, 32], strides = [1, 1]} : vector<2x128xf32> to vector<2x32xf32>
    %204 = vector.extract_strided_slice %200 {offsets = [0, 64], sizes = [2, 32], strides = [1, 1]} : vector<2x128xf32> to vector<2x32xf32>
    %205 = arith.mulf %203, %204 : vector<2x32xf32>
    %206 = arith.addf %202, %205 : vector<2x32xf32>
    %207 = vector.extract_strided_slice %199 {offsets = [0, 96], sizes = [2, 32], strides = [1, 1]} : vector<2x128xf32> to vector<2x32xf32>
    %208 = math.tanh %206 : vector<2x32xf32>
    %209 = arith.mulf %207, %208 : vector<2x32xf32>
    %210 = vector.extract_strided_slice %120 {offsets = [2, 0], sizes = [1, 128], strides = [1, 1]} : vector<32x128xf32> to vector<1x128xf32>
    %211 = vector.extract_strided_slice %120 {offsets = [18, 0], sizes = [1, 128], strides = [1, 1]} : vector<32x128xf32> to vector<1x128xf32>
    %212 = tpu.concatenate %210, %211 in 0 : vector<1x128xf32>, vector<1x128xf32> -> vector<2x128xf32>
    %cst_119 = arith.constant dense<0.000000e+00> : vector<2x128xf32>
    %213 = tpu.matmul %190, %121, %cst_119 {dimension_numbers = #tpu.dot_dimension_numbers<[1], [0], [0], [1], [0, 0, 1, 1], [], []>} : vector<2x32xf32>, vector<32x128xf32>, vector<2x128xf32> -> vector<2x128xf32>
    %214 = arith.addf %212, %213 : vector<2x128xf32>
    %215 = arith.negf %214 : vector<2x128xf32>
    %216 = math.exp %215 : vector<2x128xf32>
    %cst_120 = arith.constant 1.000000e+00 : f32
    %217 = vector.broadcast %cst_120 : f32 to vector<2x128xf32>
    %218 = arith.addf %217, %216 : vector<2x128xf32>
    %219 = arith.divf %217, %218 : vector<2x128xf32>
    %220 = math.tanh %214 : vector<2x128xf32>
    %221 = vector.extract_strided_slice %219 {offsets = [0, 32], sizes = [2, 32], strides = [1, 1]} : vector<2x128xf32> to vector<2x32xf32>
    %222 = arith.mulf %221, %187 : vector<2x32xf32>
    %223 = vector.extract_strided_slice %219 {offsets = [0, 0], sizes = [2, 32], strides = [1, 1]} : vector<2x128xf32> to vector<2x32xf32>
    %224 = vector.extract_strided_slice %220 {offsets = [0, 64], sizes = [2, 32], strides = [1, 1]} : vector<2x128xf32> to vector<2x32xf32>
    %225 = arith.mulf %223, %224 : vector<2x32xf32>
    %226 = arith.addf %222, %225 : vector<2x32xf32>
    %227 = vector.extract_strided_slice %219 {offsets = [0, 96], sizes = [2, 32], strides = [1, 1]} : vector<2x128xf32> to vector<2x32xf32>
    %228 = math.tanh %226 : vector<2x32xf32>
    %229 = arith.mulf %227, %228 : vector<2x32xf32>
    %230 = tpu.concatenate %229, %209 in 1 : vector<2x32xf32>, vector<2x32xf32> -> vector<2x64xf32>
    %cst_121 = arith.constant dense<0.000000e+00> : vector<2x128xf32>
    %231 = tpu.matmul %230, %122, %cst_121 {dimension_numbers = #tpu.dot_dimension_numbers<[1], [0], [0], [1], [0, 0, 1, 1], [], []>} : vector<2x64xf32>, vector<64x128xf32>, vector<2x128xf32> -> vector<2x128xf32>
    %232 = vector.broadcast %123 : vector<1x128xf32> to vector<2x128xf32>
    %233 = arith.addf %231, %232 : vector<2x128xf32>
    %234 = arith.negf %233 : vector<2x128xf32>
    %235 = math.exp %234 : vector<2x128xf32>
    %cst_122 = arith.constant 1.000000e+00 : f32
    %236 = vector.broadcast %cst_122 : f32 to vector<2x128xf32>
    %237 = arith.addf %236, %235 : vector<2x128xf32>
    %238 = arith.divf %236, %237 : vector<2x128xf32>
    %239 = math.tanh %233 : vector<2x128xf32>
    %240 = vector.extract_strided_slice %238 {offsets = [0, 32], sizes = [2, 32], strides = [1, 1]} : vector<2x128xf32> to vector<2x32xf32>
    %241 = arith.mulf %240, %206 : vector<2x32xf32>
    %242 = vector.extract_strided_slice %238 {offsets = [0, 0], sizes = [2, 32], strides = [1, 1]} : vector<2x128xf32> to vector<2x32xf32>
    %243 = vector.extract_strided_slice %239 {offsets = [0, 64], sizes = [2, 32], strides = [1, 1]} : vector<2x128xf32> to vector<2x32xf32>
    %244 = arith.mulf %242, %243 : vector<2x32xf32>
    %245 = arith.addf %241, %244 : vector<2x32xf32>
    %246 = vector.extract_strided_slice %238 {offsets = [0, 96], sizes = [2, 32], strides = [1, 1]} : vector<2x128xf32> to vector<2x32xf32>
    %247 = math.tanh %245 : vector<2x32xf32>
    %248 = arith.mulf %246, %247 : vector<2x32xf32>
    %249 = vector.extract_strided_slice %120 {offsets = [3, 0], sizes = [1, 128], strides = [1, 1]} : vector<32x128xf32> to vector<1x128xf32>
    %250 = vector.extract_strided_slice %120 {offsets = [19, 0], sizes = [1, 128], strides = [1, 1]} : vector<32x128xf32> to vector<1x128xf32>
    %251 = tpu.concatenate %249, %250 in 0 : vector<1x128xf32>, vector<1x128xf32> -> vector<2x128xf32>
    %cst_123 = arith.constant dense<0.000000e+00> : vector<2x128xf32>
    %252 = tpu.matmul %229, %121, %cst_123 {dimension_numbers = #tpu.dot_dimension_numbers<[1], [0], [0], [1], [0, 0, 1, 1], [], []>} : vector<2x32xf32>, vector<32x128xf32>, vector<2x128xf32> -> vector<2x128xf32>
    %253 = arith.addf %251, %252 : vector<2x128xf32>
    %254 = arith.negf %253 : vector<2x128xf32>
    %255 = math.exp %254 : vector<2x128xf32>
    %cst_124 = arith.constant 1.000000e+00 : f32
    %256 = vector.broadcast %cst_124 : f32 to vector<2x128xf32>
    %257 = arith.addf %256, %255 : vector<2x128xf32>
    %258 = arith.divf %256, %257 : vector<2x128xf32>
    %259 = math.tanh %253 : vector<2x128xf32>
    %260 = vector.extract_strided_slice %258 {offsets = [0, 32], sizes = [2, 32], strides = [1, 1]} : vector<2x128xf32> to vector<2x32xf32>
    %261 = arith.mulf %260, %226 : vector<2x32xf32>
    %262 = vector.extract_strided_slice %258 {offsets = [0, 0], sizes = [2, 32], strides = [1, 1]} : vector<2x128xf32> to vector<2x32xf32>
    %263 = vector.extract_strided_slice %259 {offsets = [0, 64], sizes = [2, 32], strides = [1, 1]} : vector<2x128xf32> to vector<2x32xf32>
    %264 = arith.mulf %262, %263 : vector<2x32xf32>
    %265 = arith.addf %261, %264 : vector<2x32xf32>
    %266 = vector.extract_strided_slice %258 {offsets = [0, 96], sizes = [2, 32], strides = [1, 1]} : vector<2x128xf32> to vector<2x32xf32>
    %267 = math.tanh %265 : vector<2x32xf32>
    %268 = arith.mulf %266, %267 : vector<2x32xf32>
    %269 = tpu.concatenate %268, %248 in 1 : vector<2x32xf32>, vector<2x32xf32> -> vector<2x64xf32>
    %cst_125 = arith.constant dense<0.000000e+00> : vector<2x128xf32>
    %270 = tpu.matmul %269, %122, %cst_125 {dimension_numbers = #tpu.dot_dimension_numbers<[1], [0], [0], [1], [0, 0, 1, 1], [], []>} : vector<2x64xf32>, vector<64x128xf32>, vector<2x128xf32> -> vector<2x128xf32>
    %271 = vector.broadcast %123 : vector<1x128xf32> to vector<2x128xf32>
    %272 = arith.addf %270, %271 : vector<2x128xf32>
    %273 = arith.negf %272 : vector<2x128xf32>
    %274 = math.exp %273 : vector<2x128xf32>
    %cst_126 = arith.constant 1.000000e+00 : f32
    %275 = vector.broadcast %cst_126 : f32 to vector<2x128xf32>
    %276 = arith.addf %275, %274 : vector<2x128xf32>
    %277 = arith.divf %275, %276 : vector<2x128xf32>
    %278 = math.tanh %272 : vector<2x128xf32>
    %279 = vector.extract_strided_slice %277 {offsets = [0, 32], sizes = [2, 32], strides = [1, 1]} : vector<2x128xf32> to vector<2x32xf32>
    %280 = arith.mulf %279, %245 : vector<2x32xf32>
    %281 = vector.extract_strided_slice %277 {offsets = [0, 0], sizes = [2, 32], strides = [1, 1]} : vector<2x128xf32> to vector<2x32xf32>
    %282 = vector.extract_strided_slice %278 {offsets = [0, 64], sizes = [2, 32], strides = [1, 1]} : vector<2x128xf32> to vector<2x32xf32>
    %283 = arith.mulf %281, %282 : vector<2x32xf32>
    %284 = arith.addf %280, %283 : vector<2x32xf32>
    %285 = vector.extract_strided_slice %277 {offsets = [0, 96], sizes = [2, 32], strides = [1, 1]} : vector<2x128xf32> to vector<2x32xf32>
    %286 = math.tanh %284 : vector<2x32xf32>
    %287 = arith.mulf %285, %286 : vector<2x32xf32>
    %288 = vector.extract_strided_slice %120 {offsets = [4, 0], sizes = [1, 128], strides = [1, 1]} : vector<32x128xf32> to vector<1x128xf32>
    %289 = vector.extract_strided_slice %120 {offsets = [20, 0], sizes = [1, 128], strides = [1, 1]} : vector<32x128xf32> to vector<1x128xf32>
    %290 = tpu.concatenate %288, %289 in 0 : vector<1x128xf32>, vector<1x128xf32> -> vector<2x128xf32>
    %cst_127 = arith.constant dense<0.000000e+00> : vector<2x128xf32>
    %291 = tpu.matmul %268, %121, %cst_127 {dimension_numbers = #tpu.dot_dimension_numbers<[1], [0], [0], [1], [0, 0, 1, 1], [], []>} : vector<2x32xf32>, vector<32x128xf32>, vector<2x128xf32> -> vector<2x128xf32>
    %292 = arith.addf %290, %291 : vector<2x128xf32>
    %293 = arith.negf %292 : vector<2x128xf32>
    %294 = math.exp %293 : vector<2x128xf32>
    %cst_128 = arith.constant 1.000000e+00 : f32
    %295 = vector.broadcast %cst_128 : f32 to vector<2x128xf32>
    %296 = arith.addf %295, %294 : vector<2x128xf32>
    %297 = arith.divf %295, %296 : vector<2x128xf32>
    %298 = math.tanh %292 : vector<2x128xf32>
    %299 = vector.extract_strided_slice %297 {offsets = [0, 32], sizes = [2, 32], strides = [1, 1]} : vector<2x128xf32> to vector<2x32xf32>
    %300 = arith.mulf %299, %265 : vector<2x32xf32>
    %301 = vector.extract_strided_slice %297 {offsets = [0, 0], sizes = [2, 32], strides = [1, 1]} : vector<2x128xf32> to vector<2x32xf32>
    %302 = vector.extract_strided_slice %298 {offsets = [0, 64], sizes = [2, 32], strides = [1, 1]} : vector<2x128xf32> to vector<2x32xf32>
    %303 = arith.mulf %301, %302 : vector<2x32xf32>
    %304 = arith.addf %300, %303 : vector<2x32xf32>
    %305 = vector.extract_strided_slice %297 {offsets = [0, 96], sizes = [2, 32], strides = [1, 1]} : vector<2x128xf32> to vector<2x32xf32>
    %306 = math.tanh %304 : vector<2x32xf32>
    %307 = arith.mulf %305, %306 : vector<2x32xf32>
    %308 = tpu.concatenate %307, %287 in 1 : vector<2x32xf32>, vector<2x32xf32> -> vector<2x64xf32>
    %cst_129 = arith.constant dense<0.000000e+00> : vector<2x128xf32>
    %309 = tpu.matmul %308, %122, %cst_129 {dimension_numbers = #tpu.dot_dimension_numbers<[1], [0], [0], [1], [0, 0, 1, 1], [], []>} : vector<2x64xf32>, vector<64x128xf32>, vector<2x128xf32> -> vector<2x128xf32>
    %310 = vector.broadcast %123 : vector<1x128xf32> to vector<2x128xf32>
    %311 = arith.addf %309, %310 : vector<2x128xf32>
    %312 = arith.negf %311 : vector<2x128xf32>
    %313 = math.exp %312 : vector<2x128xf32>
    %cst_130 = arith.constant 1.000000e+00 : f32
    %314 = vector.broadcast %cst_130 : f32 to vector<2x128xf32>
    %315 = arith.addf %314, %313 : vector<2x128xf32>
    %316 = arith.divf %314, %315 : vector<2x128xf32>
    %317 = math.tanh %311 : vector<2x128xf32>
    %318 = vector.extract_strided_slice %316 {offsets = [0, 32], sizes = [2, 32], strides = [1, 1]} : vector<2x128xf32> to vector<2x32xf32>
    %319 = arith.mulf %318, %284 : vector<2x32xf32>
    %320 = vector.extract_strided_slice %316 {offsets = [0, 0], sizes = [2, 32], strides = [1, 1]} : vector<2x128xf32> to vector<2x32xf32>
    %321 = vector.extract_strided_slice %317 {offsets = [0, 64], sizes = [2, 32], strides = [1, 1]} : vector<2x128xf32> to vector<2x32xf32>
    %322 = arith.mulf %320, %321 : vector<2x32xf32>
    %323 = arith.addf %319, %322 : vector<2x32xf32>
    %324 = vector.extract_strided_slice %316 {offsets = [0, 96], sizes = [2, 32], strides = [1, 1]} : vector<2x128xf32> to vector<2x32xf32>
    %325 = math.tanh %323 : vector<2x32xf32>
    %326 = arith.mulf %324, %325 : vector<2x32xf32>
    %327 = vector.extract_strided_slice %120 {offsets = [5, 0], sizes = [1, 128], strides = [1, 1]} : vector<32x128xf32> to vector<1x128xf32>
    %328 = vector.extract_strided_slice %120 {offsets = [21, 0], sizes = [1, 128], strides = [1, 1]} : vector<32x128xf32> to vector<1x128xf32>
    %329 = tpu.concatenate %327, %328 in 0 : vector<1x128xf32>, vector<1x128xf32> -> vector<2x128xf32>
    %cst_131 = arith.constant dense<0.000000e+00> : vector<2x128xf32>
    %330 = tpu.matmul %307, %121, %cst_131 {dimension_numbers = #tpu.dot_dimension_numbers<[1], [0], [0], [1], [0, 0, 1, 1], [], []>} : vector<2x32xf32>, vector<32x128xf32>, vector<2x128xf32> -> vector<2x128xf32>
    %331 = arith.addf %329, %330 : vector<2x128xf32>
    %332 = arith.negf %331 : vector<2x128xf32>
    %333 = math.exp %332 : vector<2x128xf32>
    %cst_132 = arith.constant 1.000000e+00 : f32
    %334 = vector.broadcast %cst_132 : f32 to vector<2x128xf32>
    %335 = arith.addf %334, %333 : vector<2x128xf32>
    %336 = arith.divf %334, %335 : vector<2x128xf32>
    %337 = math.tanh %331 : vector<2x128xf32>
    %338 = vector.extract_strided_slice %336 {offsets = [0, 32], sizes = [2, 32], strides = [1, 1]} : vector<2x128xf32> to vector<2x32xf32>
    %339 = arith.mulf %338, %304 : vector<2x32xf32>
    %340 = vector.extract_strided_slice %336 {offsets = [0, 0], sizes = [2, 32], strides = [1, 1]} : vector<2x128xf32> to vector<2x32xf32>
    %341 = vector.extract_strided_slice %337 {offsets = [0, 64], sizes = [2, 32], strides = [1, 1]} : vector<2x128xf32> to vector<2x32xf32>
    %342 = arith.mulf %340, %341 : vector<2x32xf32>
    %343 = arith.addf %339, %342 : vector<2x32xf32>
    %344 = vector.extract_strided_slice %336 {offsets = [0, 96], sizes = [2, 32], strides = [1, 1]} : vector<2x128xf32> to vector<2x32xf32>
    %345 = math.tanh %343 : vector<2x32xf32>
    %346 = arith.mulf %344, %345 : vector<2x32xf32>
    %347 = tpu.concatenate %346, %326 in 1 : vector<2x32xf32>, vector<2x32xf32> -> vector<2x64xf32>
    %cst_133 = arith.constant dense<0.000000e+00> : vector<2x128xf32>
    %348 = tpu.matmul %347, %122, %cst_133 {dimension_numbers = #tpu.dot_dimension_numbers<[1], [0], [0], [1], [0, 0, 1, 1], [], []>} : vector<2x64xf32>, vector<64x128xf32>, vector<2x128xf32> -> vector<2x128xf32>
    %349 = vector.broadcast %123 : vector<1x128xf32> to vector<2x128xf32>
    %350 = arith.addf %348, %349 : vector<2x128xf32>
    %351 = arith.negf %350 : vector<2x128xf32>
    %352 = math.exp %351 : vector<2x128xf32>
    %cst_134 = arith.constant 1.000000e+00 : f32
    %353 = vector.broadcast %cst_134 : f32 to vector<2x128xf32>
    %354 = arith.addf %353, %352 : vector<2x128xf32>
    %355 = arith.divf %353, %354 : vector<2x128xf32>
    %356 = math.tanh %350 : vector<2x128xf32>
    %357 = vector.extract_strided_slice %355 {offsets = [0, 32], sizes = [2, 32], strides = [1, 1]} : vector<2x128xf32> to vector<2x32xf32>
    %358 = arith.mulf %357, %323 : vector<2x32xf32>
    %359 = vector.extract_strided_slice %355 {offsets = [0, 0], sizes = [2, 32], strides = [1, 1]} : vector<2x128xf32> to vector<2x32xf32>
    %360 = vector.extract_strided_slice %356 {offsets = [0, 64], sizes = [2, 32], strides = [1, 1]} : vector<2x128xf32> to vector<2x32xf32>
    %361 = arith.mulf %359, %360 : vector<2x32xf32>
    %362 = arith.addf %358, %361 : vector<2x32xf32>
    %363 = vector.extract_strided_slice %355 {offsets = [0, 96], sizes = [2, 32], strides = [1, 1]} : vector<2x128xf32> to vector<2x32xf32>
    %364 = math.tanh %362 : vector<2x32xf32>
    %365 = arith.mulf %363, %364 : vector<2x32xf32>
    %366 = vector.extract_strided_slice %120 {offsets = [6, 0], sizes = [1, 128], strides = [1, 1]} : vector<32x128xf32> to vector<1x128xf32>
    %367 = vector.extract_strided_slice %120 {offsets = [22, 0], sizes = [1, 128], strides = [1, 1]} : vector<32x128xf32> to vector<1x128xf32>
    %368 = tpu.concatenate %366, %367 in 0 : vector<1x128xf32>, vector<1x128xf32> -> vector<2x128xf32>
    %cst_135 = arith.constant dense<0.000000e+00> : vector<2x128xf32>
    %369 = tpu.matmul %346, %121, %cst_135 {dimension_numbers = #tpu.dot_dimension_numbers<[1], [0], [0], [1], [0, 0, 1, 1], [], []>} : vector<2x32xf32>, vector<32x128xf32>, vector<2x128xf32> -> vector<2x128xf32>
    %370 = arith.addf %368, %369 : vector<2x128xf32>
    %371 = arith.negf %370 : vector<2x128xf32>
    %372 = math.exp %371 : vector<2x128xf32>
    %cst_136 = arith.constant 1.000000e+00 : f32
    %373 = vector.broadcast %cst_136 : f32 to vector<2x128xf32>
    %374 = arith.addf %373, %372 : vector<2x128xf32>
    %375 = arith.divf %373, %374 : vector<2x128xf32>
    %376 = math.tanh %370 : vector<2x128xf32>
    %377 = vector.extract_strided_slice %375 {offsets = [0, 32], sizes = [2, 32], strides = [1, 1]} : vector<2x128xf32> to vector<2x32xf32>
    %378 = arith.mulf %377, %343 : vector<2x32xf32>
    %379 = vector.extract_strided_slice %375 {offsets = [0, 0], sizes = [2, 32], strides = [1, 1]} : vector<2x128xf32> to vector<2x32xf32>
    %380 = vector.extract_strided_slice %376 {offsets = [0, 64], sizes = [2, 32], strides = [1, 1]} : vector<2x128xf32> to vector<2x32xf32>
    %381 = arith.mulf %379, %380 : vector<2x32xf32>
    %382 = arith.addf %378, %381 : vector<2x32xf32>
    %383 = vector.extract_strided_slice %375 {offsets = [0, 96], sizes = [2, 32], strides = [1, 1]} : vector<2x128xf32> to vector<2x32xf32>
    %384 = math.tanh %382 : vector<2x32xf32>
    %385 = arith.mulf %383, %384 : vector<2x32xf32>
    %386 = tpu.concatenate %385, %365 in 1 : vector<2x32xf32>, vector<2x32xf32> -> vector<2x64xf32>
    %cst_137 = arith.constant dense<0.000000e+00> : vector<2x128xf32>
    %387 = tpu.matmul %386, %122, %cst_137 {dimension_numbers = #tpu.dot_dimension_numbers<[1], [0], [0], [1], [0, 0, 1, 1], [], []>} : vector<2x64xf32>, vector<64x128xf32>, vector<2x128xf32> -> vector<2x128xf32>
    %388 = vector.broadcast %123 : vector<1x128xf32> to vector<2x128xf32>
    %389 = arith.addf %387, %388 : vector<2x128xf32>
    %390 = arith.negf %389 : vector<2x128xf32>
    %391 = math.exp %390 : vector<2x128xf32>
    %cst_138 = arith.constant 1.000000e+00 : f32
    %392 = vector.broadcast %cst_138 : f32 to vector<2x128xf32>
    %393 = arith.addf %392, %391 : vector<2x128xf32>
    %394 = arith.divf %392, %393 : vector<2x128xf32>
    %395 = math.tanh %389 : vector<2x128xf32>
    %396 = vector.extract_strided_slice %394 {offsets = [0, 32], sizes = [2, 32], strides = [1, 1]} : vector<2x128xf32> to vector<2x32xf32>
    %397 = arith.mulf %396, %362 : vector<2x32xf32>
    %398 = vector.extract_strided_slice %394 {offsets = [0, 0], sizes = [2, 32], strides = [1, 1]} : vector<2x128xf32> to vector<2x32xf32>
    %399 = vector.extract_strided_slice %395 {offsets = [0, 64], sizes = [2, 32], strides = [1, 1]} : vector<2x128xf32> to vector<2x32xf32>
    %400 = arith.mulf %398, %399 : vector<2x32xf32>
    %401 = arith.addf %397, %400 : vector<2x32xf32>
    %402 = vector.extract_strided_slice %394 {offsets = [0, 96], sizes = [2, 32], strides = [1, 1]} : vector<2x128xf32> to vector<2x32xf32>
    %403 = math.tanh %401 : vector<2x32xf32>
    %404 = arith.mulf %402, %403 : vector<2x32xf32>
    %405 = vector.extract_strided_slice %120 {offsets = [7, 0], sizes = [1, 128], strides = [1, 1]} : vector<32x128xf32> to vector<1x128xf32>
    %406 = vector.extract_strided_slice %120 {offsets = [23, 0], sizes = [1, 128], strides = [1, 1]} : vector<32x128xf32> to vector<1x128xf32>
    %407 = tpu.concatenate %405, %406 in 0 : vector<1x128xf32>, vector<1x128xf32> -> vector<2x128xf32>
    %cst_139 = arith.constant dense<0.000000e+00> : vector<2x128xf32>
    %408 = tpu.matmul %385, %121, %cst_139 {dimension_numbers = #tpu.dot_dimension_numbers<[1], [0], [0], [1], [0, 0, 1, 1], [], []>} : vector<2x32xf32>, vector<32x128xf32>, vector<2x128xf32> -> vector<2x128xf32>
    %409 = arith.addf %407, %408 : vector<2x128xf32>
    %410 = arith.negf %409 : vector<2x128xf32>
    %411 = math.exp %410 : vector<2x128xf32>
    %cst_140 = arith.constant 1.000000e+00 : f32
    %412 = vector.broadcast %cst_140 : f32 to vector<2x128xf32>
    %413 = arith.addf %412, %411 : vector<2x128xf32>
    %414 = arith.divf %412, %413 : vector<2x128xf32>
    %415 = math.tanh %409 : vector<2x128xf32>
    %416 = vector.extract_strided_slice %414 {offsets = [0, 32], sizes = [2, 32], strides = [1, 1]} : vector<2x128xf32> to vector<2x32xf32>
    %417 = arith.mulf %416, %382 : vector<2x32xf32>
    %418 = vector.extract_strided_slice %414 {offsets = [0, 0], sizes = [2, 32], strides = [1, 1]} : vector<2x128xf32> to vector<2x32xf32>
    %419 = vector.extract_strided_slice %415 {offsets = [0, 64], sizes = [2, 32], strides = [1, 1]} : vector<2x128xf32> to vector<2x32xf32>
    %420 = arith.mulf %418, %419 : vector<2x32xf32>
    %421 = arith.addf %417, %420 : vector<2x32xf32>
    %422 = vector.extract_strided_slice %414 {offsets = [0, 96], sizes = [2, 32], strides = [1, 1]} : vector<2x128xf32> to vector<2x32xf32>
    %423 = math.tanh %421 : vector<2x32xf32>
    %424 = arith.mulf %422, %423 : vector<2x32xf32>
    %425 = tpu.concatenate %424, %404 in 1 : vector<2x32xf32>, vector<2x32xf32> -> vector<2x64xf32>
    %cst_141 = arith.constant dense<0.000000e+00> : vector<2x128xf32>
    %426 = tpu.matmul %425, %122, %cst_141 {dimension_numbers = #tpu.dot_dimension_numbers<[1], [0], [0], [1], [0, 0, 1, 1], [], []>} : vector<2x64xf32>, vector<64x128xf32>, vector<2x128xf32> -> vector<2x128xf32>
    %427 = vector.broadcast %123 : vector<1x128xf32> to vector<2x128xf32>
    %428 = arith.addf %426, %427 : vector<2x128xf32>
    %429 = arith.negf %428 : vector<2x128xf32>
    %430 = math.exp %429 : vector<2x128xf32>
    %cst_142 = arith.constant 1.000000e+00 : f32
    %431 = vector.broadcast %cst_142 : f32 to vector<2x128xf32>
    %432 = arith.addf %431, %430 : vector<2x128xf32>
    %433 = arith.divf %431, %432 : vector<2x128xf32>
    %434 = math.tanh %428 : vector<2x128xf32>
    %435 = vector.extract_strided_slice %433 {offsets = [0, 32], sizes = [2, 32], strides = [1, 1]} : vector<2x128xf32> to vector<2x32xf32>
    %436 = arith.mulf %435, %401 : vector<2x32xf32>
    %437 = vector.extract_strided_slice %433 {offsets = [0, 0], sizes = [2, 32], strides = [1, 1]} : vector<2x128xf32> to vector<2x32xf32>
    %438 = vector.extract_strided_slice %434 {offsets = [0, 64], sizes = [2, 32], strides = [1, 1]} : vector<2x128xf32> to vector<2x32xf32>
    %439 = arith.mulf %437, %438 : vector<2x32xf32>
    %440 = arith.addf %436, %439 : vector<2x32xf32>
    %441 = vector.extract_strided_slice %433 {offsets = [0, 96], sizes = [2, 32], strides = [1, 1]} : vector<2x128xf32> to vector<2x32xf32>
    %442 = math.tanh %440 : vector<2x32xf32>
    %443 = arith.mulf %441, %442 : vector<2x32xf32>
    %444 = vector.extract_strided_slice %120 {offsets = [8, 0], sizes = [1, 128], strides = [1, 1]} : vector<32x128xf32> to vector<1x128xf32>
    %445 = vector.extract_strided_slice %120 {offsets = [24, 0], sizes = [1, 128], strides = [1, 1]} : vector<32x128xf32> to vector<1x128xf32>
    %446 = tpu.concatenate %444, %445 in 0 : vector<1x128xf32>, vector<1x128xf32> -> vector<2x128xf32>
    %cst_143 = arith.constant dense<0.000000e+00> : vector<2x128xf32>
    %447 = tpu.matmul %424, %121, %cst_143 {dimension_numbers = #tpu.dot_dimension_numbers<[1], [0], [0], [1], [0, 0, 1, 1], [], []>} : vector<2x32xf32>, vector<32x128xf32>, vector<2x128xf32> -> vector<2x128xf32>
    %448 = arith.addf %446, %447 : vector<2x128xf32>
    %449 = arith.negf %448 : vector<2x128xf32>
    %450 = math.exp %449 : vector<2x128xf32>
    %cst_144 = arith.constant 1.000000e+00 : f32
    %451 = vector.broadcast %cst_144 : f32 to vector<2x128xf32>
    %452 = arith.addf %451, %450 : vector<2x128xf32>
    %453 = arith.divf %451, %452 : vector<2x128xf32>
    %454 = math.tanh %448 : vector<2x128xf32>
    %455 = vector.extract_strided_slice %453 {offsets = [0, 32], sizes = [2, 32], strides = [1, 1]} : vector<2x128xf32> to vector<2x32xf32>
    %456 = arith.mulf %455, %421 : vector<2x32xf32>
    %457 = vector.extract_strided_slice %453 {offsets = [0, 0], sizes = [2, 32], strides = [1, 1]} : vector<2x128xf32> to vector<2x32xf32>
    %458 = vector.extract_strided_slice %454 {offsets = [0, 64], sizes = [2, 32], strides = [1, 1]} : vector<2x128xf32> to vector<2x32xf32>
    %459 = arith.mulf %457, %458 : vector<2x32xf32>
    %460 = arith.addf %456, %459 : vector<2x32xf32>
    %461 = vector.extract_strided_slice %453 {offsets = [0, 96], sizes = [2, 32], strides = [1, 1]} : vector<2x128xf32> to vector<2x32xf32>
    %462 = math.tanh %460 : vector<2x32xf32>
    %463 = arith.mulf %461, %462 : vector<2x32xf32>
    %464 = tpu.concatenate %463, %443 in 1 : vector<2x32xf32>, vector<2x32xf32> -> vector<2x64xf32>
    %cst_145 = arith.constant dense<0.000000e+00> : vector<2x128xf32>
    %465 = tpu.matmul %464, %122, %cst_145 {dimension_numbers = #tpu.dot_dimension_numbers<[1], [0], [0], [1], [0, 0, 1, 1], [], []>} : vector<2x64xf32>, vector<64x128xf32>, vector<2x128xf32> -> vector<2x128xf32>
    %466 = vector.broadcast %123 : vector<1x128xf32> to vector<2x128xf32>
    %467 = arith.addf %465, %466 : vector<2x128xf32>
    %468 = arith.negf %467 : vector<2x128xf32>
    %469 = math.exp %468 : vector<2x128xf32>
    %cst_146 = arith.constant 1.000000e+00 : f32
    %470 = vector.broadcast %cst_146 : f32 to vector<2x128xf32>
    %471 = arith.addf %470, %469 : vector<2x128xf32>
    %472 = arith.divf %470, %471 : vector<2x128xf32>
    %473 = math.tanh %467 : vector<2x128xf32>
    %474 = vector.extract_strided_slice %472 {offsets = [0, 32], sizes = [2, 32], strides = [1, 1]} : vector<2x128xf32> to vector<2x32xf32>
    %475 = arith.mulf %474, %440 : vector<2x32xf32>
    %476 = vector.extract_strided_slice %472 {offsets = [0, 0], sizes = [2, 32], strides = [1, 1]} : vector<2x128xf32> to vector<2x32xf32>
    %477 = vector.extract_strided_slice %473 {offsets = [0, 64], sizes = [2, 32], strides = [1, 1]} : vector<2x128xf32> to vector<2x32xf32>
    %478 = arith.mulf %476, %477 : vector<2x32xf32>
    %479 = arith.addf %475, %478 : vector<2x32xf32>
    %480 = vector.extract_strided_slice %472 {offsets = [0, 96], sizes = [2, 32], strides = [1, 1]} : vector<2x128xf32> to vector<2x32xf32>
    %481 = math.tanh %479 : vector<2x32xf32>
    %482 = arith.mulf %480, %481 : vector<2x32xf32>
    %483 = vector.extract_strided_slice %120 {offsets = [9, 0], sizes = [1, 128], strides = [1, 1]} : vector<32x128xf32> to vector<1x128xf32>
    %484 = vector.extract_strided_slice %120 {offsets = [25, 0], sizes = [1, 128], strides = [1, 1]} : vector<32x128xf32> to vector<1x128xf32>
    %485 = tpu.concatenate %483, %484 in 0 : vector<1x128xf32>, vector<1x128xf32> -> vector<2x128xf32>
    %cst_147 = arith.constant dense<0.000000e+00> : vector<2x128xf32>
    %486 = tpu.matmul %463, %121, %cst_147 {dimension_numbers = #tpu.dot_dimension_numbers<[1], [0], [0], [1], [0, 0, 1, 1], [], []>} : vector<2x32xf32>, vector<32x128xf32>, vector<2x128xf32> -> vector<2x128xf32>
    %487 = arith.addf %485, %486 : vector<2x128xf32>
    %488 = arith.negf %487 : vector<2x128xf32>
    %489 = math.exp %488 : vector<2x128xf32>
    %cst_148 = arith.constant 1.000000e+00 : f32
    %490 = vector.broadcast %cst_148 : f32 to vector<2x128xf32>
    %491 = arith.addf %490, %489 : vector<2x128xf32>
    %492 = arith.divf %490, %491 : vector<2x128xf32>
    %493 = math.tanh %487 : vector<2x128xf32>
    %494 = vector.extract_strided_slice %492 {offsets = [0, 32], sizes = [2, 32], strides = [1, 1]} : vector<2x128xf32> to vector<2x32xf32>
    %495 = arith.mulf %494, %460 : vector<2x32xf32>
    %496 = vector.extract_strided_slice %492 {offsets = [0, 0], sizes = [2, 32], strides = [1, 1]} : vector<2x128xf32> to vector<2x32xf32>
    %497 = vector.extract_strided_slice %493 {offsets = [0, 64], sizes = [2, 32], strides = [1, 1]} : vector<2x128xf32> to vector<2x32xf32>
    %498 = arith.mulf %496, %497 : vector<2x32xf32>
    %499 = arith.addf %495, %498 : vector<2x32xf32>
    %500 = vector.extract_strided_slice %492 {offsets = [0, 96], sizes = [2, 32], strides = [1, 1]} : vector<2x128xf32> to vector<2x32xf32>
    %501 = math.tanh %499 : vector<2x32xf32>
    %502 = arith.mulf %500, %501 : vector<2x32xf32>
    %503 = tpu.concatenate %502, %482 in 1 : vector<2x32xf32>, vector<2x32xf32> -> vector<2x64xf32>
    %cst_149 = arith.constant dense<0.000000e+00> : vector<2x128xf32>
    %504 = tpu.matmul %503, %122, %cst_149 {dimension_numbers = #tpu.dot_dimension_numbers<[1], [0], [0], [1], [0, 0, 1, 1], [], []>} : vector<2x64xf32>, vector<64x128xf32>, vector<2x128xf32> -> vector<2x128xf32>
    %505 = vector.broadcast %123 : vector<1x128xf32> to vector<2x128xf32>
    %506 = arith.addf %504, %505 : vector<2x128xf32>
    %507 = arith.negf %506 : vector<2x128xf32>
    %508 = math.exp %507 : vector<2x128xf32>
    %cst_150 = arith.constant 1.000000e+00 : f32
    %509 = vector.broadcast %cst_150 : f32 to vector<2x128xf32>
    %510 = arith.addf %509, %508 : vector<2x128xf32>
    %511 = arith.divf %509, %510 : vector<2x128xf32>
    %512 = math.tanh %506 : vector<2x128xf32>
    %513 = vector.extract_strided_slice %511 {offsets = [0, 32], sizes = [2, 32], strides = [1, 1]} : vector<2x128xf32> to vector<2x32xf32>
    %514 = arith.mulf %513, %479 : vector<2x32xf32>
    %515 = vector.extract_strided_slice %511 {offsets = [0, 0], sizes = [2, 32], strides = [1, 1]} : vector<2x128xf32> to vector<2x32xf32>
    %516 = vector.extract_strided_slice %512 {offsets = [0, 64], sizes = [2, 32], strides = [1, 1]} : vector<2x128xf32> to vector<2x32xf32>
    %517 = arith.mulf %515, %516 : vector<2x32xf32>
    %518 = arith.addf %514, %517 : vector<2x32xf32>
    %519 = vector.extract_strided_slice %511 {offsets = [0, 96], sizes = [2, 32], strides = [1, 1]} : vector<2x128xf32> to vector<2x32xf32>
    %520 = math.tanh %518 : vector<2x32xf32>
    %521 = arith.mulf %519, %520 : vector<2x32xf32>
    %522 = vector.extract_strided_slice %120 {offsets = [10, 0], sizes = [1, 128], strides = [1, 1]} : vector<32x128xf32> to vector<1x128xf32>
    %523 = vector.extract_strided_slice %120 {offsets = [26, 0], sizes = [1, 128], strides = [1, 1]} : vector<32x128xf32> to vector<1x128xf32>
    %524 = tpu.concatenate %522, %523 in 0 : vector<1x128xf32>, vector<1x128xf32> -> vector<2x128xf32>
    %cst_151 = arith.constant dense<0.000000e+00> : vector<2x128xf32>
    %525 = tpu.matmul %502, %121, %cst_151 {dimension_numbers = #tpu.dot_dimension_numbers<[1], [0], [0], [1], [0, 0, 1, 1], [], []>} : vector<2x32xf32>, vector<32x128xf32>, vector<2x128xf32> -> vector<2x128xf32>
    %526 = arith.addf %524, %525 : vector<2x128xf32>
    %527 = arith.negf %526 : vector<2x128xf32>
    %528 = math.exp %527 : vector<2x128xf32>
    %cst_152 = arith.constant 1.000000e+00 : f32
    %529 = vector.broadcast %cst_152 : f32 to vector<2x128xf32>
    %530 = arith.addf %529, %528 : vector<2x128xf32>
    %531 = arith.divf %529, %530 : vector<2x128xf32>
    %532 = math.tanh %526 : vector<2x128xf32>
    %533 = vector.extract_strided_slice %531 {offsets = [0, 32], sizes = [2, 32], strides = [1, 1]} : vector<2x128xf32> to vector<2x32xf32>
    %534 = arith.mulf %533, %499 : vector<2x32xf32>
    %535 = vector.extract_strided_slice %531 {offsets = [0, 0], sizes = [2, 32], strides = [1, 1]} : vector<2x128xf32> to vector<2x32xf32>
    %536 = vector.extract_strided_slice %532 {offsets = [0, 64], sizes = [2, 32], strides = [1, 1]} : vector<2x128xf32> to vector<2x32xf32>
    %537 = arith.mulf %535, %536 : vector<2x32xf32>
    %538 = arith.addf %534, %537 : vector<2x32xf32>
    %539 = vector.extract_strided_slice %531 {offsets = [0, 96], sizes = [2, 32], strides = [1, 1]} : vector<2x128xf32> to vector<2x32xf32>
    %540 = math.tanh %538 : vector<2x32xf32>
    %541 = arith.mulf %539, %540 : vector<2x32xf32>
    %542 = tpu.concatenate %541, %521 in 1 : vector<2x32xf32>, vector<2x32xf32> -> vector<2x64xf32>
    %cst_153 = arith.constant dense<0.000000e+00> : vector<2x128xf32>
    %543 = tpu.matmul %542, %122, %cst_153 {dimension_numbers = #tpu.dot_dimension_numbers<[1], [0], [0], [1], [0, 0, 1, 1], [], []>} : vector<2x64xf32>, vector<64x128xf32>, vector<2x128xf32> -> vector<2x128xf32>
    %544 = vector.broadcast %123 : vector<1x128xf32> to vector<2x128xf32>
    %545 = arith.addf %543, %544 : vector<2x128xf32>
    %546 = arith.negf %545 : vector<2x128xf32>
    %547 = math.exp %546 : vector<2x128xf32>
    %cst_154 = arith.constant 1.000000e+00 : f32
    %548 = vector.broadcast %cst_154 : f32 to vector<2x128xf32>
    %549 = arith.addf %548, %547 : vector<2x128xf32>
    %550 = arith.divf %548, %549 : vector<2x128xf32>
    %551 = math.tanh %545 : vector<2x128xf32>
    %552 = vector.extract_strided_slice %550 {offsets = [0, 32], sizes = [2, 32], strides = [1, 1]} : vector<2x128xf32> to vector<2x32xf32>
    %553 = arith.mulf %552, %518 : vector<2x32xf32>
    %554 = vector.extract_strided_slice %550 {offsets = [0, 0], sizes = [2, 32], strides = [1, 1]} : vector<2x128xf32> to vector<2x32xf32>
    %555 = vector.extract_strided_slice %551 {offsets = [0, 64], sizes = [2, 32], strides = [1, 1]} : vector<2x128xf32> to vector<2x32xf32>
    %556 = arith.mulf %554, %555 : vector<2x32xf32>
    %557 = arith.addf %553, %556 : vector<2x32xf32>
    %558 = vector.extract_strided_slice %550 {offsets = [0, 96], sizes = [2, 32], strides = [1, 1]} : vector<2x128xf32> to vector<2x32xf32>
    %559 = math.tanh %557 : vector<2x32xf32>
    %560 = arith.mulf %558, %559 : vector<2x32xf32>
    %561 = vector.extract_strided_slice %120 {offsets = [11, 0], sizes = [1, 128], strides = [1, 1]} : vector<32x128xf32> to vector<1x128xf32>
    %562 = vector.extract_strided_slice %120 {offsets = [27, 0], sizes = [1, 128], strides = [1, 1]} : vector<32x128xf32> to vector<1x128xf32>
    %563 = tpu.concatenate %561, %562 in 0 : vector<1x128xf32>, vector<1x128xf32> -> vector<2x128xf32>
    %cst_155 = arith.constant dense<0.000000e+00> : vector<2x128xf32>
    %564 = tpu.matmul %541, %121, %cst_155 {dimension_numbers = #tpu.dot_dimension_numbers<[1], [0], [0], [1], [0, 0, 1, 1], [], []>} : vector<2x32xf32>, vector<32x128xf32>, vector<2x128xf32> -> vector<2x128xf32>
    %565 = arith.addf %563, %564 : vector<2x128xf32>
    %566 = arith.negf %565 : vector<2x128xf32>
    %567 = math.exp %566 : vector<2x128xf32>
    %cst_156 = arith.constant 1.000000e+00 : f32
    %568 = vector.broadcast %cst_156 : f32 to vector<2x128xf32>
    %569 = arith.addf %568, %567 : vector<2x128xf32>
    %570 = arith.divf %568, %569 : vector<2x128xf32>
    %571 = math.tanh %565 : vector<2x128xf32>
    %572 = vector.extract_strided_slice %570 {offsets = [0, 32], sizes = [2, 32], strides = [1, 1]} : vector<2x128xf32> to vector<2x32xf32>
    %573 = arith.mulf %572, %538 : vector<2x32xf32>
    %574 = vector.extract_strided_slice %570 {offsets = [0, 0], sizes = [2, 32], strides = [1, 1]} : vector<2x128xf32> to vector<2x32xf32>
    %575 = vector.extract_strided_slice %571 {offsets = [0, 64], sizes = [2, 32], strides = [1, 1]} : vector<2x128xf32> to vector<2x32xf32>
    %576 = arith.mulf %574, %575 : vector<2x32xf32>
    %577 = arith.addf %573, %576 : vector<2x32xf32>
    %578 = vector.extract_strided_slice %570 {offsets = [0, 96], sizes = [2, 32], strides = [1, 1]} : vector<2x128xf32> to vector<2x32xf32>
    %579 = math.tanh %577 : vector<2x32xf32>
    %580 = arith.mulf %578, %579 : vector<2x32xf32>
    %581 = tpu.concatenate %580, %560 in 1 : vector<2x32xf32>, vector<2x32xf32> -> vector<2x64xf32>
    %cst_157 = arith.constant dense<0.000000e+00> : vector<2x128xf32>
    %582 = tpu.matmul %581, %122, %cst_157 {dimension_numbers = #tpu.dot_dimension_numbers<[1], [0], [0], [1], [0, 0, 1, 1], [], []>} : vector<2x64xf32>, vector<64x128xf32>, vector<2x128xf32> -> vector<2x128xf32>
    %583 = vector.broadcast %123 : vector<1x128xf32> to vector<2x128xf32>
    %584 = arith.addf %582, %583 : vector<2x128xf32>
    %585 = arith.negf %584 : vector<2x128xf32>
    %586 = math.exp %585 : vector<2x128xf32>
    %cst_158 = arith.constant 1.000000e+00 : f32
    %587 = vector.broadcast %cst_158 : f32 to vector<2x128xf32>
    %588 = arith.addf %587, %586 : vector<2x128xf32>
    %589 = arith.divf %587, %588 : vector<2x128xf32>
    %590 = math.tanh %584 : vector<2x128xf32>
    %591 = vector.extract_strided_slice %589 {offsets = [0, 32], sizes = [2, 32], strides = [1, 1]} : vector<2x128xf32> to vector<2x32xf32>
    %592 = arith.mulf %591, %557 : vector<2x32xf32>
    %593 = vector.extract_strided_slice %589 {offsets = [0, 0], sizes = [2, 32], strides = [1, 1]} : vector<2x128xf32> to vector<2x32xf32>
    %594 = vector.extract_strided_slice %590 {offsets = [0, 64], sizes = [2, 32], strides = [1, 1]} : vector<2x128xf32> to vector<2x32xf32>
    %595 = arith.mulf %593, %594 : vector<2x32xf32>
    %596 = arith.addf %592, %595 : vector<2x32xf32>
    %597 = vector.extract_strided_slice %589 {offsets = [0, 96], sizes = [2, 32], strides = [1, 1]} : vector<2x128xf32> to vector<2x32xf32>
    %598 = math.tanh %596 : vector<2x32xf32>
    %599 = arith.mulf %597, %598 : vector<2x32xf32>
    %600 = vector.extract_strided_slice %120 {offsets = [12, 0], sizes = [1, 128], strides = [1, 1]} : vector<32x128xf32> to vector<1x128xf32>
    %601 = vector.extract_strided_slice %120 {offsets = [28, 0], sizes = [1, 128], strides = [1, 1]} : vector<32x128xf32> to vector<1x128xf32>
    %602 = tpu.concatenate %600, %601 in 0 : vector<1x128xf32>, vector<1x128xf32> -> vector<2x128xf32>
    %cst_159 = arith.constant dense<0.000000e+00> : vector<2x128xf32>
    %603 = tpu.matmul %580, %121, %cst_159 {dimension_numbers = #tpu.dot_dimension_numbers<[1], [0], [0], [1], [0, 0, 1, 1], [], []>} : vector<2x32xf32>, vector<32x128xf32>, vector<2x128xf32> -> vector<2x128xf32>
    %604 = arith.addf %602, %603 : vector<2x128xf32>
    %605 = arith.negf %604 : vector<2x128xf32>
    %606 = math.exp %605 : vector<2x128xf32>
    %cst_160 = arith.constant 1.000000e+00 : f32
    %607 = vector.broadcast %cst_160 : f32 to vector<2x128xf32>
    %608 = arith.addf %607, %606 : vector<2x128xf32>
    %609 = arith.divf %607, %608 : vector<2x128xf32>
    %610 = math.tanh %604 : vector<2x128xf32>
    %611 = vector.extract_strided_slice %609 {offsets = [0, 32], sizes = [2, 32], strides = [1, 1]} : vector<2x128xf32> to vector<2x32xf32>
    %612 = arith.mulf %611, %577 : vector<2x32xf32>
    %613 = vector.extract_strided_slice %609 {offsets = [0, 0], sizes = [2, 32], strides = [1, 1]} : vector<2x128xf32> to vector<2x32xf32>
    %614 = vector.extract_strided_slice %610 {offsets = [0, 64], sizes = [2, 32], strides = [1, 1]} : vector<2x128xf32> to vector<2x32xf32>
    %615 = arith.mulf %613, %614 : vector<2x32xf32>
    %616 = arith.addf %612, %615 : vector<2x32xf32>
    %617 = vector.extract_strided_slice %609 {offsets = [0, 96], sizes = [2, 32], strides = [1, 1]} : vector<2x128xf32> to vector<2x32xf32>
    %618 = math.tanh %616 : vector<2x32xf32>
    %619 = arith.mulf %617, %618 : vector<2x32xf32>
    %620 = tpu.concatenate %619, %599 in 1 : vector<2x32xf32>, vector<2x32xf32> -> vector<2x64xf32>
    %cst_161 = arith.constant dense<0.000000e+00> : vector<2x128xf32>
    %621 = tpu.matmul %620, %122, %cst_161 {dimension_numbers = #tpu.dot_dimension_numbers<[1], [0], [0], [1], [0, 0, 1, 1], [], []>} : vector<2x64xf32>, vector<64x128xf32>, vector<2x128xf32> -> vector<2x128xf32>
    %622 = vector.broadcast %123 : vector<1x128xf32> to vector<2x128xf32>
    %623 = arith.addf %621, %622 : vector<2x128xf32>
    %624 = arith.negf %623 : vector<2x128xf32>
    %625 = math.exp %624 : vector<2x128xf32>
    %cst_162 = arith.constant 1.000000e+00 : f32
    %626 = vector.broadcast %cst_162 : f32 to vector<2x128xf32>
    %627 = arith.addf %626, %625 : vector<2x128xf32>
    %628 = arith.divf %626, %627 : vector<2x128xf32>
    %629 = math.tanh %623 : vector<2x128xf32>
    %630 = vector.extract_strided_slice %628 {offsets = [0, 32], sizes = [2, 32], strides = [1, 1]} : vector<2x128xf32> to vector<2x32xf32>
    %631 = arith.mulf %630, %596 : vector<2x32xf32>
    %632 = vector.extract_strided_slice %628 {offsets = [0, 0], sizes = [2, 32], strides = [1, 1]} : vector<2x128xf32> to vector<2x32xf32>
    %633 = vector.extract_strided_slice %629 {offsets = [0, 64], sizes = [2, 32], strides = [1, 1]} : vector<2x128xf32> to vector<2x32xf32>
    %634 = arith.mulf %632, %633 : vector<2x32xf32>
    %635 = arith.addf %631, %634 : vector<2x32xf32>
    %636 = vector.extract_strided_slice %628 {offsets = [0, 96], sizes = [2, 32], strides = [1, 1]} : vector<2x128xf32> to vector<2x32xf32>
    %637 = math.tanh %635 : vector<2x32xf32>
    %638 = arith.mulf %636, %637 : vector<2x32xf32>
    %639 = vector.extract_strided_slice %120 {offsets = [13, 0], sizes = [1, 128], strides = [1, 1]} : vector<32x128xf32> to vector<1x128xf32>
    %640 = vector.extract_strided_slice %120 {offsets = [29, 0], sizes = [1, 128], strides = [1, 1]} : vector<32x128xf32> to vector<1x128xf32>
    %641 = tpu.concatenate %639, %640 in 0 : vector<1x128xf32>, vector<1x128xf32> -> vector<2x128xf32>
    %cst_163 = arith.constant dense<0.000000e+00> : vector<2x128xf32>
    %642 = tpu.matmul %619, %121, %cst_163 {dimension_numbers = #tpu.dot_dimension_numbers<[1], [0], [0], [1], [0, 0, 1, 1], [], []>} : vector<2x32xf32>, vector<32x128xf32>, vector<2x128xf32> -> vector<2x128xf32>
    %643 = arith.addf %641, %642 : vector<2x128xf32>
    %644 = arith.negf %643 : vector<2x128xf32>
    %645 = math.exp %644 : vector<2x128xf32>
    %cst_164 = arith.constant 1.000000e+00 : f32
    %646 = vector.broadcast %cst_164 : f32 to vector<2x128xf32>
    %647 = arith.addf %646, %645 : vector<2x128xf32>
    %648 = arith.divf %646, %647 : vector<2x128xf32>
    %649 = math.tanh %643 : vector<2x128xf32>
    %650 = vector.extract_strided_slice %648 {offsets = [0, 32], sizes = [2, 32], strides = [1, 1]} : vector<2x128xf32> to vector<2x32xf32>
    %651 = arith.mulf %650, %616 : vector<2x32xf32>
    %652 = vector.extract_strided_slice %648 {offsets = [0, 0], sizes = [2, 32], strides = [1, 1]} : vector<2x128xf32> to vector<2x32xf32>
    %653 = vector.extract_strided_slice %649 {offsets = [0, 64], sizes = [2, 32], strides = [1, 1]} : vector<2x128xf32> to vector<2x32xf32>
    %654 = arith.mulf %652, %653 : vector<2x32xf32>
    %655 = arith.addf %651, %654 : vector<2x32xf32>
    %656 = vector.extract_strided_slice %648 {offsets = [0, 96], sizes = [2, 32], strides = [1, 1]} : vector<2x128xf32> to vector<2x32xf32>
    %657 = math.tanh %655 : vector<2x32xf32>
    %658 = arith.mulf %656, %657 : vector<2x32xf32>
    %659 = tpu.concatenate %658, %638 in 1 : vector<2x32xf32>, vector<2x32xf32> -> vector<2x64xf32>
    %cst_165 = arith.constant dense<0.000000e+00> : vector<2x128xf32>
    %660 = tpu.matmul %659, %122, %cst_165 {dimension_numbers = #tpu.dot_dimension_numbers<[1], [0], [0], [1], [0, 0, 1, 1], [], []>} : vector<2x64xf32>, vector<64x128xf32>, vector<2x128xf32> -> vector<2x128xf32>
    %661 = vector.broadcast %123 : vector<1x128xf32> to vector<2x128xf32>
    %662 = arith.addf %660, %661 : vector<2x128xf32>
    %663 = arith.negf %662 : vector<2x128xf32>
    %664 = math.exp %663 : vector<2x128xf32>
    %cst_166 = arith.constant 1.000000e+00 : f32
    %665 = vector.broadcast %cst_166 : f32 to vector<2x128xf32>
    %666 = arith.addf %665, %664 : vector<2x128xf32>
    %667 = arith.divf %665, %666 : vector<2x128xf32>
    %668 = math.tanh %662 : vector<2x128xf32>
    %669 = vector.extract_strided_slice %667 {offsets = [0, 32], sizes = [2, 32], strides = [1, 1]} : vector<2x128xf32> to vector<2x32xf32>
    %670 = arith.mulf %669, %635 : vector<2x32xf32>
    %671 = vector.extract_strided_slice %667 {offsets = [0, 0], sizes = [2, 32], strides = [1, 1]} : vector<2x128xf32> to vector<2x32xf32>
    %672 = vector.extract_strided_slice %668 {offsets = [0, 64], sizes = [2, 32], strides = [1, 1]} : vector<2x128xf32> to vector<2x32xf32>
    %673 = arith.mulf %671, %672 : vector<2x32xf32>
    %674 = arith.addf %670, %673 : vector<2x32xf32>
    %675 = vector.extract_strided_slice %667 {offsets = [0, 96], sizes = [2, 32], strides = [1, 1]} : vector<2x128xf32> to vector<2x32xf32>
    %676 = math.tanh %674 : vector<2x32xf32>
    %677 = arith.mulf %675, %676 : vector<2x32xf32>
    %678 = vector.extract_strided_slice %120 {offsets = [14, 0], sizes = [1, 128], strides = [1, 1]} : vector<32x128xf32> to vector<1x128xf32>
    %679 = vector.extract_strided_slice %120 {offsets = [30, 0], sizes = [1, 128], strides = [1, 1]} : vector<32x128xf32> to vector<1x128xf32>
    %680 = tpu.concatenate %678, %679 in 0 : vector<1x128xf32>, vector<1x128xf32> -> vector<2x128xf32>
    %cst_167 = arith.constant dense<0.000000e+00> : vector<2x128xf32>
    %681 = tpu.matmul %658, %121, %cst_167 {dimension_numbers = #tpu.dot_dimension_numbers<[1], [0], [0], [1], [0, 0, 1, 1], [], []>} : vector<2x32xf32>, vector<32x128xf32>, vector<2x128xf32> -> vector<2x128xf32>
    %682 = arith.addf %680, %681 : vector<2x128xf32>
    %683 = arith.negf %682 : vector<2x128xf32>
    %684 = math.exp %683 : vector<2x128xf32>
    %cst_168 = arith.constant 1.000000e+00 : f32
    %685 = vector.broadcast %cst_168 : f32 to vector<2x128xf32>
    %686 = arith.addf %685, %684 : vector<2x128xf32>
    %687 = arith.divf %685, %686 : vector<2x128xf32>
    %688 = math.tanh %682 : vector<2x128xf32>
    %689 = vector.extract_strided_slice %687 {offsets = [0, 32], sizes = [2, 32], strides = [1, 1]} : vector<2x128xf32> to vector<2x32xf32>
    %690 = arith.mulf %689, %655 : vector<2x32xf32>
    %691 = vector.extract_strided_slice %687 {offsets = [0, 0], sizes = [2, 32], strides = [1, 1]} : vector<2x128xf32> to vector<2x32xf32>
    %692 = vector.extract_strided_slice %688 {offsets = [0, 64], sizes = [2, 32], strides = [1, 1]} : vector<2x128xf32> to vector<2x32xf32>
    %693 = arith.mulf %691, %692 : vector<2x32xf32>
    %694 = arith.addf %690, %693 : vector<2x32xf32>
    %695 = vector.extract_strided_slice %687 {offsets = [0, 96], sizes = [2, 32], strides = [1, 1]} : vector<2x128xf32> to vector<2x32xf32>
    %696 = math.tanh %694 : vector<2x32xf32>
    %697 = arith.mulf %695, %696 : vector<2x32xf32>
    %698 = tpu.concatenate %697, %677 in 1 : vector<2x32xf32>, vector<2x32xf32> -> vector<2x64xf32>
    %cst_169 = arith.constant dense<0.000000e+00> : vector<2x128xf32>
    %699 = tpu.matmul %698, %122, %cst_169 {dimension_numbers = #tpu.dot_dimension_numbers<[1], [0], [0], [1], [0, 0, 1, 1], [], []>} : vector<2x64xf32>, vector<64x128xf32>, vector<2x128xf32> -> vector<2x128xf32>
    %700 = vector.broadcast %123 : vector<1x128xf32> to vector<2x128xf32>
    %701 = arith.addf %699, %700 : vector<2x128xf32>
    %702 = arith.negf %701 : vector<2x128xf32>
    %703 = math.exp %702 : vector<2x128xf32>
    %cst_170 = arith.constant 1.000000e+00 : f32
    %704 = vector.broadcast %cst_170 : f32 to vector<2x128xf32>
    %705 = arith.addf %704, %703 : vector<2x128xf32>
    %706 = arith.divf %704, %705 : vector<2x128xf32>
    %707 = math.tanh %701 : vector<2x128xf32>
    %708 = vector.extract_strided_slice %706 {offsets = [0, 32], sizes = [2, 32], strides = [1, 1]} : vector<2x128xf32> to vector<2x32xf32>
    %709 = arith.mulf %708, %674 : vector<2x32xf32>
    %710 = vector.extract_strided_slice %706 {offsets = [0, 0], sizes = [2, 32], strides = [1, 1]} : vector<2x128xf32> to vector<2x32xf32>
    %711 = vector.extract_strided_slice %707 {offsets = [0, 64], sizes = [2, 32], strides = [1, 1]} : vector<2x128xf32> to vector<2x32xf32>
    %712 = arith.mulf %710, %711 : vector<2x32xf32>
    %713 = arith.addf %709, %712 : vector<2x32xf32>
    %714 = vector.extract_strided_slice %706 {offsets = [0, 96], sizes = [2, 32], strides = [1, 1]} : vector<2x128xf32> to vector<2x32xf32>
    %715 = math.tanh %713 : vector<2x32xf32>
    %716 = arith.mulf %714, %715 : vector<2x32xf32>
    %717 = vector.extract_strided_slice %120 {offsets = [15, 0], sizes = [1, 128], strides = [1, 1]} : vector<32x128xf32> to vector<1x128xf32>
    %718 = vector.extract_strided_slice %120 {offsets = [31, 0], sizes = [1, 128], strides = [1, 1]} : vector<32x128xf32> to vector<1x128xf32>
    %719 = tpu.concatenate %717, %718 in 0 : vector<1x128xf32>, vector<1x128xf32> -> vector<2x128xf32>
    %cst_171 = arith.constant dense<0.000000e+00> : vector<2x128xf32>
    %720 = tpu.matmul %697, %121, %cst_171 {dimension_numbers = #tpu.dot_dimension_numbers<[1], [0], [0], [1], [0, 0, 1, 1], [], []>} : vector<2x32xf32>, vector<32x128xf32>, vector<2x128xf32> -> vector<2x128xf32>
    %721 = arith.addf %719, %720 : vector<2x128xf32>
    %722 = arith.negf %721 : vector<2x128xf32>
    %723 = math.exp %722 : vector<2x128xf32>
    %cst_172 = arith.constant 1.000000e+00 : f32
    %724 = vector.broadcast %cst_172 : f32 to vector<2x128xf32>
    %725 = arith.addf %724, %723 : vector<2x128xf32>
    %726 = arith.divf %724, %725 : vector<2x128xf32>
    %727 = math.tanh %721 : vector<2x128xf32>
    %728 = vector.extract_strided_slice %726 {offsets = [0, 32], sizes = [2, 32], strides = [1, 1]} : vector<2x128xf32> to vector<2x32xf32>
    %729 = arith.mulf %728, %694 : vector<2x32xf32>
    %730 = vector.extract_strided_slice %726 {offsets = [0, 0], sizes = [2, 32], strides = [1, 1]} : vector<2x128xf32> to vector<2x32xf32>
    %731 = vector.extract_strided_slice %727 {offsets = [0, 64], sizes = [2, 32], strides = [1, 1]} : vector<2x128xf32> to vector<2x32xf32>
    %732 = arith.mulf %730, %731 : vector<2x32xf32>
    %733 = arith.addf %729, %732 : vector<2x32xf32>
    %734 = vector.extract_strided_slice %726 {offsets = [0, 96], sizes = [2, 32], strides = [1, 1]} : vector<2x128xf32> to vector<2x32xf32>
    %735 = math.tanh %733 : vector<2x32xf32>
    %736 = arith.mulf %734, %735 : vector<2x32xf32>
    %737 = tpu.concatenate %736, %716 in 1 : vector<2x32xf32>, vector<2x32xf32> -> vector<2x64xf32>
    %cst_173 = arith.constant dense<0.000000e+00> : vector<2x128xf32>
    %738 = tpu.matmul %737, %122, %cst_173 {dimension_numbers = #tpu.dot_dimension_numbers<[1], [0], [0], [1], [0, 0, 1, 1], [], []>} : vector<2x64xf32>, vector<64x128xf32>, vector<2x128xf32> -> vector<2x128xf32>
    %739 = vector.broadcast %123 : vector<1x128xf32> to vector<2x128xf32>
    %740 = arith.addf %738, %739 : vector<2x128xf32>
    %741 = arith.negf %740 : vector<2x128xf32>
    %742 = math.exp %741 : vector<2x128xf32>
    %cst_174 = arith.constant 1.000000e+00 : f32
    %743 = vector.broadcast %cst_174 : f32 to vector<2x128xf32>
    %744 = arith.addf %743, %742 : vector<2x128xf32>
    %745 = arith.divf %743, %744 : vector<2x128xf32>
    %746 = math.tanh %740 : vector<2x128xf32>
    %747 = vector.extract_strided_slice %745 {offsets = [0, 32], sizes = [2, 32], strides = [1, 1]} : vector<2x128xf32> to vector<2x32xf32>
    %748 = arith.mulf %747, %713 : vector<2x32xf32>
    %749 = vector.extract_strided_slice %745 {offsets = [0, 0], sizes = [2, 32], strides = [1, 1]} : vector<2x128xf32> to vector<2x32xf32>
    %750 = vector.extract_strided_slice %746 {offsets = [0, 64], sizes = [2, 32], strides = [1, 1]} : vector<2x128xf32> to vector<2x32xf32>
    %751 = arith.mulf %749, %750 : vector<2x32xf32>
    %752 = arith.addf %748, %751 : vector<2x32xf32>
    %753 = vector.extract_strided_slice %745 {offsets = [0, 96], sizes = [2, 32], strides = [1, 1]} : vector<2x128xf32> to vector<2x32xf32>
    %754 = math.tanh %752 : vector<2x32xf32>
    %755 = arith.mulf %753, %754 : vector<2x32xf32>
    %c0_175 = arith.constant 0 : index
    %c0_176 = arith.constant 0 : index
    %c0_177 = arith.constant 0 : index
    %756 = vector.load %arg19[%c0_175, %c0_176, %c0_177] : memref<2x2x32xf32, #tpu.memory_space<vmem>>, vector<1x2x32xf32>
    %757 = vector.shape_cast %756 : vector<1x2x32xf32> to vector<2x32xf32>
    %758 = vector.shape_cast %736 : vector<2x32xf32> to vector<1x2x32xf32>
    tpu.vector_store %arg19[%c0_175, %c0_176, %c0_177], %758 {strides = array<i32>} : memref<2x2x32xf32, #tpu.memory_space<vmem>>, vector<1x2x32xf32>,
    %c1_178 = arith.constant 1 : index
    %c0_179 = arith.constant 0 : index
    %c0_180 = arith.constant 0 : index
    %759 = vector.load %arg19[%c1_178, %c0_179, %c0_180] : memref<2x2x32xf32, #tpu.memory_space<vmem>>, vector<1x2x32xf32>
    %760 = vector.shape_cast %759 : vector<1x2x32xf32> to vector<2x32xf32>
    %761 = vector.shape_cast %755 : vector<2x32xf32> to vector<1x2x32xf32>
    tpu.vector_store %arg19[%c1_178, %c0_179, %c0_180], %761 {strides = array<i32>} : memref<2x2x32xf32, #tpu.memory_space<vmem>>, vector<1x2x32xf32>,
    %c0_181 = arith.constant 0 : index
    %c0_182 = arith.constant 0 : index
    %c0_183 = arith.constant 0 : index
    %762 = vector.load %arg20[%c0_181, %c0_182, %c0_183] : memref<2x2x32xf32, #tpu.memory_space<vmem>>, vector<1x2x32xf32>
    %763 = vector.shape_cast %762 : vector<1x2x32xf32> to vector<2x32xf32>
    %764 = vector.shape_cast %733 : vector<2x32xf32> to vector<1x2x32xf32>
    tpu.vector_store %arg20[%c0_181, %c0_182, %c0_183], %764 {strides = array<i32>} : memref<2x2x32xf32, #tpu.memory_space<vmem>>, vector<1x2x32xf32>,
    %c1_184 = arith.constant 1 : index
    %c0_185 = arith.constant 0 : index
    %c0_186 = arith.constant 0 : index
    %765 = vector.load %arg20[%c1_184, %c0_185, %c0_186] : memref<2x2x32xf32, #tpu.memory_space<vmem>>, vector<1x2x32xf32>
    %766 = vector.shape_cast %765 : vector<1x2x32xf32> to vector<2x32xf32>
    %767 = vector.shape_cast %752 : vector<2x32xf32> to vector<1x2x32xf32>
    tpu.vector_store %arg20[%c1_184, %c0_185, %c0_186], %767 {strides = array<i32>} : memref<2x2x32xf32, #tpu.memory_space<vmem>>, vector<1x2x32xf32>,
    %c0_187 = arith.constant 0 : index
    %c0_188 = arith.constant 0 : index
    %768 = vector.load %arg14[%c0_187, %c0_188] : memref<1x32xf32, #tpu.memory_space<vmem>>, vector<1x32xf32>
    %769 = vector.broadcast %768 : vector<1x32xf32> to vector<2x32xf32>
    %770 = arith.mulf %755, %769 : vector<2x32xf32>
    %cst_189 = arith.constant dense<0.000000e+00> : vector<2xf32>
    %771 = vector.multi_reduction <add>, %770, %cst_189 [1] : vector<2x32xf32> to vector<2xf32>
    %772 = vector.shape_cast %771 : vector<2xf32> to vector<2x1xf32>
    %c0_190 = arith.constant 0 : index
    %c0_191 = arith.constant 0 : index
    %773 = vector.load %arg15[%c0_190, %c0_191] : memref<1x1xf32, #tpu.memory_space<vmem>>, vector<1x1xf32>
    %774 = vector.broadcast %773 : vector<1x1xf32> to vector<2x1xf32>
    %775 = arith.addf %772, %774 : vector<2x1xf32>
    %776 = arith.negf %775 : vector<2x1xf32>
    %777 = math.exp %776 : vector<2x1xf32>
    %cst_192 = arith.constant 1.000000e+00 : f32
    %778 = vector.broadcast %cst_192 : f32 to vector<2x1xf32>
    %779 = arith.addf %778, %777 : vector<2x1xf32>
    %780 = arith.divf %778, %779 : vector<2x1xf32>
    %c0_193 = arith.constant 0 : index
    %c0_194 = arith.constant 0 : index
    %781 = vector.load %arg18[%c0_193, %c0_194] : memref<2x1xf32, #tpu.memory_space<vmem>>, vector<2x1xf32>
    tpu.vector_store %arg18[%c0_193, %c0_194], %780 {strides = array<i32>} : memref<2x1xf32, #tpu.memory_space<vmem>>, vector<2x1xf32>,
    return
  }
}

</mosaic_0001>

<bundles_post_ra>
// kernel: _lambda_.1
= control target key start
LH: loop header
LB: loop body
LE: loop exit
PB: predicated region body
PF: predicated region fallthrough
CT: control target
= control target key end

     0   :  { %s8603_s0 = inlined_call_operand.vmem [shape: f32[2,4,32], index: 0, kind: input, shape index: {}]   ;;  %s8604_s1 = inlined_call_operand.vmem [shape: f32[5,16,4], index: 1, kind: input, shape index: {}]   ;;  %s8605_s2 = inlined_call_operand.vmem [shape: f32[16,1], index: 2, kind: input, shape index: {}]   ;;  %s8606_s3 = inlined_call_operand.vmem [shape: f32[5,16,16], index: 3, kind: input, shape index: {}]   ;;  %s8607_s4 = inlined_call_operand.vmem [shape: f32[16,1], index: 4, kind: input, shape index: {}]   ;;  %s8608_s5 = inlined_call_operand.vmem [shape: f32[5,16,16], index: 5, kind: input, shape index: {}]   ;;  %s8609_s6 = inlined_call_operand.vmem [shape: f32[16,1], index: 6, kind: input, shape index: {}]   ;;  %s8610_s7 = inlined_call_operand.hbm [shape: f32[5,16,16], index: 7, kind: input, shape index: {}]   ;;  %s8611_s8 = inlined_call_operand.vmem [shape: f32[16,1], index: 8, kind: input, shape index: {}]   ;;  %s8612_s9 = inlined_call_operand.vmem [shape: f32[16,128], index: 9, kind: input, shape index: {}]   ;;  %s8613_s10 = inlined_call_operand.hbm [shape: f32[1,128], index: 10, kind: input, shape index: {}]   ;;  %s8614_s11 = inlined_call_operand.vmem [shape: f32[32,128], index: 11, kind: input, shape index: {}]   ;;  %s8615_s12 = inlined_call_operand.hbm [shape: f32[64,128], index: 12, kind: input, shape index: {}]   ;;  %s8616_s13 = inlined_call_operand.hbm [shape: f32[1,128], index: 13, kind: input, shape index: {}]   ;;  %s8617_s14 = inlined_call_operand.hbm [shape: f32[1,32], index: 14, kind: input, shape index: {}]   ;;  %s8618_s15 = inlined_call_operand.<no memory space> [shape: f32[1,1], index: 15, kind: input, shape index: {}]   ;;  %s8619_s16 = inlined_call_operand.vmem [shape: f32[2,2,32], index: 16, kind: input, shape index: {}]   ;;  %s8620_s17 = inlined_call_operand.vmem [shape: f32[2,2,32], index: 17, kind: input, shape index: {}]   ;;  %s8621_s18 = inlined_call_operand.vmem [shape: f32[2,1], index: 18, kind: output, shape index: {0}]   ;;  %s8622_s19 = inlined_call_operand.hbm [shape: f32[2,2,32], index: 19, kind: output, shape index: {1}]   ;;  %s8623_s20 = inlined_call_operand.hbm [shape: f32[2,2,32], index: 20, kind: output, shape index: {2}]  }
   0x1   :  { %8629 = sst [smem:[#allocation20_spill]] %s8603_s0  ;;  %v26_v0 = vstv %s8618_s15 }
   0x2   :  { %8630 = sst [smem:[#allocation21_spill]] %s8604_s1  ;;  %27 = vst [vmem:[#allocation2] sm:$0x1] %v26_v0 }
   0x3   :  { %8631 = sst [smem:[#allocation22_spill]] %s8605_s2 }
   0x4   :  { %8632 = sst [smem:[#allocation23_spill]] %s8606_s3 }
   0x5   :  { %8633 = sst [smem:[#allocation24_spill]] %s8607_s4 }
   0x6   :  { %28 = vsyncpa [#allocation4], 0 }
   0x7   :  { %29 = vsyncpa [#allocation7], 0 }
   0x8   :  { %30 = vsyncpa [#allocation10], 0 }
   0x9   :  { %31 = vsyncpa [#allocation5], 0 }
   0xa   :  { %32 = vsyncpa [#allocation14], 0  ;;  %s7514_s23 = smov [#allocation6]   ;;  %s7515_s2 = smov [#allocation9]  }
   0xb   :  { %s69_s24 = sshll.u32 %s7514_s23, 4  ;;  %s93_s25 = sshll.u32 %s7515_s2, 4  ;;  %s70_s24 = int_to_ptr.vmem [resolvable:$true] %s69_s24  ;;  %s94_s25 = int_to_ptr.vmem [resolvable:$true] %s93_s25 }
   0xc   :  { %s7350_s27 = scalar_lea.hbm %s8613_s10, 16 }
   0xd   :  { %p7351_p0 = scmp.ne.s32.totalorder %s8613_s10, %s7350_s27  ;;  %p7354_p1 = scmp.lt.u32.totalorder %s7350_s27, %s8613_s10 }
   0xf   :  { %p7356_p2 = pnand %p7354_p1, %p7351_p0 }
  0x11   :  { %7359 = shalt.err (!%p7356_p2)
}
  0x12   :  { %s7360_s30 = scalar_lea.vmem %s70_s24, 16  ;;  %s7364_s0 = scalar_lea.vmem %s70_s24, 32 }
  0x13   :  { %p7361_p3 = scmp.ne.s32.totalorder %s70_s24, %s7360_s30  ;;  %p7365_p4 = scmp.lt.s32.totalorder %s70_s24, %s70_s24 }
  0x14   :  { %p7366_p5 = scmp.lt.s32.totalorder %s7364_s0, %s7360_s30 }
  0x16   :  { %p7367_p6 = por %p7366_p5, %p7365_p4 }
  0x18   :  { %p7368_p7 = pnand %p7367_p6, %p7361_p3 }
  0x1a   :  { %7371 = shalt.err (!%p7368_p7)
}
  0x1b   :  { %72 = dma.hbm_to_vmem [thread:$0]  %s8613_s10, 16, %s70_s24, [#allocation7]  }
  0x1c   :  { %s7372_s2 = scalar_lea.hbm %s8616_s13, 16 }
  0x1d   :  { %p7373_p8 = scmp.ne.s32.totalorder %s8616_s13, %s7372_s2  ;;  %p7376_p9 = scmp.lt.u32.totalorder %s7372_s2, %s8616_s13 }
  0x1f   :  { %p7378_p10 = pnand %p7376_p9, %p7373_p8 }
  0x21   :  { %7381 = shalt.err (!%p7378_p10)
}
  0x22   :  { %s7382_s4 = scalar_lea.vmem %s94_s25, 16  ;;  %s7386_s15 = scalar_lea.vmem %s94_s25, 32 }
  0x23   :  { %p7383_p11 = scmp.ne.s32.totalorder %s94_s25, %s7382_s4  ;;  %p7387_p12 = scmp.lt.s32.totalorder %s94_s25, %s94_s25 }
  0x24   :  { %p7388_p13 = scmp.lt.s32.totalorder %s7386_s15, %s7382_s4 }
  0x26   :  { %p7389_p0 = por %p7388_p13, %p7387_p12 }
  0x28   :  { %p7390_p1 = pnand %p7389_p0, %p7383_p11 }
  0x2a   :  { %7393 = shalt.err (!%p7390_p1)
}
  0x2b   :  { %96 = dma.hbm_to_vmem [thread:$0]  %s8616_s13, 16, %s94_s25, [#allocation10]  }
  0x2c   :  { %s7516_s29 = smov [#allocation3]   ;;  %s7394_s1 = scalar_lea.hbm %s8610_s7, 1280 }
  0x2d   :  { %s52_s30 = sshll.u32 %s7516_s29, 4  ;;  %p7395_p2 = scmp.ne.s32.totalorder %s8610_s7, %s7394_s1  ;;  %s53_s30 = int_to_ptr.vmem [resolvable:$true] %s52_s30 }
  0x2e   :  { %p7398_p3 = scmp.lt.u32.totalorder %s7394_s1, %s8610_s7 }
  0x30   :  { %p7400_p4 = pnand %p7398_p3, %p7395_p2 }
  0x32   :  { %7403 = shalt.err (!%p7400_p4)
}
  0x33   :  { %s7404_s26 = scalar_lea.vmem %s53_s30, 1280  ;;  %p7409_p6 = scmp.lt.s32.totalorder %s53_s30, %s53_s30 }
  0x34   :  { %p7405_p5 = scmp.ne.s32.totalorder %s53_s30, %s7404_s26  ;;  %p7410_p7 = scmp.lt.s32.totalorder %s7404_s26, %s7404_s26 }
  0x36   :  { %p7411_p8 = por %p7410_p7, %p7409_p6 }
  0x38   :  { %p7412_p9 = pnand %p7411_p8, %p7405_p5 }
  0x3a   :  { %7415 = shalt.err (!%p7412_p9)
}
  0x3b   :  { %s7517_s13 = smov 128   ;;  %s7518_s25 = smov 8  }
  0x3c   :  { %58 = dma.hbm_to_vmem [thread:$0]  %s8610_s7, 1280, %s53_s30, [#allocation4], %s7517_s13, %s7517_s13, %s7518_s25  }
  0x3d   :  { %s7519_s4 = smov [#allocation8]   ;;  %s7520_s10 = smov [#allocation11]  }
  0x3e   :  { %s80_s15 = sshll.u32 %s7519_s4, 4  ;;  %s103_s24 = sshll.u32 %s7520_s10, 4  ;;  %s81_s15 = int_to_ptr.vmem [resolvable:$true] %s80_s15  ;;  %s104_s24 = int_to_ptr.vmem [resolvable:$true] %s103_s24 }
  0x3f   :  { %s7416_s21 = scalar_lea.hbm %s8615_s12, 1024 }
  0x40   :  { %p7417_p10 = scmp.ne.s32.totalorder %s8615_s12, %s7416_s21  ;;  %p7420_p11 = scmp.lt.u32.totalorder %s7416_s21, %s8615_s12 }
  0x42   :  { %p7422_p12 = pnand %p7420_p11, %p7417_p10 }
  0x44   :  { %7425 = shalt.err (!%p7422_p12)
}
  0x45   :  { %s7426_s7 = scalar_lea.vmem %s81_s15, 1024  ;;  %p7431_p0 = scmp.lt.s32.totalorder %s81_s15, %s81_s15 }
  0x46   :  { %p7427_p13 = scmp.ne.s32.totalorder %s81_s15, %s7426_s7  ;;  %p7432_p1 = scmp.lt.s32.totalorder %s7426_s7, %s7426_s7 }
  0x48   :  { %p7433_p2 = por %p7432_p1, %p7431_p0 }
  0x4a   :  { %p7434_p3 = pnand %p7433_p2, %p7427_p13 }
  0x4c   :  { %7437 = shalt.err (!%p7434_p3)
}
  0x4d   :  { %86 = dma.hbm_to_vmem [thread:$0]  %s8615_s12, 1024, %s81_s15, [#allocation7], %s7517_s13, %s7517_s13, %s7518_s25  }
  0x4e   :  { %s7438_s28 = scalar_lea.hbm %s8617_s14, 16 }
  0x4f   :  { %p7439_p4 = scmp.ne.s32.totalorder %s8617_s14, %s7438_s28  ;;  %p7442_p5 = scmp.lt.u32.totalorder %s7438_s28, %s8617_s14 }
  0x51   :  { %p7444_p6 = pnand %p7442_p5, %p7439_p4 }
  0x53   :  { %7447 = shalt.err (!%p7444_p6)
}
  0x54   :  { %s7448_s21 = scalar_lea.vmem %s104_s24, 16  ;;  %s7452_s1 = scalar_lea.vmem %s104_s24, 32 }
  0x55   :  { %p7449_p7 = scmp.ne.s32.totalorder %s104_s24, %s7448_s21  ;;  %p7453_p8 = scmp.lt.s32.totalorder %s104_s24, %s104_s24 }
  0x56   :  { %p7454_p9 = scmp.lt.s32.totalorder %s7452_s1, %s7448_s21 }
  0x58   :  { %p7455_p10 = por %p7454_p9, %p7453_p8 }
  0x5a   :  { %p7456_p11 = pnand %p7455_p10, %p7449_p7 }
  0x5c   :  { %7459 = shalt.err (!%p7456_p11)
}
  0x5d   :  { %106 = dma.hbm_to_vmem [thread:$0]  %s8617_s14, 16, %s104_s24, [#allocation10]  }
  0x5e   :  { %7504 = dma.done.wait [#allocation4], 1280  }
  0x5f   :  { %7505 = vsyncadd [#allocation4], 4294966016 }
  0x60   :  { %7506 = dma.done.wait [#allocation7], 1040  }
  0x61   :  { %7507 = vsyncadd [#allocation7], 4294966256 }
  0x62   :  { %7508 = dma.done.wait [#allocation10], 32  }
  0x63   :  { %7509 = vsyncadd [#allocation10], 4294967264  ;;  %s8634_s22 = sld [smem:[#allocation20_spill]]  ;;  %s7521_s23 = smov 32   ;;  %vm145_vm0 = vcmask 31744   ;;  %vm135_vm1 = vcmask 261120  }
  0x64   :  { %s8635_s30 = sld [smem:[#allocation21_spill]]  ;;  %s7522_s3 = smov 126   ;;  %v7526_v8 = vmov 0   ;;  %vm152_vm2 = vcmask 1043456   ;;  %vm610_vm3 = vcmask 130048   ;;  %v5594_v58 = vld [vmem:[%s8608_s5 + $0x10] sm:$0xff] }
  0x65   :  { %s7523_s26 = smov 127   ;;  %s7524_s27 = smov 125   ;;  %7028 = vset.pattern.permute.xlu0 %v7526_v8  ;;  %7027 = vset.pattern.permute.xlu1 %v7526_v8  ;;  %vm7528_vm4 = vmmov 0   ;;  %vm2123_vm5 = vcmask 1040384   ;;  %vm2242_vm6 = vcmask 523264   ;;  %vm5461_vm7 = vcmask 254976  }
  0x66   :  { %s7525_s28 = smov 124   ;;  %s8636_s29 = sld [smem:[#allocation22_spill]] }
  0x67   :  { %s8638_s7 = sld [smem:[#allocation24_spill]]  ;;  %s7531_s1 = smov 64  }
  0x68   :  { %s7533_s15 = smov [#allocation13]  }
  0x69   :  { %v5552_v1 = vld [vmem:[%s8634_s22 + $0x4] sm:$0xf]  ;;  %v128_v3 = vld [vmem:[%s8634_s22] sm:$0xf]  ;;  %s8637_s22 = sld [smem:[#allocation23_spill]] }
  0x6a   :  { %132 = vrot.lane.b32.xlu0 %v5552_v1, %s7521_s23  ;;  %v5553_v2 = vld [vmem:[%s8635_s30 + $0x10] sm:$0xff]  ;;  %v5554_v10 = vld [vmem:[%s8635_s30 + $0x18] sm:$0xff]  ;;  %v137_v11 = vld [vmem:[%s8635_s30] sm:$0xff] }
  0x6b   :  { %6004 = vmatprep.mubr.msk.f32.mxu0 %vm145_vm0, %v5553_v2  ;;  %v138_v13 = vld [vmem:[%s8635_s30 + $0x8] sm:$0xff]  ;;  %v5561_v14 = vld [vmem:[%s8635_s30 + $0x20] sm:$0xff]  ;;  %v5566_v17 = vld [vmem:[%s8635_s30 + $0x30] sm:$0xff] }
  0x6c   :  { %v584_v6 = vld [vmem:[%s8636_s29 + $0x8] sm:$0xff]  ;;  %v583_v7 = vld [vmem:[%s8636_s29] sm:$0xff]  ;;  %v5567_v19 = vld [vmem:[%s8635_s30 + $0x38] sm:$0xff] }
  0x6d   :  { %v5562_v16 = vld [vmem:[%s8635_s30 + $0x28] sm:$0xff]  ;;  %v5571_v20 = vld [vmem:[%s8635_s30 + $0x40] sm:$0xff] }
  0x6e   :  { %v5572_v21 = vld [vmem:[%s8635_s30 + $0x48] sm:$0xff]  ;;  %v1049_v31 = vld [vmem:[%s8638_s7] sm:$0xff]  ;;  %s5532_s30 = sshll.u32 %s7533_s15, 4  ;;  %s5533_s30 = int_to_ptr.vmem [resolvable:$true] %s5532_s30 }
  0x6f   :  { %v5576_v24 = vld [vmem:[%s8637_s22 + $0x10] sm:$0xff]  ;;  %v1050_v32 = vld [vmem:[%s8638_s7 + $0x8] sm:$0xff]  ;;  %v5577_v40 = vld [vmem:[%s8637_s22 + $0x18] sm:$0xff] }
  0x70   :  { %6031 = vmatprep.mubr.msk.f32.mxu1 %vm610_vm3, %v5576_v24  ;;  %v597_v41 = vld [vmem:[%s8637_s22] sm:$0xff]  ;;  %v598_v46 = vld [vmem:[%s8637_s22 + $0x8] sm:$0xff]  ;;  %v5586_v53 = vld [vmem:[%s8637_s22 + $0x30] sm:$0xff] }
  0x71   :  { %v5582_v47 = vld [vmem:[%s8637_s22 + $0x20] sm:$0xff]  ;;  %v5583_v52 = vld [vmem:[%s8637_s22 + $0x28] sm:$0xff]  ;;  %v5587_v55 = vld [vmem:[%s8637_s22 + $0x38] sm:$0xff] }
  0x72   :  { %v5590_v56 = vld [vmem:[%s8637_s22 + $0x40] sm:$0xff]  ;;  %v5591_v57 = vld [vmem:[%s8637_s22 + $0x48] sm:$0xff] }
  0x73   :  { %v5601_v24 = vld [vmem:[%s8608_s5 + $0x28] sm:$0xff] }
  0xdc   :  { %v133_v4 = vpop.permute.xlu0 %132 }
  0xdd   :  { %v136_v5 = vsel %vm135_vm1, %v128_v3, %v133_v4  ;;  %v1515_v3 = vld [vmem:[%s8609_s6 + $0x8] sm:$0xff]  ;;  %v1514_v4 = vld [vmem:[%s8609_s6] sm:$0xff] }
  0xde   :  { %316 = vrot.lane.b32.xlu1 %v136_v5, %s7522_s3  ;;  %143 = vrot.lane.b32.xlu0 %v136_v5, %s7523_s26 }
  0xe2   :  { %406 = vrot.lane.b32.xlu1 %v136_v5, %s7524_s27  ;;  %496 = vrot.lane.b32.xlu0 %v136_v5, %s7525_s28 }
  0xe6   :  { %592 = vperm.xlu0 %7028, %v584_v6   ;;  %587 = vperm.xlu1 %7027, %v583_v7  }
 0x150   :  { %v144_v9 = vpop.permute.xlu0 %143  ;;  %v317_v12 = vpop.permute.xlu1 %316 }
 0x151   :  { %6002 = vmatprep.subr.msk.mxu0 %vm152_vm2, %v144_v9 }
 0x152   :  { %6003 = vmatpush3.msk.msra.mxu0 %vm152_vm2, %v144_v9 }
 0x153   :  { %6005 = vmatmul.mubr.msk.f32.vlgmr.msra.gmra.mrb[0].mxu0 %vm145_vm0, %v5554_v10  ;;  %6007 = vmatprep.subr.msk.mxu0 %vm152_vm2, %v136_v5 }
 0x154   :  { %6008 = vmatpush3.msk.msra.mxu0 %vm152_vm2, %v136_v5  ;;  %6009 = vmatprep.mubr.msk.f32.mxu0 %vm145_vm0, %v137_v11  ;;  %v407_v15 = vpop.permute.xlu1 %406  ;;  %v497_v18 = vpop.permute.xlu0 %496 }
 0x155   :  { %6012 = vmatprep.subr.msk.mxu0 %vm152_vm2, %v317_v12 }
 0x15b   :  { %6010 = vmatmul.mubr.msk.f32.vlgmr.msra.gmra.mrb[0].mxu0 %vm145_vm0, %v138_v13  ;;  %v1063_v13 = vld [vmem:[%s8608_s5] sm:$0xff] }
 0x15c   :  { %6013 = vmatpush3.msk.msra.mxu0 %vm152_vm2, %v317_v12  ;;  %6014 = vmatprep.mubr.msk.f32.mxu0 %vm145_vm0, %v5561_v14  ;;  %v5595_v12 = vld [vmem:[%s8608_s5 + $0x18] sm:$0xff] }
 0x15d   :  { %6017 = vmatprep.subr.msk.mxu0 %vm152_vm2, %v407_v15 }
 0x163   :  { %6015 = vmatmul.mubr.msk.f32.vlgmr.msra.gmra.mrb[0].mxu0 %vm145_vm0, %v5562_v16 }
 0x164   :  { %6018 = vmatpush3.msk.msra.mxu0 %vm152_vm2, %v407_v15  ;;  %6019 = vmatprep.mubr.msk.f32.mxu0 %vm145_vm0, %v5566_v17 }
 0x165   :  { %6022 = vmatprep.subr.msk.mxu0 %vm152_vm2, %v497_v18  ;;  %v593_v22 = vpop.permute.xlu0 %592  ;;  %v588_v23 = vpop.permute.xlu1 %587 }
 0x16b   :  { %6020 = vmatmul.mubr.msk.f32.vlgmr.msra.gmra.mrb[0].mxu0 %vm145_vm0, %v5567_v19  ;;  %v5600_v19 = vld [vmem:[%s8608_s5 + $0x20] sm:$0xff] }
 0x16c   :  { %6023 = vmatpush3.msk.msra.mxu0 %vm152_vm2, %v497_v18  ;;  %6024 = vmatprep.mubr.msk.f32.mxu0 %vm145_vm0, %v5571_v20  ;;  %v1064_v18 = vld [vmem:[%s8608_s5 + $0x8] sm:$0xff] }
 0x173   :  { %6025 = vmatmul.mubr.msk.f32.vlgmr.msra.gmra.mrb[0].mxu0 %vm145_vm0, %v5572_v21 }
 0x174   :  { %6066 = vmatprep.mubr.msk.f32.mxu0 %vm610_vm3, %v5594_v58 }
 0x246   :  { %v6026_v25 = vpop.f32.mrb[0].mxu0 }
 0x247   :  { %v596_v26 = vadd.f32 %v6026_v25, %v593_v22  ;;  %v572_v27 = vpop.f32.mrb[1].mxu0  ;;  %v5604_v25 = vld [vmem:[%s8608_s5 + $0x30] sm:$0xff] }
 0x248   :  { %v595_v28 = vadd.f32 %v588_v23, %v572_v27  ;;  %v5605_v27 = vld [vmem:[%s8608_s5 + $0x38] sm:$0xff] }
 0x24a   :  { %v7039_v29 = vpack.i.bf16 %v596_v26, %v595_v28  ;;  %v6626_v30 = vpack.c.bf16 %v596_v26, %v595_v28  ;;  %v5608_v28 = vld [vmem:[%s8608_s5 + $0x40] sm:$0xff] }
 0x24c   :  { %7040 = vrot.lane.b32.xlu0 %v7039_v29, %s7524_s27  ;;  %7030 = vrot.lane.b32.xlu1 %v7039_v29, %s7523_s26 }
 0x250   :  { %1053 = vperm.xlu0 %7028, %v1049_v31   ;;  %7035 = vrot.lane.b32.xlu1 %v7039_v29, %s7522_s3 }
 0x254   :  { %7045 = vrot.lane.b32.xlu1 %v7039_v29, %s7525_s28  ;;  %v5609_v29 = vld [vmem:[%s8608_s5 + $0x48] sm:$0xff] }
 0x258   :  { %1058 = vperm.xlu1 %7027, %v1050_v32  }
 0x2be   :  { %v7031_v33 = vpop.permute.xlu1 %7030  ;;  %v7041_v43 = vpop.permute.xlu0 %7040 }
 0x2bf   :  { %v7033_v34 = vunpack.i.h.bf16 %v7031_v33  ;;  %v7032_v35 = vunpack.i.l.bf16 %v7031_v33  ;;  %v7043_v44 = vunpack.i.h.bf16 %v7041_v43  ;;  %v7042_v45 = vunpack.i.l.bf16 %v7041_v43 }
 0x2c1   :  { %v6622_v36 = vpack.c.bf16 %v7033_v34, %v7032_v35  ;;  %v6634_v48 = vpack.c.bf16 %v7043_v44, %v7042_v45 }
 0x2c2   :  { %v7036_v37 = vpop.permute.xlu1 %7035 }
 0x2c3   :  { %v7038_v38 = vunpack.i.h.bf16 %v7036_v37  ;;  %v7037_v39 = vunpack.i.l.bf16 %v7036_v37  ;;  %6623 = vmatprep.subr.bf16.mxu1 %v6622_v36 }
 0x2c4   :  { %6625 = vmatpush3.bf16.msra.mxu1 %v6622_v36 }
 0x2c5   :  { %6627 = vmatprep.subr.bf16.mxu1 %v6626_v30  ;;  %v6630_v42 = vpack.c.bf16 %v7038_v38, %v7037_v39  ;;  %v1980_v39 = vld [vmem:[%s8611_s8 + $0x8] sm:$0xff] }
 0x2c6   :  { %v7046_v49 = vpop.permute.xlu1 %7045 }
 0x2c7   :  { %6032 = vmatmul.mubr.msk.f32.vlgmr.msra.gmra.mrb[0].mxu1 %vm610_vm3, %v5577_v40  ;;  %v7048_v50 = vunpack.i.h.bf16 %v7046_v49  ;;  %v7047_v51 = vunpack.i.l.bf16 %v7046_v49  ;;  %v1979_v40 = vld [vmem:[%s8611_s8] sm:$0xff] }
 0x2c8   :  { %6629 = vmatpush3.bf16.msra.mxu1 %v6626_v30  ;;  %6038 = vmatprep.mubr.msk.f32.mxu1 %vm610_vm3, %v597_v41  ;;  %v1531_v30 = vld [vmem:[#allocation3 + $0x10] sm:$0xff]  ;;  %v1528_v49 = vld [vmem:[#allocation3] sm:$0xff] }
 0x2c9   :  { %6631 = vmatprep.subr.bf16.mxu1 %v6630_v42  ;;  %v6638_v54 = vpack.c.bf16 %v7048_v50, %v7047_v51 }
 0x2cf   :  { %6039 = vmatmul.mubr.msk.f32.vlgmr.msra.gmra.mrb[0].mxu1 %vm610_vm3, %v598_v46  ;;  %v1054_v61 = vpop.permute.xlu0 %1053 }
 0x2d0   :  { %6633 = vmatpush3.bf16.msra.mxu1 %v6630_v42  ;;  %6045 = vmatprep.mubr.msk.f32.mxu1 %vm610_vm3, %v5582_v47 }
 0x2d1   :  { %6635 = vmatprep.subr.bf16.mxu1 %v6634_v48 }
 0x2d7   :  { %6046 = vmatmul.mubr.msk.f32.vlgmr.msra.gmra.mrb[0].mxu1 %vm610_vm3, %v5583_v52  ;;  %v1059_v59 = vpop.permute.xlu1 %1058 }
 0x2d8   :  { %6637 = vmatpush3.bf16.msra.mxu1 %v6634_v48  ;;  %6052 = vmatprep.mubr.msk.f32.mxu1 %vm610_vm3, %v5586_v53  ;;  %v1532_v48 = vld [vmem:[#allocation3 + $0x18] sm:$0xff] }
 0x2d9   :  { %6639 = vmatprep.subr.bf16.mxu1 %v6638_v54 }
 0x2df   :  { %6053 = vmatmul.mubr.msk.f32.vlgmr.msra.gmra.mrb[0].mxu1 %vm610_vm3, %v5587_v55  ;;  %v1704_v55 = vld [vmem:[#allocation3 + $0x20] sm:$0xff] }
 0x2e0   :  { %6641 = vmatpush3.bf16.msra.mxu1 %v6638_v54  ;;  %6059 = vmatprep.mubr.msk.f32.mxu1 %vm610_vm3, %v5590_v56  ;;  %v1529_v54 = vld [vmem:[#allocation3 + $0x8] sm:$0xff] }
 0x2e7   :  { %6060 = vmatmul.mubr.msk.f32.vlgmr.msra.gmra.mrb[0].mxu1 %vm610_vm3, %v5591_v57 }
 0x2e8   :  { %6101 = vmatprep.mubr.msk.f32.mxu1 %vm610_vm3, %v1531_v30 }
 0x3ba   :  { %v6061_v60 = vpop.f32.mrb[0].mxu1 }
 0x3bb   :  { %v1062_v62 = vadd.f32 %v6061_v60, %v1059_v59  ;;  %v1038_v63 = vpop.f32.mrb[1].mxu1  ;;  %v1705_v60 = vld [vmem:[#allocation3 + $0x28] sm:$0xff] }
 0x3bc   :  { %v1061_v0 = vadd.f32 %v1054_v61, %v1038_v63  ;;  %v1796_v61 = vld [vmem:[#allocation3 + $0x30] sm:$0xff]  ;;  %v1797_v63 = vld [vmem:[#allocation3 + $0x38] sm:$0xff] }
 0x3be   :  { %v7054_v1 = vpack.i.bf16 %v1062_v62, %v1061_v0  ;;  %v6646_v2 = vpack.c.bf16 %v1062_v62, %v1061_v0  ;;  %v1888_v0 = vld [vmem:[#allocation3 + $0x40] sm:$0xff] }
 0x3c0   :  { %7055 = vrot.lane.b32.xlu1 %v7054_v1, %s7522_s3  ;;  %7050 = vrot.lane.b32.xlu0 %v7054_v1, %s7523_s26 }
 0x3c4   :  { %7065 = vrot.lane.b32.xlu1 %v7054_v1, %s7525_s28  ;;  %7060 = vrot.lane.b32.xlu0 %v7054_v1, %s7524_s27  ;;  %v1889_v1 = vld [vmem:[#allocation3 + $0x48] sm:$0xff] }
 0x3c8   :  { %1523 = vperm.xlu1 %7027, %v1515_v3   ;;  %1518 = vperm.xlu0 %7028, %v1514_v4   ;;  %v2000_v3 = vld [vmem:[%s8612_s9 + $0x8] sm:$0xff] }
 0x432   :  { %v7051_v5 = vpop.permute.xlu0 %7050  ;;  %v7056_v8 = vpop.permute.xlu1 %7055 }
 0x433   :  { %v7053_v6 = vunpack.i.h.bf16 %v7051_v5  ;;  %v7052_v7 = vunpack.i.l.bf16 %v7051_v5  ;;  %v7058_v10 = vunpack.i.h.bf16 %v7056_v8  ;;  %v7057_v11 = vunpack.i.l.bf16 %v7056_v8  ;;  %v2101_v5 = vld [vmem:[%s8614_s11] sm:$0xff] }
 0x434   :  { %v7527_v8 = vmov 0.0|0.0  }
 0x435   :  { %v6642_v9 = vpack.c.bf16 %v7053_v6, %v7052_v7  ;;  %v6650_v14 = vpack.c.bf16 %v7058_v10, %v7057_v11  ;;  %v2102_v6 = vld [vmem:[%s8614_s11 + $0x8] sm:$0xff]  ;;  %v2104_v10 = vld [vmem:[%s8614_s11 + $0x18] sm:$0xff] }
 0x436   :  { %v7061_v15 = vpop.permute.xlu0 %7060  ;;  %v7066_v21 = vpop.permute.xlu1 %7065  ;;  %v7903_v7 = vpack.c.bf16 %v2102_v6, %v2101_v5 }
 0x437   :  { %6643 = vmatprep.subr.bf16.mxu0 %v6642_v9  ;;  %v7063_v16 = vunpack.i.h.bf16 %v7061_v15  ;;  %v7062_v17 = vunpack.i.l.bf16 %v7061_v15  ;;  %v7068_v22 = vunpack.i.h.bf16 %v7066_v21  ;;  %v7067_v23 = vunpack.i.l.bf16 %v7066_v21 }
 0x438   :  { %6645 = vmatpush3.bf16.msra.mxu0 %v6642_v9  ;;  %v2103_v9 = vld [vmem:[%s8614_s11 + $0x10] sm:$0xff]  ;;  %s7530_s11 = smov 96  }
 0x439   :  { %6647 = vmatprep.subr.bf16.mxu0 %v6646_v2  ;;  %v6654_v20 = vpack.c.bf16 %v7063_v16, %v7062_v17  ;;  %v6658_v26 = vpack.c.bf16 %v7068_v22, %v7067_v23  ;;  %v7915_v11 = vpack.c.bf16 %v2104_v10, %v2103_v9  ;;  %v2114_v22 = vld [vmem:[%s8619_s16] sm:$0x3] }
 0x43b   :  { %6067 = vmatmul.mubr.msk.f32.vlgmr.msra.gmra.mrb[2].mxu0 %vm610_vm3, %v5595_v12  ;;  %v7529_v12 = vmov 0.0  }
 0x43c   :  { %6649 = vmatpush3.bf16.msra.mxu0 %v6646_v2  ;;  %6073 = vmatprep.mubr.msk.f32.mxu0 %vm610_vm3, %v1063_v13  ;;  %v1999_v2 = vld [vmem:[%s8612_s9] sm:$0xff] }
 0x43d   :  { %6651 = vmatprep.subr.bf16.mxu0 %v6650_v14  ;;  %v6682_v4 = vpack.c.bf16 %v2000_v3, %v1999_v2 }
 0x443   :  { %6074 = vmatmul.mubr.msk.f32.vlgmr.msra.gmra.mrb[2].mxu0 %vm610_vm3, %v1064_v18 }
 0x444   :  { %6653 = vmatpush3.bf16.msra.mxu0 %v6650_v14  ;;  %6080 = vmatprep.mubr.msk.f32.mxu0 %vm610_vm3, %v5600_v19  ;;  %v2115_v19 = vld [vmem:[%s8620_s17] sm:$0x3] }
 0x445   :  { %6655 = vmatprep.subr.bf16.mxu0 %v6654_v20 }
 0x447   :  { %v1524_v31 = vpop.permute.xlu1 %1523  ;;  %v1519_v33 = vpop.permute.xlu0 %1518 }
 0x44b   :  { %6081 = vmatmul.mubr.msk.f32.vlgmr.msra.gmra.mrb[2].mxu0 %vm610_vm3, %v5601_v24 }
 0x44c   :  { %6657 = vmatpush3.bf16.msra.mxu0 %v6654_v20  ;;  %6087 = vmatprep.mubr.msk.f32.mxu0 %vm610_vm3, %v5604_v25  ;;  %v5622_v25 = vld [vmem:[#allocation6] ss:$0 sm:$0xff] }
 0x44d   :  { %6659 = vmatprep.subr.bf16.mxu0 %v6658_v26 }
 0x453   :  { %6088 = vmatmul.mubr.msk.f32.vlgmr.msra.gmra.mrb[2].mxu0 %vm610_vm3, %v5605_v27 }
 0x454   :  { %6661 = vmatpush3.bf16.msra.mxu0 %v6658_v26  ;;  %6094 = vmatprep.mubr.msk.f32.mxu0 %vm610_vm3, %v5608_v28 }
 0x455   :  { %6683 = vmatprep.subr.bf16.mxu0 %v6682_v4 }
 0x45b   :  { %6095 = vmatmul.mubr.msk.f32.vlgmr.msra.gmra.mrb[2].mxu0 %vm610_vm3, %v5609_v29 }
 0x45c   :  { %6685 = vmatpush3.bf16.msra.mxu0 %v6682_v4 }
 0x45d   :  { %6686 = vmatprep.subr.bf16.mxu0 %v7527_v8 }
 0x52e   :  { %v6096_v32 = vpop.f32.mrb[2].mxu0 }
 0x52f   :  { %v1527_v34 = vadd.f32 %v6096_v32, %v1524_v31  ;;  %v1503_v35 = vpop.f32.mrb[3].mxu0 }
 0x530   :  { %v1526_v36 = vadd.f32 %v1519_v33, %v1503_v35 }
 0x532   :  { %v7074_v37 = vpack.i.bf16 %v1527_v34, %v1526_v36  ;;  %v6666_v38 = vpack.c.bf16 %v1527_v34, %v1526_v36 }
 0x534   :  { %7075 = vrot.lane.b32.xlu1 %v7074_v37, %s7522_s3  ;;  %7070 = vrot.lane.b32.xlu0 %v7074_v37, %s7523_s26 }
 0x538   :  { %7085 = vrot.lane.b32.xlu1 %v7074_v37, %s7525_s28  ;;  %7080 = vrot.lane.b32.xlu0 %v7074_v37, %s7524_s27 }
 0x53c   :  { %1988 = vperm.xlu1 %7027, %v1980_v39   ;;  %1983 = vperm.xlu0 %7028, %v1979_v40  }
 0x5a6   :  { %v7071_v41 = vpop.permute.xlu0 %7070  ;;  %v7076_v44 = vpop.permute.xlu1 %7075 }
 0x5a7   :  { %v7073_v42 = vunpack.i.h.bf16 %v7071_v41  ;;  %v7072_v43 = vunpack.i.l.bf16 %v7071_v41  ;;  %v7078_v46 = vunpack.i.h.bf16 %v7076_v44  ;;  %v7077_v47 = vunpack.i.l.bf16 %v7076_v44 }
 0x5a9   :  { %v6662_v45 = vpack.c.bf16 %v7073_v42, %v7072_v43  ;;  %v6670_v50 = vpack.c.bf16 %v7078_v46, %v7077_v47 }
 0x5aa   :  { %v7081_v51 = vpop.permute.xlu0 %7080  ;;  %v7086_v57 = vpop.permute.xlu1 %7085 }
 0x5ab   :  { %6663 = vmatprep.subr.bf16.mxu1 %v6662_v45  ;;  %v7083_v52 = vunpack.i.h.bf16 %v7081_v51  ;;  %v7082_v53 = vunpack.i.l.bf16 %v7081_v51  ;;  %v7088_v58 = vunpack.i.h.bf16 %v7086_v57  ;;  %v7087_v59 = vunpack.i.l.bf16 %v7086_v57 }
 0x5ac   :  { %6665 = vmatpush3.bf16.msra.mxu1 %v6662_v45 }
 0x5ad   :  { %6667 = vmatprep.subr.bf16.mxu1 %v6666_v38  ;;  %v6674_v56 = vpack.c.bf16 %v7083_v52, %v7082_v53  ;;  %v6678_v62 = vpack.c.bf16 %v7088_v58, %v7087_v59 }
 0x5af   :  { %6102 = vmatmul.mubr.msk.f32.vlgmr.msra.gmra.mrb[2].mxu1 %vm610_vm3, %v1532_v48 }
 0x5b0   :  { %6669 = vmatpush3.bf16.msra.mxu1 %v6666_v38  ;;  %6108 = vmatprep.mubr.msk.f32.mxu1 %vm610_vm3, %v1528_v49 }
 0x5b1   :  { %6671 = vmatprep.subr.bf16.mxu1 %v6670_v50 }
 0x5b7   :  { %6109 = vmatmul.mubr.msk.f32.vlgmr.msra.gmra.mrb[2].mxu1 %vm610_vm3, %v1529_v54 }
 0x5b8   :  { %6673 = vmatpush3.bf16.msra.mxu1 %v6670_v50  ;;  %6115 = vmatprep.mubr.msk.f32.mxu1 %vm610_vm3, %v1704_v55 }
 0x5b9   :  { %6675 = vmatprep.subr.bf16.mxu1 %v6674_v56 }
 0x5bb   :  { %v1989_v13 = vpop.permute.xlu1 %1988  ;;  %v1984_v15 = vpop.permute.xlu0 %1983 }
 0x5bf   :  { %6116 = vmatmul.mubr.msk.f32.vlgmr.msra.gmra.mrb[2].mxu1 %vm610_vm3, %v1705_v60 }
 0x5c0   :  { %6677 = vmatpush3.bf16.msra.mxu1 %v6674_v56  ;;  %6122 = vmatprep.mubr.msk.f32.mxu1 %vm610_vm3, %v1796_v61 }
 0x5c1   :  { %6679 = vmatprep.subr.bf16.mxu1 %v6678_v62 }
 0x5c7   :  { %6123 = vmatmul.mubr.msk.f32.vlgmr.msra.gmra.mrb[2].mxu1 %vm610_vm3, %v1797_v63 }
 0x5c8   :  { %6681 = vmatpush3.bf16.msra.mxu1 %v6678_v62  ;;  %6129 = vmatprep.mubr.msk.f32.mxu1 %vm610_vm3, %v1888_v0 }
 0x5c9   :  { %6704 = vmatprep.subr.bf16.mxu1 %v7527_v8 }
 0x5cf   :  { %6130 = vmatmul.mubr.msk.f32.vlgmr.msra.gmra.mrb[2].mxu1 %vm610_vm3, %v1889_v1 }
 0x5d0   :  { %6706 = vmatpush3.bf16.msra.mxu1 %v7903_v7  ;;  %6180 = vmatprep.mubr.msk.f32.mxu1 %vm7528_vm4, %v7529_v12 }
 0x5d1   :  { %6707 = vmatprep.subr.bf16.mxu1 %v7527_v8 }
 0x5d4   :  { %6709 = vmatpush3.bf16.msra.mxu1 %v7915_v11 }
 0x5d5   :  { %6710 = vmatprep.subr.bf16.mxu1 %v7527_v8 }
 0x6a2   :  { %v6131_v14 = vpop.f32.mrb[2].mxu1 }
 0x6a3   :  { %v1992_v16 = vadd.f32 %v6131_v14, %v1989_v13  ;;  %v1968_v17 = vpop.f32.mrb[3].mxu1 }
 0x6a4   :  { %v1991_v18 = vadd.f32 %v1984_v15, %v1968_v17 }
 0x6a5   :  { %1997 = vrot.lane.b32.xlu1 %v1992_v16, %s7530_s11 }
 0x6a6   :  { %1995 = vrot.lane.b32.xlu0 %v1991_v18, %s7530_s11  ;;  %6136 = vmatprep.mubr.msk.f32.mxu0 %vm610_vm3, %v1991_v18 }
 0x6a7   :  { %6137 = vmatmul.mubr.msk.f32.vlgmr.msra.gmra.mrb[4].mxu0 %vm610_vm3, %v1992_v16 }
 0x6a8   :  { %6688 = vmatpush3.bf16.msra.mxu0 %v7903_v7 }
 0x6a9   :  { %6689 = vmatprep.subr.bf16.mxu0 %v7527_v8  ;;  %2207 = vrot.lane.b32.xlu1 %v2115_v19, %s7521_s23 }
 0x6ac   :  { %6691 = vmatpush3.bf16.msra.mxu0 %v7915_v11 }
 0x6ad   :  { %6692 = vmatprep.subr.bf16.mxu0 %v7527_v8 }
 0x717   :  { %v1998_v21 = vpop.permute.xlu1 %1997 }
 0x718   :  { %v1996_v20 = vpop.permute.xlu0 %1995 }
 0x719   :  { %6139 = vmatprep.mubr.msk.f32.mxu0 %vm610_vm3, %v1996_v20 }
 0x71a   :  { %6140 = vmatmul.mubr.msk.f32.gmra.mrb[6].mxu0 %vm610_vm3, %v1998_v21 }
 0x71b   :  { %6150 = vmatprep.mubr.msk.f32.mxu0 %vm7528_vm4, %v7529_v12 }
 0x71e   :  { %6151 = vmatmul.mubr.msk.f32.vlgmr.msra.gmra.mrb[8].mxu0 %vm135_vm1, %v2114_v22 }
 0x71f   :  { %6169 = vmatprep.mubr.msk.f32.mxu0 %vm7528_vm4, %v7529_v12 }
 0x77a   :  { %v6138_v23 = vpop.f32.mrb[4].mxu0 }
 0x77b   :  { %v2082_v24 = vpop.f32.mrb[5].mxu0  ;;  %v2088_v26 = vadd.f32 %v6138_v23, %v5622_v25 }
 0x77c   :  { %v2083_v27 = vadd.f32 %v5622_v25, %v2082_v24 }
 0x77d   :  { %v4007_v28 = vrot.slane %v2088_v26, 1  ;;  %v4213_v29 = vrot.slane %v2088_v26, 2  ;;  %v4421_v33 = vrot.slane %v2088_v26, 3  ;;  %v4629_v34 = vrot.slane %v2088_v26, 4 }
 0x77e   :  { %v2345_v31 = vrot.slane %v2083_v27, 1  ;;  %v2551_v32 = vrot.slane %v2083_v27, 2  ;;  %v2759_v37 = vrot.slane %v2083_v27, 3  ;;  %v2967_v38 = vrot.slane %v2083_v27, 4 }
 0x77f   :  { %v3175_v39 = vrot.slane %v2083_v27, 5  ;;  %v3383_v41 = vrot.slane %v2083_v27, 6  ;;  %v3591_v42 = vrot.slane %v2083_v27, 7  ;;  %v4837_v43 = vrot.slane %v2088_v26, 5 }
 0x780   :  { %v5045_v9 = vrot.slane %v2088_v26, 6  ;;  %v5253_v14 = vrot.slane %v2088_v26, 7 }
 0x7ed   :  { %v6141_v30 = vpop.f32.mrb[6].mxu0 }
 0x7ee   :  { %v2098_v35 = vadd.f32 %v6141_v30, %v5622_v25  ;;  %v2092_v36 = vpop.f32.mrb[7].mxu0  ;;  %v2105_v30 = vld [vmem:[#allocation8] sm:$0xff] }
 0x7ef   :  { %v2093_v40 = vadd.f32 %v5622_v25, %v2092_v36  ;;  %v2109_v36 = vld [vmem:[#allocation8 + $0x20] sm:$0xff] }
 0x7f0   :  { %v3800_v44 = vrot.slane %v2098_v35, 7  ;;  %v7944_v45 = vsel %vm2123_vm5, %v4007_v28, %v2098_v35  ;;  %v4215_v46 = vrot.slane %v2098_v35, 1  ;;  %v4423_v47 = vrot.slane %v2098_v35, 2 }
 0x7f1   :  { %v2121_v48 = vrot.slane %v2093_v40, 7  ;;  %v2194_v49 = vpop.f32.mrb[8].mxu0  ;;  %v7947_v50 = vsel %vm2123_vm5, %v2345_v31, %v2093_v40  ;;  %v2553_v51 = vrot.slane %v2093_v40, 1  ;;  %v2761_v52 = vrot.slane %v2093_v40, 2  ;;  %v2106_v31 = vld [vmem:[#allocation8 + $0x8] sm:$0xff] }
 0x7f2   :  { %v6152_v53 = vpop.f32.mrb[9].mxu0  ;;  %v2969_v54 = vrot.slane %v2093_v40, 3  ;;  %v3177_v55 = vrot.slane %v2093_v40, 4  ;;  %v3385_v56 = vrot.slane %v2093_v40, 5  ;;  %v3593_v57 = vrot.slane %v2093_v40, 6  ;;  %v2112_v40 = vld [vmem:[#allocation8 + $0x38] sm:$0xff] }
 0x7f3   :  { %v2124_v58 = vsel %vm2123_vm5, %v2083_v27, %v2121_v48  ;;  %v7951_v59 = vsel %vm2123_vm5, %v2551_v32, %v2553_v51  ;;  %v7954_v60 = vsel %vm2123_vm5, %v2759_v37, %v2761_v52  ;;  %v7957_v61 = vsel %vm2123_vm5, %v2088_v26, %v3800_v44  ;;  %v2208_v26 = vpop.permute.xlu1 %2207  ;;  %v2107_v32 = vld [vmem:[#allocation8 + $0x10] sm:$0xff]  ;;  %v2110_v37 = vld [vmem:[#allocation8 + $0x28] sm:$0xff]  ;;  %v8035_v51 = vld [vmem:[#allocation9] ss:$0 sm:$0xff] }
 0x7f4   :  { %v2198_v62 = vadd.f32 %v2194_v49, %v2124_v58  ;;  %v7960_v63 = vsel %vm2123_vm5, %v2967_v38, %v2969_v54  ;;  %v7963_v0 = vsel %vm2123_vm5, %v3175_v39, %v3177_v55  ;;  %v7966_v1 = vsel %vm2123_vm5, %v3383_v41, %v3385_v56  ;;  %v2111_v39 = vld [vmem:[#allocation8 + $0x30] sm:$0xff] }
 0x7f5   :  { %v7969_v2 = vsel %vm2123_vm5, %v3591_v42, %v3593_v57  ;;  %v7972_v3 = vsel %vm2123_vm5, %v4213_v29, %v4215_v46  ;;  %v7975_v4 = vsel %vm2123_vm5, %v4421_v33, %v4423_v47  ;;  %v4631_v5 = vrot.slane %v2098_v35, 3 }
 0x7f6   :  { %7089 = vtanh.f32 %v2198_v62  ;;  %v4839_v6 = vrot.slane %v2098_v35, 4  ;;  %v5047_v10 = vrot.slane %v2098_v35, 5  ;;  %v5255_v15 = vrot.slane %v2098_v35, 6 }
 0x7f7   :  { %v7978_v13 = vsel %vm2123_vm5, %v4629_v34, %v4631_v5  ;;  %v5630_v20 = vmul.f32 -1.442695, %v2198_v62  ;;  %v7994_v33 = vpack.c.bf16 %v2106_v31, %v2105_v30  ;;  %v2108_v34 = vld [vmem:[#allocation8 + $0x18] sm:$0xff]  ;;  %v8001_v38 = vpack.c.bf16 %v2110_v37, %v2109_v36  ;;  %v5628_v5 = vld [vmem:[%s8620_s17 + $0x2] sm:$0x3]  ;;  %s7532_s17 = smov [#allocation12]  }
 0x7f8   :  { %v7981_v16 = vsel %vm2123_vm5, %v4837_v43, %v4839_v6  ;;  %v7984_v17 = vsel %vm2123_vm5, %v5045_v9, %v5047_v10  ;;  %v7987_v18 = vsel %vm2123_vm5, %v5253_v14, %v5255_v15  ;;  %v7997_v35 = vpack.c.bf16 %v2108_v34, %v2107_v32  ;;  %v5627_v43 = vld [vmem:[%s8619_s16 + $0x2] sm:$0x3]  ;;  %s5520_s5 = sshll.u32 %s7532_s17, 4  ;;  %s5521_s5 = int_to_ptr.vmem [resolvable:$true] %s5520_s5 }
 0x7f9   :  { %7091 = vpow2.f32 %v5630_v20  ;;  %6694 = vmatpush3.bf16.msra.mxu0 %v7994_v33  ;;  %v8006_v42 = vpack.c.bf16 %v2112_v40, %v2111_v39  ;;  %s7460_s2 = scalar_lea.vmem %s5521_s5, 64  ;;  %p7465_p13 = scmp.lt.s32.totalorder %s5521_s5, %s5521_s5 }
 0x7fa   :  { %6695 = vmatprep.subr.bf16.mxu0 %v7527_v8  ;;  %p7461_p12 = scmp.ne.s32.totalorder %s5521_s5, %s7460_s2  ;;  %p7466_p0 = scmp.lt.s32.totalorder %s7460_s2, %s7460_s2 }
 0x7fc   :  { %p7467_p1 = por %p7466_p0, %p7465_p13 }
 0x7fd   :  { %6697 = vmatpush3.bf16.msra.mxu0 %v7997_v35 }
 0x7fe   :  { %6698 = vmatprep.subr.bf16.mxu0 %v7527_v8  ;;  %p7468_p2 = pnand %p7467_p1, %p7461_p12 }
 0x800   :  { %v7090_v19 = vpop.eup %7089 }
 0x801   :  { %2212 = vrot.lane.b32.xlu0 %v7090_v19, %s7531_s1  ;;  %6700 = vmatpush3.bf16.msra.mxu0 %v8001_v38 }
 0x802   :  { %6701 = vmatprep.subr.bf16.mxu0 %v7527_v8 }
 0x803   :  { %v7092_v21 = vpop.eup %7091 }
 0x804   :  { %v2202_v22 = vadd.f32 1.0, %v7092_v21 }
 0x805   :  { %6703 = vmatpush3.bf16.msra.mxu0 %v8006_v42 }
 0x806   :  { %7093 = vrcp.f32 %v2202_v22  ;;  %6722 = vmatprep.subr.bf16.mxu0 %v7527_v8 }
 0x810   :  { %v7094_v23 = vpop.eup %7093 }
 0x811   :  { %v2210_v27 = vmul.f32 %v7094_v23, %v2208_v26 }
 0x873   :  { %v2213_v24 = vpop.permute.xlu0 %2212 }
 0x874   :  { %v2215_v25 = vmul.f32 %v7094_v23, %v2213_v24 }
 0x876   :  { %2217 = vrot.lane.b32.xlu0 %v2215_v25, %s7521_s23 }
 0x8e8   :  { %v2218_v28 = vpop.permute.xlu0 %2217 }
 0x8e9   :  { %v7991_v29 = vadd.f32 %v2218_v28, %v2210_v27 }
 0x8eb   :  { %7095 = vtanh.f32 %v7991_v29 }
 0x8f5   :  { %v7096_v41 = vpop.eup %7095 }
 0x8f6   :  { %2223 = vrot.lane.b32.xlu1 %v7096_v41, %s7531_s1 }
 0x8fa   :  { %2232 = vrot.lane.b32.xlu1 %v5627_v43, %s7521_s23 }
 0x968   :  { %v2224_v44 = vpop.permute.xlu1 %2223 }
 0x969   :  { %v2226_v46 = vmul.f32 %v7094_v23, %v2224_v44 }
 0x96b   :  { %2228 = vrot.lane.b32.xlu0 %v2226_v46, %s7521_s23 }
 0x96c   :  { %v2233_v47 = vpop.permute.xlu1 %2232 }
 0x9dd   :  { %v2229_v48 = vpop.permute.xlu0 %2228 }
 0x9de   :  { %v2235_v49 = vsel %vm135_vm1, %v2229_v48, %v2233_v47  ;;  %6181 = vmatmul.mubr.msk.f32.vlgmr.msra.gmra.mrb[4].mxu1 %vm135_vm1, %v2229_v48 }
 0x9df   :  { %6170 = vmatmul.mubr.msk.f32.vlgmr.msra.gmra.mrb[10].mxu0 %vm2242_vm6, %v2235_v49  ;;  %6712 = vmatpush3.bf16.msra.mxu1 %v7994_v33 }
 0x9e0   :  { %6713 = vmatprep.subr.bf16.mxu1 %v7527_v8  ;;  %6724 = vmatpush3.bf16.msra.mxu0 %v7903_v7 }
 0x9e1   :  { %6725 = vmatprep.subr.bf16.mxu0 %v7527_v8  ;;  %6210 = vmatprep.mubr.msk.f32.mxu0 %vm7528_vm4, %v7529_v12 }
 0x9e2   :  { %6199 = vmatprep.mubr.msk.f32.mxu1 %vm7528_vm4, %v7529_v12 }
 0x9e3   :  { %6715 = vmatpush3.bf16.msra.mxu1 %v7997_v35 }
 0x9e4   :  { %6716 = vmatprep.subr.bf16.mxu1 %v7527_v8  ;;  %6727 = vmatpush3.bf16.msra.mxu0 %v7915_v11 }
 0x9e5   :  { %6728 = vmatprep.subr.bf16.mxu0 %v7527_v8 }
 0x9e7   :  { %6718 = vmatpush3.bf16.msra.mxu1 %v8001_v38 }
 0x9e8   :  { %6719 = vmatprep.subr.bf16.mxu1 %v7527_v8 }
 0x9eb   :  { %6721 = vmatpush3.bf16.msra.mxu1 %v8006_v42 }
 0x9ec   :  { %6740 = vmatprep.subr.bf16.mxu1 %v7527_v8 }
 0xab1   :  { %v2416_v52 = vpop.f32.mrb[4].mxu1 }
 0xab2   :  { %v2420_v53 = vadd.f32 %v2416_v52, %v7947_v50  ;;  %v2312_v54 = vpop.f32.mrb[10].mxu0  ;;  %v6182_v55 = vpop.f32.mrb[5].mxu1 }
 0xab3   :  { %v2313_v56 = vadd.f32 %v8035_v51, %v2312_v54  ;;  %v6171_v57 = vpop.f32.mrb[11].mxu0 }
 0xab4   :  { %7097 = vtanh.f32 %v2420_v53  ;;  %v5635_v50 = vmul.f32 -1.442695, %v2420_v53 }
 0xab5   :  { %7099 = vtanh.f32 %v2313_v56  ;;  %v5633_v6 = vmul.f32 -1.442695, %v2313_v56 }
 0xab6   :  { %7101 = vpow2.f32 %v5635_v50 }
 0xab7   :  { %7103 = vpow2.f32 %v5633_v6 }
 0xabe   :  { %v7098_v58 = vpop.eup %7097 }
 0xabf   :  { %v7100_v62 = vpop.eup %7099  ;;  %2430 = vrot.lane.b32.xlu1 %v7098_v58, %s7531_s1 }
 0xac0   :  { %2329 = vrot.lane.b32.xlu0 %v7100_v62, %s7531_s1  ;;  %v7102_v9 = vpop.eup %7101 }
 0xac1   :  { %v7104_v10 = vpop.eup %7103  ;;  %v2424_v14 = vadd.f32 1.0, %v7102_v9 }
 0xac2   :  { %v2319_v15 = vadd.f32 1.0, %v7104_v10 }
 0xac3   :  { %7105 = vrcp.f32 %v2424_v14 }
 0xac4   :  { %2324 = vrot.lane.b32.xlu0 %v5628_v5, %s7521_s23  ;;  %7107 = vrcp.f32 %v2319_v15 }
 0xacd   :  { %v7106_v19 = vpop.eup %7105 }
 0xace   :  { %v7108_v21 = vpop.eup %7107  ;;  %v2428_v26 = vmul.f32 %v7106_v19, %v7991_v29 }
 0xb31   :  { %v2431_v20 = vpop.permute.xlu1 %2430 }
 0xb32   :  { %v2433_v22 = vmul.f32 %v7106_v19, %v2431_v20  ;;  %v2330_v23 = vpop.permute.xlu0 %2329 }
 0xb33   :  { %v2332_v24 = vmul.f32 %v7108_v21, %v2330_v23 }
 0xb34   :  { %2435 = vrot.lane.b32.xlu0 %v2433_v22, %s7521_s23 }
 0xb35   :  { %2334 = vrot.lane.b32.xlu1 %v2332_v24, %s7521_s23 }
 0xb36   :  { %v2325_v25 = vpop.permute.xlu0 %2324 }
 0xb37   :  { %v2327_v27 = vmul.f32 %v7108_v21, %v2325_v25 }
 0xba6   :  { %v2436_v28 = vpop.permute.xlu0 %2435 }
 0xba7   :  { %v8048_v30 = vadd.f32 %v2436_v28, %v2428_v26  ;;  %v2335_v31 = vpop.permute.xlu1 %2334 }
 0xba8   :  { %v8050_v32 = vadd.f32 %v2335_v31, %v2327_v27 }
 0xba9   :  { %7109 = vtanh.f32 %v8048_v30 }
 0xbaa   :  { %7111 = vtanh.f32 %v8050_v32 }
 0xbb3   :  { %v7110_v34 = vpop.eup %7109 }
 0xbb4   :  { %v7112_v36 = vpop.eup %7111  ;;  %2441 = vrot.lane.b32.xlu0 %v7110_v34, %s7531_s1 }
 0xbb5   :  { %2340 = vrot.lane.b32.xlu1 %v7112_v36, %s7531_s1 }
 0xc26   :  { %v2442_v37 = vpop.permute.xlu0 %2441 }
 0xc27   :  { %v2444_v39 = vmul.f32 %v7106_v19, %v2442_v37  ;;  %v2341_v29 = vpop.permute.xlu1 %2340 }
 0xc28   :  { %v2343_v40 = vmul.f32 %v7108_v21, %v2341_v29 }
 0xc29   :  { %2446 = vrot.lane.b32.xlu1 %v2444_v39, %s7521_s23 }
 0xc2a   :  { %2450 = vrot.lane.b32.xlu0 %v2343_v40, %s7531_s1 }
 0xc9b   :  { %v2447_v41 = vpop.permute.xlu1 %2446 }
 0xc9c   :  { %v2451_v43 = vpop.permute.xlu0 %2450  ;;  %6211 = vmatmul.mubr.msk.f32.vlgmr.msra.gmra.mrb[12].mxu0 %vm135_vm1, %v2447_v41 }
 0xc9d   :  { %v2453_v44 = vsel %vm135_vm1, %v2447_v41, %v2451_v43  ;;  %6730 = vmatpush3.bf16.msra.mxu0 %v7994_v33  ;;  %6229 = vmatprep.mubr.msk.f32.mxu0 %vm7528_vm4, %v7529_v12 }
 0xc9e   :  { %6200 = vmatmul.mubr.msk.f32.vlgmr.msra.gmra.mrb[6].mxu1 %vm2242_vm6, %v2453_v44  ;;  %6731 = vmatprep.subr.bf16.mxu0 %v7527_v8 }
 0xc9f   :  { %6742 = vmatpush3.bf16.msra.mxu1 %v7903_v7  ;;  %6240 = vmatprep.mubr.msk.f32.mxu1 %vm7528_vm4, %v7529_v12 }
 0xca0   :  { %6743 = vmatprep.subr.bf16.mxu1 %v7527_v8 }
 0xca1   :  { %6733 = vmatpush3.bf16.msra.mxu0 %v7997_v35 }
 0xca2   :  { %6734 = vmatprep.subr.bf16.mxu0 %v7527_v8 }
 0xca3   :  { %6745 = vmatpush3.bf16.msra.mxu1 %v7915_v11 }
 0xca4   :  { %6746 = vmatprep.subr.bf16.mxu1 %v7527_v8 }
 0xca5   :  { %6736 = vmatpush3.bf16.msra.mxu0 %v8001_v38 }
 0xca6   :  { %6737 = vmatprep.subr.bf16.mxu0 %v7527_v8 }
 0xca9   :  { %6739 = vmatpush3.bf16.msra.mxu0 %v8006_v42 }
 0xcaa   :  { %6758 = vmatprep.subr.bf16.mxu0 %v7527_v8 }
 0xd6f   :  { %v2624_v46 = vpop.f32.mrb[12].mxu0 }
 0xd70   :  { %v2628_v47 = vadd.f32 %v2624_v46, %v7951_v59  ;;  %v6212_v48 = vpop.f32.mrb[13].mxu0 }
 0xd71   :  { %v2523_v49 = vpop.f32.mrb[6].mxu1 }
 0xd72   :  { %7113 = vtanh.f32 %v2628_v47  ;;  %v2524_v52 = vadd.f32 %v8035_v51, %v2523_v49  ;;  %v6201_v53 = vpop.f32.mrb[7].mxu1  ;;  %v5639_v56 = vmul.f32 -1.442695, %v2628_v47 }
 0xd74   :  { %7115 = vtanh.f32 %v2524_v52  ;;  %v5637_v57 = vmul.f32 -1.442695, %v2524_v52 }
 0xd75   :  { %7117 = vpow2.f32 %v5639_v56 }
 0xd76   :  { %7119 = vpow2.f32 %v5637_v57 }
 0xd7c   :  { %v7114_v54 = vpop.eup %7113 }
 0xd7d   :  { %2638 = vrot.lane.b32.xlu0 %v7114_v54, %s7531_s1 }
 0xd7e   :  { %v7116_v55 = vpop.eup %7115 }
 0xd7f   :  { %2536 = vrot.lane.b32.xlu1 %v7116_v55, %s7531_s1  ;;  %v7118_v58 = vpop.eup %7117 }
 0xd80   :  { %v7120_v62 = vpop.eup %7119  ;;  %v2632_v59 = vadd.f32 1.0, %v7118_v58 }
 0xd81   :  { %v2530_v5 = vadd.f32 1.0, %v7120_v62 }
 0xd82   :  { %7121 = vrcp.f32 %v2632_v59 }
 0xd83   :  { %7123 = vrcp.f32 %v2530_v5 }
 0xd8c   :  { %v7122_v50 = vpop.eup %7121 }
 0xd8d   :  { %v7124_v10 = vpop.eup %7123  ;;  %v2636_v19 = vmul.f32 %v7122_v50, %v8048_v30 }
 0xd8e   :  { %v2534_v22 = vmul.f32 %v7124_v10, %v8050_v32 }
 0xdef   :  { %v2639_v6 = vpop.permute.xlu0 %2638 }
 0xdf0   :  { %v2641_v9 = vmul.f32 %v7122_v50, %v2639_v6 }
 0xdf1   :  { %v2537_v14 = vpop.permute.xlu1 %2536 }
 0xdf2   :  { %2643 = vrot.lane.b32.xlu0 %v2641_v9, %s7521_s23  ;;  %v2539_v15 = vmul.f32 %v7124_v10, %v2537_v14 }
 0xdf4   :  { %2541 = vrot.lane.b32.xlu1 %v2539_v15, %s7521_s23 }
 0xe64   :  { %v2644_v20 = vpop.permute.xlu0 %2643 }
 0xe65   :  { %v8084_v21 = vadd.f32 %v2644_v20, %v2636_v19 }
 0xe66   :  { %v2542_v23 = vpop.permute.xlu1 %2541 }
 0xe67   :  { %7125 = vtanh.f32 %v8084_v21  ;;  %v8088_v24 = vadd.f32 %v2542_v23, %v2534_v22 }
 0xe69   :  { %7127 = vtanh.f32 %v8088_v24 }
 0xe71   :  { %v7126_v25 = vpop.eup %7125 }
 0xe72   :  { %2649 = vrot.lane.b32.xlu0 %v7126_v25, %s7531_s1 }
 0xe73   :  { %v7128_v26 = vpop.eup %7127 }
 0xe74   :  { %2547 = vrot.lane.b32.xlu1 %v7128_v26, %s7531_s1 }
 0xee4   :  { %v2650_v27 = vpop.permute.xlu0 %2649 }
 0xee5   :  { %v2652_v28 = vmul.f32 %v7122_v50, %v2650_v27 }
 0xee6   :  { %v2548_v30 = vpop.permute.xlu1 %2547 }
 0xee7   :  { %2654 = vrot.lane.b32.xlu1 %v2652_v28, %s7521_s23  ;;  %v2550_v31 = vmul.f32 %v7124_v10, %v2548_v30 }
 0xee9   :  { %2658 = vrot.lane.b32.xlu0 %v2550_v31, %s7531_s1 }
 0xf59   :  { %v2655_v32 = vpop.permute.xlu1 %2654 }
 0xf5a   :  { %6241 = vmatmul.mubr.msk.f32.vlgmr.msra.gmra.mrb[8].mxu1 %vm135_vm1, %v2655_v32 }
 0xf5b   :  { %6748 = vmatpush3.bf16.msra.mxu1 %v7994_v33  ;;  %6259 = vmatprep.mubr.msk.f32.mxu1 %vm7528_vm4, %v7529_v12  ;;  %v2659_v34 = vpop.permute.xlu0 %2658 }
 0xf5c   :  { %6749 = vmatprep.subr.bf16.mxu1 %v7527_v8  ;;  %v2661_v36 = vsel %vm135_vm1, %v2655_v32, %v2659_v34 }
 0xf5d   :  { %6230 = vmatmul.mubr.msk.f32.vlgmr.msra.gmra.mrb[14].mxu0 %vm2242_vm6, %v2661_v36 }
 0xf5e   :  { %6760 = vmatpush3.bf16.msra.mxu0 %v7903_v7  ;;  %6270 = vmatprep.mubr.msk.f32.mxu0 %vm7528_vm4, %v7529_v12 }
 0xf5f   :  { %6751 = vmatpush3.bf16.msra.mxu1 %v7997_v35  ;;  %6761 = vmatprep.subr.bf16.mxu0 %v7527_v8 }
 0xf60   :  { %6752 = vmatprep.subr.bf16.mxu1 %v7527_v8 }
 0xf62   :  { %6763 = vmatpush3.bf16.msra.mxu0 %v7915_v11 }
 0xf63   :  { %6754 = vmatpush3.bf16.msra.mxu1 %v8001_v38  ;;  %6764 = vmatprep.subr.bf16.mxu0 %v7527_v8 }
 0xf64   :  { %6755 = vmatprep.subr.bf16.mxu1 %v7527_v8 }
 0xf67   :  { %6757 = vmatpush3.bf16.msra.mxu1 %v8006_v42 }
 0xf68   :  { %6776 = vmatprep.subr.bf16.mxu1 %v7527_v8 }
0x102d   :  { %v2832_v37 = vpop.f32.mrb[8].mxu1 }
0x102e   :  { %v2836_v39 = vadd.f32 %v2832_v37, %v7954_v60  ;;  %v6242_v29 = vpop.f32.mrb[9].mxu1 }
0x1030   :  { %7129 = vtanh.f32 %v2836_v39  ;;  %v2731_v40 = vpop.f32.mrb[14].mxu0  ;;  %v5643_v47 = vmul.f32 -1.442695, %v2836_v39 }
0x1031   :  { %v2732_v41 = vadd.f32 %v8035_v51, %v2731_v40  ;;  %v6231_v43 = vpop.f32.mrb[15].mxu0 }
0x1033   :  { %7131 = vtanh.f32 %v2732_v41  ;;  %v5641_v48 = vmul.f32 -1.442695, %v2732_v41 }
0x1034   :  { %7133 = vpow2.f32 %v5643_v47 }
0x1035   :  { %7135 = vpow2.f32 %v5641_v48 }
0x103a   :  { %v7130_v44 = vpop.eup %7129 }
0x103b   :  { %2846 = vrot.lane.b32.xlu0 %v7130_v44, %s7531_s1 }
0x103d   :  { %v7132_v46 = vpop.eup %7131 }
0x103e   :  { %2744 = vrot.lane.b32.xlu1 %v7132_v46, %s7531_s1  ;;  %v7134_v49 = vpop.eup %7133 }
0x103f   :  { %v2840_v52 = vadd.f32 1.0, %v7134_v49  ;;  %v7136_v60 = vpop.eup %7135 }
0x1040   :  { %v2738_v53 = vadd.f32 1.0, %v7136_v60 }
0x1041   :  { %7137 = vrcp.f32 %v2840_v52 }
0x1042   :  { %7139 = vrcp.f32 %v2738_v53 }
0x104b   :  { %v7138_v54 = vpop.eup %7137 }
0x104c   :  { %v7140_v57 = vpop.eup %7139  ;;  %v2844_v59 = vmul.f32 %v7138_v54, %v8084_v21 }
0x104d   :  { %v2742_v6 = vmul.f32 %v7140_v57, %v8088_v24 }
0x10ad   :  { %v2847_v55 = vpop.permute.xlu0 %2846 }
0x10ae   :  { %v2849_v56 = vmul.f32 %v7138_v54, %v2847_v55 }
0x10b0   :  { %2851 = vrot.lane.b32.xlu0 %v2849_v56, %s7521_s23  ;;  %v2745_v58 = vpop.permute.xlu1 %2744 }
0x10b1   :  { %v2747_v62 = vmul.f32 %v7140_v57, %v2745_v58 }
0x10b3   :  { %2749 = vrot.lane.b32.xlu1 %v2747_v62, %s7521_s23 }
0x1122   :  { %v2852_v5 = vpop.permute.xlu0 %2851 }
0x1123   :  { %v8121_v50 = vadd.f32 %v2852_v5, %v2844_v59 }
0x1125   :  { %7141 = vtanh.f32 %v8121_v50  ;;  %v2750_v9 = vpop.permute.xlu1 %2749 }
0x1126   :  { %v8125_v10 = vadd.f32 %v2750_v9, %v2742_v6 }
0x1128   :  { %7143 = vtanh.f32 %v8125_v10 }
0x112f   :  { %v7142_v14 = vpop.eup %7141 }
0x1130   :  { %2857 = vrot.lane.b32.xlu0 %v7142_v14, %s7531_s1 }
0x1132   :  { %v7144_v15 = vpop.eup %7143 }
0x1133   :  { %2755 = vrot.lane.b32.xlu1 %v7144_v15, %s7531_s1 }
0x11a2   :  { %v2858_v19 = vpop.permute.xlu0 %2857 }
0x11a3   :  { %v2860_v20 = vmul.f32 %v7138_v54, %v2858_v19 }
0x11a5   :  { %2862 = vrot.lane.b32.xlu1 %v2860_v20, %s7521_s23  ;;  %v2756_v21 = vpop.permute.xlu1 %2755 }
0x11a6   :  { %v2758_v22 = vmul.f32 %v7140_v57, %v2756_v21 }
0x11a8   :  { %2866 = vrot.lane.b32.xlu0 %v2758_v22, %s7531_s1 }
0x1217   :  { %v2863_v23 = vpop.permute.xlu1 %2862 }
0x1218   :  { %6271 = vmatmul.mubr.msk.f32.vlgmr.msra.gmra.mrb[16].mxu0 %vm135_vm1, %v2863_v23 }
0x1219   :  { %6766 = vmatpush3.bf16.msra.mxu0 %v7994_v33  ;;  %6289 = vmatprep.mubr.msk.f32.mxu0 %vm7528_vm4, %v7529_v12 }
0x121a   :  { %6767 = vmatprep.subr.bf16.mxu0 %v7527_v8  ;;  %v2867_v24 = vpop.permute.xlu0 %2866 }
0x121b   :  { %v2869_v25 = vsel %vm135_vm1, %v2863_v23, %v2867_v24 }
0x121c   :  { %6260 = vmatmul.mubr.msk.f32.vlgmr.msra.gmra.mrb[10].mxu1 %vm2242_vm6, %v2869_v25 }
0x121d   :  { %6769 = vmatpush3.bf16.msra.mxu0 %v7997_v35  ;;  %6778 = vmatpush3.bf16.msra.mxu1 %v7903_v7 }
0x121e   :  { %6770 = vmatprep.subr.bf16.mxu0 %v7527_v8  ;;  %6779 = vmatprep.subr.bf16.mxu1 %v7527_v8 }
0x121f   :  { %6300 = vmatprep.mubr.msk.f32.mxu1 %vm7528_vm4, %v7529_v12 }
0x1221   :  { %6772 = vmatpush3.bf16.msra.mxu0 %v8001_v38  ;;  %6781 = vmatpush3.bf16.msra.mxu1 %v7915_v11 }
0x1222   :  { %6773 = vmatprep.subr.bf16.mxu0 %v7527_v8  ;;  %6782 = vmatprep.subr.bf16.mxu1 %v7527_v8 }
0x1225   :  { %6775 = vmatpush3.bf16.msra.mxu0 %v8006_v42 }
0x1226   :  { %6794 = vmatprep.subr.bf16.mxu0 %v7527_v8 }
0x12eb   :  { %v3040_v26 = vpop.f32.mrb[16].mxu0 }
0x12ec   :  { %v3044_v27 = vadd.f32 %v3040_v26, %v7960_v63  ;;  %v6272_v28 = vpop.f32.mrb[17].mxu0 }
0x12ee   :  { %7145 = vtanh.f32 %v3044_v27  ;;  %v5647_v37 = vmul.f32 -1.442695, %v3044_v27 }
0x12ef   :  { %v2939_v30 = vpop.f32.mrb[10].mxu1 }
0x12f0   :  { %v2940_v31 = vadd.f32 %v8035_v51, %v2939_v30  ;;  %v6261_v32 = vpop.f32.mrb[11].mxu1 }
0x12f2   :  { %7147 = vtanh.f32 %v2940_v31  ;;  %v5645_v39 = vmul.f32 -1.442695, %v2940_v31 }
0x12f3   :  { %7149 = vpow2.f32 %v5647_v37 }
0x12f4   :  { %7151 = vpow2.f32 %v5645_v39 }
0x12f8   :  { %v7146_v34 = vpop.eup %7145 }
0x12f9   :  { %3054 = vrot.lane.b32.xlu0 %v7146_v34, %s7531_s1 }
0x12fc   :  { %v7148_v36 = vpop.eup %7147 }
0x12fd   :  { %2952 = vrot.lane.b32.xlu1 %v7148_v36, %s7531_s1  ;;  %v7150_v29 = vpop.eup %7149 }
0x12fe   :  { %v3048_v40 = vadd.f32 1.0, %v7150_v29  ;;  %v7152_v63 = vpop.eup %7151 }
0x12ff   :  { %v2946_v41 = vadd.f32 1.0, %v7152_v63 }
0x1300   :  { %7153 = vrcp.f32 %v3048_v40 }
0x1301   :  { %7155 = vrcp.f32 %v2946_v41 }
0x130a   :  { %v7154_v43 = vpop.eup %7153 }
0x130b   :  { %v7156_v47 = vpop.eup %7155  ;;  %v3052_v52 = vmul.f32 %v7154_v43, %v8121_v50 }
0x130c   :  { %v2950_v54 = vmul.f32 %v7156_v47, %v8125_v10 }
0x136b   :  { %v3055_v44 = vpop.permute.xlu0 %3054 }
0x136c   :  { %v3057_v46 = vmul.f32 %v7154_v43, %v3055_v44 }
0x136e   :  { %3059 = vrot.lane.b32.xlu0 %v3057_v46, %s7521_s23 }
0x136f   :  { %v2953_v48 = vpop.permute.xlu1 %2952 }
0x1370   :  { %v2955_v49 = vmul.f32 %v7156_v47, %v2953_v48 }
0x1372   :  { %2957 = vrot.lane.b32.xlu1 %v2955_v49, %s7521_s23 }
0x13e0   :  { %v3060_v60 = vpop.permute.xlu0 %3059 }
0x13e1   :  { %v8158_v53 = vadd.f32 %v3060_v60, %v3052_v52 }
0x13e3   :  { %7157 = vtanh.f32 %v8158_v53 }
0x13e4   :  { %v2958_v55 = vpop.permute.xlu1 %2957 }
0x13e5   :  { %v8162_v56 = vadd.f32 %v2958_v55, %v2950_v54 }
0x13e7   :  { %7159 = vtanh.f32 %v8162_v56 }
0x13ed   :  { %v7158_v57 = vpop.eup %7157 }
0x13ee   :  { %3065 = vrot.lane.b32.xlu0 %v7158_v57, %s7531_s1 }
0x13f1   :  { %v7160_v58 = vpop.eup %7159 }
0x13f2   :  { %2963 = vrot.lane.b32.xlu1 %v7160_v58, %s7531_s1 }
0x1460   :  { %v3066_v62 = vpop.permute.xlu0 %3065 }
0x1461   :  { %v3068_v59 = vmul.f32 %v7154_v43, %v3066_v62 }
0x1463   :  { %3070 = vrot.lane.b32.xlu1 %v3068_v59, %s7521_s23 }
0x1464   :  { %v2964_v5 = vpop.permute.xlu1 %2963 }
0x1465   :  { %v2966_v50 = vmul.f32 %v7156_v47, %v2964_v5 }
0x1467   :  { %3074 = vrot.lane.b32.xlu0 %v2966_v50, %s7531_s1 }
0x14d5   :  { %v3071_v6 = vpop.permute.xlu1 %3070 }
0x14d6   :  { %6301 = vmatmul.mubr.msk.f32.vlgmr.msra.gmra.mrb[12].mxu1 %vm135_vm1, %v3071_v6 }
0x14d7   :  { %6784 = vmatpush3.bf16.msra.mxu1 %v7994_v33  ;;  %6319 = vmatprep.mubr.msk.f32.mxu1 %vm7528_vm4, %v7529_v12 }
0x14d8   :  { %6785 = vmatprep.subr.bf16.mxu1 %v7527_v8 }
0x14d9   :  { %v3075_v9 = vpop.permute.xlu0 %3074 }
0x14da   :  { %v3077_v10 = vsel %vm135_vm1, %v3071_v6, %v3075_v9 }
0x14db   :  { %6787 = vmatpush3.bf16.msra.mxu1 %v7997_v35  ;;  %6290 = vmatmul.mubr.msk.f32.vlgmr.msra.gmra.mrb[18].mxu0 %vm2242_vm6, %v3077_v10 }
0x14dc   :  { %6788 = vmatprep.subr.bf16.mxu1 %v7527_v8  ;;  %6796 = vmatpush3.bf16.msra.mxu0 %v7903_v7 }
0x14dd   :  { %6330 = vmatprep.mubr.msk.f32.mxu0 %vm7528_vm4, %v7529_v12  ;;  %6797 = vmatprep.subr.bf16.mxu0 %v7527_v8 }
0x14df   :  { %6790 = vmatpush3.bf16.msra.mxu1 %v8001_v38 }
0x14e0   :  { %6791 = vmatprep.subr.bf16.mxu1 %v7527_v8  ;;  %6799 = vmatpush3.bf16.msra.mxu0 %v7915_v11 }
0x14e1   :  { %6800 = vmatprep.subr.bf16.mxu0 %v7527_v8 }
0x14e3   :  { %6793 = vmatpush3.bf16.msra.mxu1 %v8006_v42 }
0x14e4   :  { %6812 = vmatprep.subr.bf16.mxu1 %v7527_v8 }
0x15a9   :  { %v3248_v14 = vpop.f32.mrb[12].mxu1 }
0x15aa   :  { %v3252_v15 = vadd.f32 %v3248_v14, %v7963_v0  ;;  %v6302_v19 = vpop.f32.mrb[13].mxu1 }
0x15ac   :  { %7161 = vtanh.f32 %v3252_v15  ;;  %v5651_v25 = vmul.f32 -1.442695, %v3252_v15 }
0x15ae   :  { %v3147_v20 = vpop.f32.mrb[18].mxu0 }
0x15af   :  { %v3148_v21 = vadd.f32 %v8035_v51, %v3147_v20  ;;  %v6291_v22 = vpop.f32.mrb[19].mxu0 }
0x15b1   :  { %7163 = vtanh.f32 %v3148_v21  ;;  %v5649_v26 = vmul.f32 -1.442695, %v3148_v21 }
0x15b2   :  { %7165 = vpow2.f32 %v5651_v25 }
0x15b3   :  { %7167 = vpow2.f32 %v5649_v26 }
0x15b6   :  { %v7162_v23 = vpop.eup %7161 }
0x15b7   :  { %3262 = vrot.lane.b32.xlu0 %v7162_v23, %s7531_s1 }
0x15bb   :  { %v7164_v24 = vpop.eup %7163 }
0x15bc   :  { %3160 = vrot.lane.b32.xlu1 %v7164_v24, %s7531_s1  ;;  %v7166_v27 = vpop.eup %7165 }
0x15bd   :  { %v3256_v28 = vadd.f32 1.0, %v7166_v27  ;;  %v7168_v0 = vpop.eup %7167 }
0x15be   :  { %v3154_v30 = vadd.f32 1.0, %v7168_v0 }
0x15bf   :  { %7169 = vrcp.f32 %v3256_v28 }
0x15c0   :  { %7171 = vrcp.f32 %v3154_v30 }
0x15c9   :  { %v7170_v31 = vpop.eup %7169 }
0x15ca   :  { %v7172_v36 = vpop.eup %7171  ;;  %v3260_v29 = vmul.f32 %v7170_v31, %v8158_v53 }
0x15cb   :  { %v3158_v41 = vmul.f32 %v7172_v36, %v8162_v56 }
0x1629   :  { %v3263_v32 = vpop.permute.xlu0 %3262 }
0x162a   :  { %v3265_v34 = vmul.f32 %v7170_v31, %v3263_v32 }
0x162c   :  { %3267 = vrot.lane.b32.xlu0 %v3265_v34, %s7521_s23 }
0x162e   :  { %v3161_v37 = vpop.permute.xlu1 %3160 }
0x162f   :  { %v3163_v39 = vmul.f32 %v7172_v36, %v3161_v37 }
0x1631   :  { %3165 = vrot.lane.b32.xlu1 %v3163_v39, %s7521_s23 }
0x169e   :  { %v3268_v40 = vpop.permute.xlu0 %3267 }
0x169f   :  { %v8195_v63 = vadd.f32 %v3268_v40, %v3260_v29 }
0x16a1   :  { %7173 = vtanh.f32 %v8195_v63 }
0x16a3   :  { %v3166_v43 = vpop.permute.xlu1 %3165 }
0x16a4   :  { %v8199_v44 = vadd.f32 %v3166_v43, %v3158_v41 }
0x16a6   :  { %7175 = vtanh.f32 %v8199_v44 }
0x16ab   :  { %v7174_v46 = vpop.eup %7173 }
0x16ac   :  { %3273 = vrot.lane.b32.xlu0 %v7174_v46, %s7531_s1 }
0x16b0   :  { %v7176_v47 = vpop.eup %7175 }
0x16b1   :  { %3171 = vrot.lane.b32.xlu1 %v7176_v47, %s7531_s1 }
0x171e   :  { %v3274_v48 = vpop.permute.xlu0 %3273 }
0x171f   :  { %v3276_v49 = vmul.f32 %v7170_v31, %v3274_v48 }
0x1721   :  { %3278 = vrot.lane.b32.xlu1 %v3276_v49, %s7521_s23 }
0x1723   :  { %v3172_v52 = vpop.permute.xlu1 %3171 }
0x1724   :  { %v3174_v60 = vmul.f32 %v7172_v36, %v3172_v52 }
0x1726   :  { %3282 = vrot.lane.b32.xlu0 %v3174_v60, %s7531_s1 }
0x1793   :  { %v3279_v53 = vpop.permute.xlu1 %3278 }
0x1794   :  { %6331 = vmatmul.mubr.msk.f32.vlgmr.msra.gmra.mrb[20].mxu0 %vm135_vm1, %v3279_v53 }
0x1795   :  { %6802 = vmatpush3.bf16.msra.mxu0 %v7994_v33  ;;  %6349 = vmatprep.mubr.msk.f32.mxu0 %vm7528_vm4, %v7529_v12 }
0x1796   :  { %6803 = vmatprep.subr.bf16.mxu0 %v7527_v8 }
0x1798   :  { %v3283_v54 = vpop.permute.xlu0 %3282 }
0x1799   :  { %6805 = vmatpush3.bf16.msra.mxu0 %v7997_v35  ;;  %v3285_v55 = vsel %vm135_vm1, %v3279_v53, %v3283_v54 }
0x179a   :  { %6806 = vmatprep.subr.bf16.mxu0 %v7527_v8  ;;  %6320 = vmatmul.mubr.msk.f32.vlgmr.msra.gmra.mrb[14].mxu1 %vm2242_vm6, %v3285_v55 }
0x179b   :  { %6814 = vmatpush3.bf16.msra.mxu1 %v7903_v7  ;;  %6360 = vmatprep.mubr.msk.f32.mxu1 %vm7528_vm4, %v7529_v12 }
0x179c   :  { %6815 = vmatprep.subr.bf16.mxu1 %v7527_v8 }
0x179d   :  { %6808 = vmatpush3.bf16.msra.mxu0 %v8001_v38 }
0x179e   :  { %6809 = vmatprep.subr.bf16.mxu0 %v7527_v8 }
0x179f   :  { %6817 = vmatpush3.bf16.msra.mxu1 %v7915_v11 }
0x17a0   :  { %6818 = vmatprep.subr.bf16.mxu1 %v7527_v8 }
0x17a1   :  { %6811 = vmatpush3.bf16.msra.mxu0 %v8006_v42 }
0x17a2   :  { %6830 = vmatprep.subr.bf16.mxu0 %v7527_v8 }
0x1867   :  { %v3456_v56 = vpop.f32.mrb[20].mxu0 }
0x1868   :  { %v3460_v57 = vadd.f32 %v3456_v56, %v7966_v1  ;;  %v6332_v58 = vpop.f32.mrb[21].mxu0 }
0x186a   :  { %7177 = vtanh.f32 %v3460_v57  ;;  %v5655_v9 = vmul.f32 -1.442695, %v3460_v57 }
0x186d   :  { %v3355_v62 = vpop.f32.mrb[14].mxu1 }
0x186e   :  { %v3356_v59 = vadd.f32 %v8035_v51, %v3355_v62  ;;  %v6321_v5 = vpop.f32.mrb[15].mxu1 }
0x1870   :  { %7179 = vtanh.f32 %v3356_v59  ;;  %v5653_v10 = vmul.f32 -1.442695, %v3356_v59 }
0x1871   :  { %7181 = vpow2.f32 %v5655_v9 }
0x1872   :  { %7183 = vpow2.f32 %v5653_v10 }
0x1874   :  { %v7178_v50 = vpop.eup %7177 }
0x1875   :  { %3470 = vrot.lane.b32.xlu0 %v7178_v50, %s7531_s1 }
0x187a   :  { %v7180_v6 = vpop.eup %7179 }
0x187b   :  { %3368 = vrot.lane.b32.xlu1 %v7180_v6, %s7531_s1  ;;  %v7182_v14 = vpop.eup %7181 }
0x187c   :  { %v3464_v15 = vadd.f32 1.0, %v7182_v14  ;;  %v7184_v1 = vpop.eup %7183 }
0x187d   :  { %v3362_v19 = vadd.f32 1.0, %v7184_v1 }
0x187e   :  { %7185 = vrcp.f32 %v3464_v15 }
0x187f   :  { %7187 = vrcp.f32 %v3362_v19 }
0x1888   :  { %v7186_v20 = vpop.eup %7185 }
0x1889   :  { %v7188_v23 = vpop.eup %7187  ;;  %v3468_v26 = vmul.f32 %v7186_v20, %v8195_v63 }
0x188a   :  { %v3366_v0 = vmul.f32 %v7188_v23, %v8199_v44 }
0x18e7   :  { %v3471_v21 = vpop.permute.xlu0 %3470 }
0x18e8   :  { %v3473_v22 = vmul.f32 %v7186_v20, %v3471_v21 }
0x18ea   :  { %3475 = vrot.lane.b32.xlu0 %v3473_v22, %s7521_s23 }
0x18ed   :  { %v3369_v24 = vpop.permute.xlu1 %3368 }
0x18ee   :  { %v3371_v25 = vmul.f32 %v7188_v23, %v3369_v24 }
0x18f0   :  { %3373 = vrot.lane.b32.xlu1 %v3371_v25, %s7521_s23 }
0x195c   :  { %v3476_v27 = vpop.permute.xlu0 %3475 }
0x195d   :  { %v8232_v28 = vadd.f32 %v3476_v27, %v3468_v26 }
0x195f   :  { %7189 = vtanh.f32 %v8232_v28 }
0x1962   :  { %v3374_v30 = vpop.permute.xlu1 %3373 }
0x1963   :  { %v8236_v31 = vadd.f32 %v3374_v30, %v3366_v0 }
0x1965   :  { %7191 = vtanh.f32 %v8236_v31 }
0x1969   :  { %v7190_v32 = vpop.eup %7189 }
0x196a   :  { %3481 = vrot.lane.b32.xlu0 %v7190_v32, %s7531_s1 }
0x196f   :  { %v7192_v34 = vpop.eup %7191 }
0x1970   :  { %3379 = vrot.lane.b32.xlu1 %v7192_v34, %s7531_s1 }
0x19dc   :  { %v3482_v36 = vpop.permute.xlu0 %3481 }
0x19dd   :  { %v3484_v37 = vmul.f32 %v7186_v20, %v3482_v36 }
0x19df   :  { %3486 = vrot.lane.b32.xlu1 %v3484_v37, %s7521_s23 }
0x19e2   :  { %v3380_v39 = vpop.permute.xlu1 %3379 }
0x19e3   :  { %v3382_v29 = vmul.f32 %v7188_v23, %v3380_v39 }
0x19e5   :  { %3490 = vrot.lane.b32.xlu0 %v3382_v29, %s7531_s1 }
0x1a51   :  { %v3487_v40 = vpop.permute.xlu1 %3486 }
0x1a52   :  { %6361 = vmatmul.mubr.msk.f32.vlgmr.msra.gmra.mrb[16].mxu1 %vm135_vm1, %v3487_v40 }
0x1a53   :  { %6820 = vmatpush3.bf16.msra.mxu1 %v7994_v33  ;;  %6379 = vmatprep.mubr.msk.f32.mxu1 %vm7528_vm4, %v7529_v12 }
0x1a54   :  { %6821 = vmatprep.subr.bf16.mxu1 %v7527_v8 }
0x1a57   :  { %6823 = vmatpush3.bf16.msra.mxu1 %v7997_v35  ;;  %v3491_v63 = vpop.permute.xlu0 %3490 }
0x1a58   :  { %6824 = vmatprep.subr.bf16.mxu1 %v7527_v8  ;;  %v3493_v41 = vsel %vm135_vm1, %v3487_v40, %v3491_v63 }
0x1a59   :  { %6350 = vmatmul.mubr.msk.f32.vlgmr.msra.gmra.mrb[22].mxu0 %vm2242_vm6, %v3493_v41 }
0x1a5a   :  { %6832 = vmatpush3.bf16.msra.mxu0 %v7903_v7  ;;  %6390 = vmatprep.mubr.msk.f32.mxu0 %vm7528_vm4, %v7529_v12 }
0x1a5b   :  { %6833 = vmatprep.subr.bf16.mxu0 %v7527_v8  ;;  %6826 = vmatpush3.bf16.msra.mxu1 %v8001_v38 }
0x1a5c   :  { %6827 = vmatprep.subr.bf16.mxu1 %v7527_v8 }
0x1a5e   :  { %6835 = vmatpush3.bf16.msra.mxu0 %v7915_v11 }
0x1a5f   :  { %6829 = vmatpush3.bf16.msra.mxu1 %v8006_v42  ;;  %6836 = vmatprep.subr.bf16.mxu0 %v7527_v8 }
0x1a60   :  { %6848 = vmatprep.subr.bf16.mxu1 %v7527_v8 }
0x1b25   :  { %v3664_v43 = vpop.f32.mrb[16].mxu1 }
0x1b26   :  { %v3668_v44 = vadd.f32 %v3664_v43, %v7969_v2  ;;  %v6362_v46 = vpop.f32.mrb[17].mxu1 }
0x1b28   :  { %7193 = vtanh.f32 %v3668_v44  ;;  %v5659_v53 = vmul.f32 -1.442695, %v3668_v44 }
0x1b2c   :  { %v3563_v47 = vpop.f32.mrb[22].mxu0 }
0x1b2d   :  { %v3564_v48 = vadd.f32 %v8035_v51, %v3563_v47  ;;  %v6351_v49 = vpop.f32.mrb[23].mxu0 }
0x1b2f   :  { %7195 = vtanh.f32 %v3564_v48  ;;  %v5657_v54 = vmul.f32 -1.442695, %v3564_v48 }
0x1b30   :  { %7197 = vpow2.f32 %v5659_v53 }
0x1b31   :  { %7199 = vpow2.f32 %v5657_v54 }
0x1b32   :  { %v7194_v52 = vpop.eup %7193 }
0x1b33   :  { %3678 = vrot.lane.b32.xlu0 %v7194_v52, %s7531_s1 }
0x1b39   :  { %v7196_v60 = vpop.eup %7195 }
0x1b3a   :  { %3576 = vrot.lane.b32.xlu1 %v7196_v60, %s7531_s1  ;;  %v7198_v55 = vpop.eup %7197 }
0x1b3b   :  { %v3672_v56 = vadd.f32 1.0, %v7198_v55  ;;  %v7200_v2 = vpop.eup %7199 }
0x1b3c   :  { %v3570_v57 = vadd.f32 1.0, %v7200_v2 }
0x1b3d   :  { %7201 = vrcp.f32 %v3672_v56 }
0x1b3e   :  { %7203 = vrcp.f32 %v3570_v57 }
0x1b47   :  { %v7202_v58 = vpop.eup %7201 }
0x1b48   :  { %v7204_v5 = vpop.eup %7203  ;;  %v3676_v9 = vmul.f32 %v7202_v58, %v8232_v28 }
0x1b49   :  { %v3574_v15 = vmul.f32 %v7204_v5, %v8236_v31 }
0x1ba5   :  { %v3679_v62 = vpop.permute.xlu0 %3678 }
0x1ba6   :  { %v3681_v59 = vmul.f32 %v7202_v58, %v3679_v62 }
0x1ba8   :  { %3683 = vrot.lane.b32.xlu0 %v3681_v59, %s7521_s23 }
0x1bac   :  { %v3577_v50 = vpop.permute.xlu1 %3576 }
0x1bad   :  { %v3579_v6 = vmul.f32 %v7204_v5, %v3577_v50 }
0x1baf   :  { %3581 = vrot.lane.b32.xlu1 %v3579_v6, %s7521_s23 }
0x1c1a   :  { %v3684_v10 = vpop.permute.xlu0 %3683 }
0x1c1b   :  { %v8269_v14 = vadd.f32 %v3684_v10, %v3676_v9 }
0x1c1d   :  { %7205 = vtanh.f32 %v8269_v14 }
0x1c21   :  { %v3582_v1 = vpop.permute.xlu1 %3581 }
0x1c22   :  { %v8273_v19 = vadd.f32 %v3582_v1, %v3574_v15 }
0x1c24   :  { %7207 = vtanh.f32 %v8273_v19 }
0x1c27   :  { %v7206_v20 = vpop.eup %7205 }
0x1c28   :  { %3689 = vrot.lane.b32.xlu0 %v7206_v20, %s7531_s1 }
0x1c2e   :  { %v7208_v21 = vpop.eup %7207 }
0x1c2f   :  { %3587 = vrot.lane.b32.xlu1 %v7208_v21, %s7531_s1 }
0x1c9a   :  { %v3690_v22 = vpop.permute.xlu0 %3689 }
0x1c9b   :  { %v3692_v23 = vmul.f32 %v7202_v58, %v3690_v22 }
0x1c9d   :  { %3694 = vrot.lane.b32.xlu1 %v3692_v23, %s7521_s23 }
0x1ca1   :  { %v3588_v24 = vpop.permute.xlu1 %3587 }
0x1ca2   :  { %v3590_v25 = vmul.f32 %v7204_v5, %v3588_v24 }
0x1ca4   :  { %3698 = vrot.lane.b32.xlu0 %v3590_v25, %s7531_s1 }
0x1d0f   :  { %v3695_v26 = vpop.permute.xlu1 %3694 }
0x1d10   :  { %6391 = vmatmul.mubr.msk.f32.vlgmr.msra.gmra.mrb[24].mxu0 %vm135_vm1, %v3695_v26 }
0x1d11   :  { %6838 = vmatpush3.bf16.msra.mxu0 %v7994_v33  ;;  %6409 = vmatprep.mubr.msk.f32.mxu0 %vm7528_vm4, %v7529_v12 }
0x1d12   :  { %6839 = vmatprep.subr.bf16.mxu0 %v7527_v8 }
0x1d15   :  { %6841 = vmatpush3.bf16.msra.mxu0 %v7997_v35 }
0x1d16   :  { %6842 = vmatprep.subr.bf16.mxu0 %v7527_v8  ;;  %v3699_v27 = vpop.permute.xlu0 %3698 }
0x1d17   :  { %v3701_v28 = vsel %vm135_vm1, %v3695_v26, %v3699_v27 }
0x1d18   :  { %6380 = vmatmul.mubr.msk.f32.vlgmr.msra.gmra.mrb[18].mxu1 %vm2242_vm6, %v3701_v28 }
0x1d19   :  { %6844 = vmatpush3.bf16.msra.mxu0 %v8001_v38  ;;  %6850 = vmatpush3.bf16.msra.mxu1 %v7903_v7 }
0x1d1a   :  { %6420 = vmatprep.mubr.msk.f32.mxu1 %vm7528_vm4, %v7529_v12  ;;  %6851 = vmatprep.subr.bf16.mxu1 %v7527_v8 }
0x1d1b   :  { %6845 = vmatprep.subr.bf16.mxu0 %v7527_v8 }
0x1d1d   :  { %6847 = vmatpush3.bf16.msra.mxu0 %v8006_v42  ;;  %6853 = vmatpush3.bf16.msra.mxu1 %v7915_v11 }
0x1d1e   :  { %6866 = vmatprep.subr.bf16.mxu0 %v7527_v8  ;;  %6854 = vmatprep.subr.bf16.mxu1 %v7527_v8 }
0x1de3   :  { %v3871_v0 = vpop.f32.mrb[24].mxu0 }
0x1de4   :  { %v3875_v30 = vadd.f32 %v3871_v0, %v7957_v61  ;;  %v6392_v31 = vpop.f32.mrb[25].mxu0 }
0x1de6   :  { %7209 = vtanh.f32 %v3875_v30  ;;  %v5663_v29 = vmul.f32 -1.442695, %v3875_v30 }
0x1deb   :  { %v3771_v32 = vpop.f32.mrb[18].mxu1 }
0x1dec   :  { %v3772_v34 = vadd.f32 %v8035_v51, %v3771_v32  ;;  %v6381_v36 = vpop.f32.mrb[19].mxu1 }
0x1dee   :  { %7211 = vtanh.f32 %v3772_v34  ;;  %v5661_v40 = vmul.f32 -1.442695, %v3772_v34 }
0x1def   :  { %7213 = vpow2.f32 %v5663_v29 }
0x1df0   :  { %v7210_v37 = vpop.eup %7209  ;;  %7215 = vpow2.f32 %v5661_v40 }
0x1df1   :  { %3885 = vrot.lane.b32.xlu0 %v7210_v37, %s7531_s1 }
0x1df8   :  { %v7212_v39 = vpop.eup %7211 }
0x1df9   :  { %3784 = vrot.lane.b32.xlu1 %v7212_v39, %s7531_s1  ;;  %v7214_v63 = vpop.eup %7213 }
0x1dfa   :  { %v3879_v41 = vadd.f32 1.0, %v7214_v63  ;;  %v7216_v61 = vpop.eup %7215 }
0x1dfb   :  { %v3778_v43 = vadd.f32 1.0, %v7216_v61 }
0x1dfc   :  { %7217 = vrcp.f32 %v3879_v41 }
0x1dfd   :  { %7219 = vrcp.f32 %v3778_v43 }
0x1e06   :  { %v7218_v44 = vpop.eup %7217 }
0x1e07   :  { %v7220_v47 = vpop.eup %7219  ;;  %v3883_v52 = vmul.f32 %v7218_v44, %v8269_v14 }
0x1e08   :  { %v3782_v54 = vmul.f32 %v7220_v47, %v8273_v19  ;;  %v8337_v19 = vld [vmem:[#allocation9] ss:$0 sm:$0xff] }
0x1e63   :  { %v3886_v51 = vpop.permute.xlu0 %3885 }
0x1e64   :  { %v3888_v46 = vmul.f32 %v7218_v44, %v3886_v51 }
0x1e66   :  { %3890 = vrot.lane.b32.xlu0 %v3888_v46, %s7521_s23 }
0x1e6b   :  { %v3785_v48 = vpop.permute.xlu1 %3784 }
0x1e6c   :  { %v3787_v49 = vmul.f32 %v7220_v47, %v3785_v48 }
0x1e6e   :  { %3789 = vrot.lane.b32.xlu1 %v3787_v49, %s7521_s23 }
0x1ed8   :  { %v3891_v60 = vpop.permute.xlu0 %3890 }
0x1ed9   :  { %v8306_v53 = vadd.f32 %v3891_v60, %v3883_v52 }
0x1edb   :  { %7221 = vtanh.f32 %v8306_v53 }
0x1ee0   :  { %v3790_v55 = vpop.permute.xlu1 %3789 }
0x1ee1   :  { %v8310_v56 = vadd.f32 %v3790_v55, %v3782_v54 }
0x1ee3   :  { %7223 = vtanh.f32 %v8310_v56 }
0x1ee5   :  { %v7222_v2 = vpop.eup %7221 }
0x1ee6   :  { %3896 = vrot.lane.b32.xlu0 %v7222_v2, %s7531_s1 }
0x1eed   :  { %v7224_v57 = vpop.eup %7223 }
0x1eee   :  { %3795 = vrot.lane.b32.xlu1 %v7224_v57, %s7531_s1 }
0x1f58   :  { %v3897_v58 = vpop.permute.xlu0 %3896 }
0x1f59   :  { %v3899_v62 = vmul.f32 %v7218_v44, %v3897_v58 }
0x1f5b   :  { %3901 = vrot.lane.b32.xlu1 %v3899_v62, %s7521_s23 }
0x1f60   :  { %v3796_v59 = vpop.permute.xlu1 %3795 }
0x1f61   :  { %v3798_v5 = vmul.f32 %v7220_v47, %v3796_v59 }
0x1f63   :  { %3905 = vrot.lane.b32.xlu0 %v3798_v5, %s7531_s1 }
0x1fcd   :  { %v3902_v50 = vpop.permute.xlu1 %3901 }
0x1fce   :  { %6421 = vmatmul.mubr.msk.f32.vlgmr.msra.gmra.mrb[20].mxu1 %vm135_vm1, %v3902_v50 }
0x1fcf   :  { %6856 = vmatpush3.bf16.msra.mxu1 %v7994_v33  ;;  %6439 = vmatprep.mubr.msk.f32.mxu1 %vm7528_vm4, %v7529_v12 }
0x1fd0   :  { %6857 = vmatprep.subr.bf16.mxu1 %v7527_v8 }
0x1fd3   :  { %6859 = vmatpush3.bf16.msra.mxu1 %v7997_v35 }
0x1fd4   :  { %6860 = vmatprep.subr.bf16.mxu1 %v7527_v8 }
0x1fd5   :  { %v3906_v6 = vpop.permute.xlu0 %3905 }
0x1fd6   :  { %v3908_v9 = vsel %vm135_vm1, %v3902_v50, %v3906_v6 }
0x1fd7   :  { %6862 = vmatpush3.bf16.msra.mxu1 %v8001_v38  ;;  %6410 = vmatmul.mubr.msk.f32.vlgmr.msra.gmra.mrb[26].mxu0 %vm2242_vm6, %v3908_v9 }
0x1fd8   :  { %6863 = vmatprep.subr.bf16.mxu1 %v7527_v8  ;;  %6868 = vmatpush3.bf16.msra.mxu0 %v7903_v7 }
0x1fd9   :  { %6450 = vmatprep.mubr.msk.f32.mxu0 %vm7528_vm4, %v7529_v12  ;;  %6869 = vmatprep.subr.bf16.mxu0 %v7527_v8 }
0x1fdb   :  { %6865 = vmatpush3.bf16.msra.mxu1 %v8006_v42 }
0x1fdc   :  { %6884 = vmatprep.subr.bf16.mxu1 %v7527_v8  ;;  %6871 = vmatpush3.bf16.msra.mxu0 %v7915_v11 }
0x1fdd   :  { %6872 = vmatprep.subr.bf16.mxu0 %v7527_v8 }
0x20a1   :  { %v4078_v10 = vpop.f32.mrb[20].mxu1 }
0x20a2   :  { %v4082_v14 = vadd.f32 %v4078_v10, %v7944_v45  ;;  %v6422_v15 = vpop.f32.mrb[21].mxu1 }
0x20a4   :  { %7225 = vtanh.f32 %v4082_v14  ;;  %v5667_v24 = vmul.f32 -1.442695, %v4082_v14 }
0x20aa   :  { %v3978_v1 = vpop.f32.mrb[26].mxu0 }
0x20ab   :  { %v3979_v20 = vadd.f32 %v8337_v19, %v3978_v1  ;;  %v6411_v21 = vpop.f32.mrb[27].mxu0 }
0x20ad   :  { %7227 = vtanh.f32 %v3979_v20  ;;  %v5665_v25 = vmul.f32 -1.442695, %v3979_v20 }
0x20ae   :  { %v7226_v22 = vpop.eup %7225  ;;  %7229 = vpow2.f32 %v5667_v24 }
0x20af   :  { %4092 = vrot.lane.b32.xlu0 %v7226_v22, %s7531_s1  ;;  %7231 = vpow2.f32 %v5665_v25 }
0x20b7   :  { %v7228_v23 = vpop.eup %7227 }
0x20b8   :  { %3991 = vrot.lane.b32.xlu1 %v7228_v23, %s7531_s1  ;;  %v7230_v26 = vpop.eup %7229 }
0x20b9   :  { %v4086_v45 = vadd.f32 1.0, %v7230_v26  ;;  %v7232_v27 = vpop.eup %7231 }
0x20ba   :  { %v3985_v28 = vadd.f32 1.0, %v7232_v27 }
0x20bb   :  { %7233 = vrcp.f32 %v4086_v45 }
0x20bc   :  { %7235 = vrcp.f32 %v3985_v28 }
0x20c5   :  { %v7234_v0 = vpop.eup %7233 }
0x20c6   :  { %v7236_v32 = vpop.eup %7235  ;;  %v4090_v37 = vmul.f32 %v7234_v0, %v8306_v53 }
0x20c7   :  { %v3989_v40 = vmul.f32 %v7236_v32, %v8310_v56 }
0x2121   :  { %v4093_v30 = vpop.permute.xlu0 %4092 }
0x2122   :  { %v4095_v31 = vmul.f32 %v7234_v0, %v4093_v30 }
0x2124   :  { %4097 = vrot.lane.b32.xlu0 %v4095_v31, %s7521_s23 }
0x212a   :  { %v3992_v34 = vpop.permute.xlu1 %3991 }
0x212b   :  { %v3994_v36 = vmul.f32 %v7236_v32, %v3992_v34 }
0x212d   :  { %3996 = vrot.lane.b32.xlu1 %v3994_v36, %s7521_s23 }
0x2196   :  { %v4098_v39 = vpop.permute.xlu0 %4097 }
0x2197   :  { %v8345_v29 = vadd.f32 %v4098_v39, %v4090_v37 }
0x2199   :  { %7237 = vtanh.f32 %v8345_v29 }
0x219f   :  { %v3997_v63 = vpop.permute.xlu1 %3996 }
0x21a0   :  { %v8349_v41 = vadd.f32 %v3997_v63, %v3989_v40 }
0x21a2   :  { %7239 = vtanh.f32 %v8349_v41 }
0x21a3   :  { %v7238_v61 = vpop.eup %7237 }
0x21a4   :  { %4103 = vrot.lane.b32.xlu0 %v7238_v61, %s7531_s1 }
0x21ac   :  { %v7240_v43 = vpop.eup %7239 }
0x21ad   :  { %4002 = vrot.lane.b32.xlu1 %v7240_v43, %s7531_s1 }
0x2216   :  { %v4104_v44 = vpop.permute.xlu0 %4103 }
0x2217   :  { %v4106_v51 = vmul.f32 %v7234_v0, %v4104_v44 }
0x2219   :  { %4108 = vrot.lane.b32.xlu1 %v4106_v51, %s7521_s23 }
0x221f   :  { %v4003_v46 = vpop.permute.xlu1 %4002 }
0x2220   :  { %v4005_v47 = vmul.f32 %v7236_v32, %v4003_v46 }
0x2222   :  { %4112 = vrot.lane.b32.xlu0 %v4005_v47, %s7531_s1 }
0x228b   :  { %v4109_v48 = vpop.permute.xlu1 %4108 }
0x228c   :  { %6451 = vmatmul.mubr.msk.f32.vlgmr.msra.gmra.mrb[28].mxu0 %vm135_vm1, %v4109_v48 }
0x228d   :  { %6874 = vmatpush3.bf16.msra.mxu0 %v7994_v33  ;;  %6469 = vmatprep.mubr.msk.f32.mxu0 %vm7528_vm4, %v7529_v12 }
0x228e   :  { %6875 = vmatprep.subr.bf16.mxu0 %v7527_v8 }
0x2291   :  { %6877 = vmatpush3.bf16.msra.mxu0 %v7997_v35 }
0x2292   :  { %6878 = vmatprep.subr.bf16.mxu0 %v7527_v8 }
0x2294   :  { %v4113_v49 = vpop.permute.xlu0 %4112 }
0x2295   :  { %6880 = vmatpush3.bf16.msra.mxu0 %v8001_v38  ;;  %v4115_v52 = vsel %vm135_vm1, %v4109_v48, %v4113_v49 }
0x2296   :  { %6881 = vmatprep.subr.bf16.mxu0 %v7527_v8  ;;  %6440 = vmatmul.mubr.msk.f32.vlgmr.msra.gmra.mrb[22].mxu1 %vm2242_vm6, %v4115_v52 }
0x2297   :  { %6886 = vmatpush3.bf16.msra.mxu1 %v7903_v7  ;;  %6480 = vmatprep.mubr.msk.f32.mxu1 %vm7528_vm4, %v7529_v12 }
0x2298   :  { %6887 = vmatprep.subr.bf16.mxu1 %v7527_v8 }
0x2299   :  { %6883 = vmatpush3.bf16.msra.mxu0 %v8006_v42 }
0x229a   :  { %6902 = vmatprep.subr.bf16.mxu0 %v7527_v8 }
0x229b   :  { %6889 = vmatpush3.bf16.msra.mxu1 %v7915_v11 }
0x229c   :  { %6890 = vmatprep.subr.bf16.mxu1 %v7527_v8 }
0x235f   :  { %v4286_v60 = vpop.f32.mrb[28].mxu0 }
0x2360   :  { %v4290_v53 = vadd.f32 %v4286_v60, %v7972_v3  ;;  %v6452_v54 = vpop.f32.mrb[29].mxu0 }
0x2362   :  { %7241 = vtanh.f32 %v4290_v53  ;;  %v5671_v62 = vmul.f32 -1.442695, %v4290_v53 }
0x2369   :  { %v4185_v55 = vpop.f32.mrb[22].mxu1 }
0x236a   :  { %v4186_v56 = vadd.f32 %v8337_v19, %v4185_v55  ;;  %v6441_v2 = vpop.f32.mrb[23].mxu1 }
0x236c   :  { %v7242_v57 = vpop.eup %7241  ;;  %7243 = vtanh.f32 %v4186_v56  ;;  %v5669_v59 = vmul.f32 -1.442695, %v4186_v56 }
0x236d   :  { %4300 = vrot.lane.b32.xlu0 %v7242_v57, %s7531_s1  ;;  %7245 = vpow2.f32 %v5671_v62 }
0x236e   :  { %7247 = vpow2.f32 %v5669_v59 }
0x2376   :  { %v7244_v58 = vpop.eup %7243 }
0x2377   :  { %4198 = vrot.lane.b32.xlu1 %v7244_v58, %s7531_s1  ;;  %v7246_v5 = vpop.eup %7245 }
0x2378   :  { %v4294_v50 = vadd.f32 1.0, %v7246_v5  ;;  %v7248_v3 = vpop.eup %7247 }
0x2379   :  { %v4192_v6 = vadd.f32 1.0, %v7248_v3 }
0x237a   :  { %7249 = vrcp.f32 %v4294_v50 }
0x237b   :  { %7251 = vrcp.f32 %v4192_v6 }
0x2384   :  { %v7250_v9 = vpop.eup %7249 }
0x2385   :  { %v7252_v15 = vpop.eup %7251  ;;  %v4298_v21 = vmul.f32 %v7250_v9, %v8345_v29 }
0x2386   :  { %v4196_v24 = vmul.f32 %v7252_v15, %v8349_v41 }
0x23df   :  { %v4301_v10 = vpop.permute.xlu0 %4300 }
0x23e0   :  { %v4303_v14 = vmul.f32 %v7250_v9, %v4301_v10 }
0x23e2   :  { %4305 = vrot.lane.b32.xlu0 %v4303_v14, %s7521_s23 }
0x23e9   :  { %v4199_v1 = vpop.permute.xlu1 %4198 }
0x23ea   :  { %v4201_v20 = vmul.f32 %v7252_v15, %v4199_v1 }
0x23ec   :  { %4203 = vrot.lane.b32.xlu1 %v4201_v20, %s7521_s23 }
0x2454   :  { %v4306_v22 = vpop.permute.xlu0 %4305 }
0x2455   :  { %v8382_v23 = vadd.f32 %v4306_v22, %v4298_v21 }
0x2457   :  { %7253 = vtanh.f32 %v8382_v23 }
0x245e   :  { %v4204_v25 = vpop.permute.xlu1 %4203 }
0x245f   :  { %v8386_v26 = vadd.f32 %v4204_v25, %v4196_v24 }
0x2461   :  { %v7254_v45 = vpop.eup %7253  ;;  %7255 = vtanh.f32 %v8386_v26 }
0x2462   :  { %4311 = vrot.lane.b32.xlu0 %v7254_v45, %s7531_s1 }
0x246b   :  { %v7256_v27 = vpop.eup %7255 }
0x246c   :  { %4209 = vrot.lane.b32.xlu1 %v7256_v27, %s7531_s1 }
0x24d4   :  { %v4312_v28 = vpop.permute.xlu0 %4311 }
0x24d5   :  { %v4314_v0 = vmul.f32 %v7250_v9, %v4312_v28 }
0x24d7   :  { %4316 = vrot.lane.b32.xlu1 %v4314_v0, %s7521_s23 }
0x24de   :  { %v4210_v30 = vpop.permute.xlu1 %4209 }
0x24df   :  { %v4212_v31 = vmul.f32 %v7252_v15, %v4210_v30 }
0x24e1   :  { %4320 = vrot.lane.b32.xlu0 %v4212_v31, %s7531_s1 }
0x2549   :  { %v4317_v32 = vpop.permute.xlu1 %4316 }
0x254a   :  { %6481 = vmatmul.mubr.msk.f32.vlgmr.msra.gmra.mrb[24].mxu1 %vm135_vm1, %v4317_v32 }
0x254b   :  { %6892 = vmatpush3.bf16.msra.mxu1 %v7994_v33  ;;  %6499 = vmatprep.mubr.msk.f32.mxu1 %vm7528_vm4, %v7529_v12 }
0x254c   :  { %6893 = vmatprep.subr.bf16.mxu1 %v7527_v8 }
0x254f   :  { %6895 = vmatpush3.bf16.msra.mxu1 %v7997_v35 }
0x2550   :  { %6896 = vmatprep.subr.bf16.mxu1 %v7527_v8 }
0x2553   :  { %6898 = vmatpush3.bf16.msra.mxu1 %v8001_v38  ;;  %v4321_v34 = vpop.permute.xlu0 %4320 }
0x2554   :  { %6899 = vmatprep.subr.bf16.mxu1 %v7527_v8  ;;  %v4323_v36 = vsel %vm135_vm1, %v4317_v32, %v4321_v34 }
0x2555   :  { %6470 = vmatmul.mubr.msk.f32.vlgmr.msra.gmra.mrb[30].mxu0 %vm2242_vm6, %v4323_v36 }
0x2556   :  { %6904 = vmatpush3.bf16.msra.mxu0 %v7903_v7  ;;  %6510 = vmatprep.mubr.msk.f32.mxu0 %vm7528_vm4, %v7529_v12 }
0x2557   :  { %6905 = vmatprep.subr.bf16.mxu0 %v7527_v8  ;;  %6901 = vmatpush3.bf16.msra.mxu1 %v8006_v42 }
0x2558   :  { %6920 = vmatprep.subr.bf16.mxu1 %v7527_v8 }
0x255a   :  { %6907 = vmatpush3.bf16.msra.mxu0 %v7915_v11 }
0x255b   :  { %6908 = vmatprep.subr.bf16.mxu0 %v7527_v8 }
0x261d   :  { %v4494_v37 = vpop.f32.mrb[24].mxu1 }
0x261e   :  { %v4498_v39 = vadd.f32 %v4494_v37, %v7975_v4  ;;  %v6482_v29 = vpop.f32.mrb[25].mxu1 }
0x2620   :  { %7257 = vtanh.f32 %v4498_v39  ;;  %v5675_v44 = vmul.f32 -1.442695, %v4498_v39 }
0x2628   :  { %v4393_v40 = vpop.f32.mrb[30].mxu0 }
0x2629   :  { %v4394_v41 = vadd.f32 %v8337_v19, %v4393_v40  ;;  %v6471_v61 = vpop.f32.mrb[31].mxu0 }
0x262a   :  { %v7258_v63 = vpop.eup %7257 }
0x262b   :  { %4508 = vrot.lane.b32.xlu0 %v7258_v63, %s7531_s1  ;;  %7259 = vtanh.f32 %v4394_v41  ;;  %v5673_v51 = vmul.f32 -1.442695, %v4394_v41 }
0x262c   :  { %7261 = vpow2.f32 %v5675_v44 }
0x262d   :  { %7263 = vpow2.f32 %v5673_v51 }
0x2635   :  { %v7260_v43 = vpop.eup %7259 }
0x2636   :  { %4406 = vrot.lane.b32.xlu1 %v7260_v43, %s7531_s1  ;;  %v7262_v46 = vpop.eup %7261 }
0x2637   :  { %v4502_v47 = vadd.f32 1.0, %v7262_v46  ;;  %v7264_v4 = vpop.eup %7263 }
0x2638   :  { %v4400_v48 = vadd.f32 1.0, %v7264_v4 }
0x2639   :  { %7265 = vrcp.f32 %v4502_v47 }
0x263a   :  { %7267 = vrcp.f32 %v4400_v48 }
0x2643   :  { %v7266_v49 = vpop.eup %7265 }
0x2644   :  { %v7268_v53 = vpop.eup %7267  ;;  %v4506_v56 = vmul.f32 %v7266_v49, %v8382_v23 }
0x2645   :  { %v4404_v58 = vmul.f32 %v7268_v53, %v8386_v26 }
0x269d   :  { %v4509_v52 = vpop.permute.xlu0 %4508 }
0x269e   :  { %v4511_v60 = vmul.f32 %v7266_v49, %v4509_v52 }
0x26a0   :  { %4513 = vrot.lane.b32.xlu0 %v4511_v60, %s7521_s23 }
0x26a8   :  { %v4407_v54 = vpop.permute.xlu1 %4406 }
0x26a9   :  { %v4409_v55 = vmul.f32 %v7268_v53, %v4407_v54 }
0x26ab   :  { %4411 = vrot.lane.b32.xlu1 %v4409_v55, %s7521_s23 }
0x2712   :  { %v4514_v2 = vpop.permute.xlu0 %4513 }
0x2713   :  { %v8419_v57 = vadd.f32 %v4514_v2, %v4506_v56 }
0x2715   :  { %7269 = vtanh.f32 %v8419_v57 }
0x271d   :  { %v4412_v62 = vpop.permute.xlu1 %4411 }
0x271e   :  { %v8423_v5 = vadd.f32 %v4412_v62, %v4404_v58 }
0x271f   :  { %v7270_v59 = vpop.eup %7269 }
0x2720   :  { %4519 = vrot.lane.b32.xlu0 %v7270_v59, %s7531_s1  ;;  %7271 = vtanh.f32 %v8423_v5 }
0x272a   :  { %v7272_v50 = vpop.eup %7271 }
0x272b   :  { %4417 = vrot.lane.b32.xlu1 %v7272_v50, %s7531_s1 }
0x2792   :  { %v4520_v3 = vpop.permute.xlu0 %4519 }
0x2793   :  { %v4522_v6 = vmul.f32 %v7266_v49, %v4520_v3 }
0x2795   :  { %4524 = vrot.lane.b32.xlu1 %v4522_v6, %s7521_s23 }
0x279d   :  { %v4418_v9 = vpop.permute.xlu1 %4417 }
0x279e   :  { %v4420_v10 = vmul.f32 %v7268_v53, %v4418_v9 }
0x27a0   :  { %4528 = vrot.lane.b32.xlu0 %v4420_v10, %s7531_s1 }
0x2807   :  { %v4525_v14 = vpop.permute.xlu1 %4524 }
0x2808   :  { %6511 = vmatmul.mubr.msk.f32.vlgmr.msra.gmra.mrb[32].mxu0 %vm135_vm1, %v4525_v14 }
0x2809   :  { %6910 = vmatpush3.bf16.msra.mxu0 %v7994_v33  ;;  %6529 = vmatprep.mubr.msk.f32.mxu0 %vm7528_vm4, %v7529_v12 }
0x280a   :  { %6911 = vmatprep.subr.bf16.mxu0 %v7527_v8 }
0x280d   :  { %6913 = vmatpush3.bf16.msra.mxu0 %v7997_v35 }
0x280e   :  { %6914 = vmatprep.subr.bf16.mxu0 %v7527_v8 }
0x2811   :  { %6916 = vmatpush3.bf16.msra.mxu0 %v8001_v38 }
0x2812   :  { %6917 = vmatprep.subr.bf16.mxu0 %v7527_v8  ;;  %v4529_v15 = vpop.permute.xlu0 %4528 }
0x2813   :  { %v4531_v1 = vsel %vm135_vm1, %v4525_v14, %v4529_v15 }
0x2814   :  { %6500 = vmatmul.mubr.msk.f32.vlgmr.msra.gmra.mrb[26].mxu1 %vm2242_vm6, %v4531_v1 }
0x2815   :  { %6919 = vmatpush3.bf16.msra.mxu0 %v8006_v42  ;;  %6922 = vmatpush3.bf16.msra.mxu1 %v7903_v7 }
0x2816   :  { %6540 = vmatprep.mubr.msk.f32.mxu1 %vm7528_vm4, %v7529_v12  ;;  %6923 = vmatprep.subr.bf16.mxu1 %v7527_v8 }
0x2817   :  { %6938 = vmatprep.subr.bf16.mxu0 %v7527_v8 }
0x2819   :  { %6925 = vmatpush3.bf16.msra.mxu1 %v7915_v11 }
0x281a   :  { %6926 = vmatprep.subr.bf16.mxu1 %v7527_v8 }
0x28db   :  { %v4702_v20 = vpop.f32.mrb[32].mxu0 }
0x28dc   :  { %v4706_v21 = vadd.f32 %v4702_v20, %v7978_v13  ;;  %v6512_v22 = vpop.f32.mrb[33].mxu0 }
0x28de   :  { %7273 = vtanh.f32 %v4706_v21  ;;  %v5679_v27 = vmul.f32 -1.442695, %v4706_v21 }
0x28e7   :  { %v4601_v24 = vpop.f32.mrb[26].mxu1 }
0x28e8   :  { %v7274_v23 = vpop.eup %7273  ;;  %v4602_v25 = vadd.f32 %v8337_v19, %v4601_v24  ;;  %v6501_v26 = vpop.f32.mrb[27].mxu1 }
0x28e9   :  { %4716 = vrot.lane.b32.xlu0 %v7274_v23, %s7531_s1 }
0x28ea   :  { %7275 = vtanh.f32 %v4602_v25  ;;  %v5677_v28 = vmul.f32 -1.442695, %v4602_v25 }
0x28eb   :  { %7277 = vpow2.f32 %v5679_v27 }
0x28ec   :  { %7279 = vpow2.f32 %v5677_v28 }
0x28f4   :  { %v7276_v45 = vpop.eup %7275 }
0x28f5   :  { %4614 = vrot.lane.b32.xlu1 %v7276_v45, %s7531_s1  ;;  %v7278_v0 = vpop.eup %7277 }
0x28f6   :  { %v4710_v30 = vadd.f32 1.0, %v7278_v0  ;;  %v7280_v13 = vpop.eup %7279 }
0x28f7   :  { %v4608_v31 = vadd.f32 1.0, %v7280_v13 }
0x28f8   :  { %7281 = vrcp.f32 %v4710_v30 }
0x28f9   :  { %7283 = vrcp.f32 %v4608_v31 }
0x2902   :  { %v7282_v32 = vpop.eup %7281 }
0x2903   :  { %v7284_v37 = vpop.eup %7283  ;;  %v4714_v40 = vmul.f32 %v7282_v32, %v8419_v57 }
0x2904   :  { %v4612_v61 = vmul.f32 %v7284_v37, %v8423_v5 }
0x295b   :  { %v4717_v34 = vpop.permute.xlu0 %4716 }
0x295c   :  { %v4719_v36 = vmul.f32 %v7282_v32, %v4717_v34 }
0x295e   :  { %4721 = vrot.lane.b32.xlu0 %v4719_v36, %s7521_s23 }
0x2967   :  { %v4615_v39 = vpop.permute.xlu1 %4614 }
0x2968   :  { %v4617_v29 = vmul.f32 %v7284_v37, %v4615_v39 }
0x296a   :  { %4619 = vrot.lane.b32.xlu1 %v4617_v29, %s7521_s23 }
0x29d0   :  { %v4722_v63 = vpop.permute.xlu0 %4721 }
0x29d1   :  { %v8456_v41 = vadd.f32 %v4722_v63, %v4714_v40 }
0x29d3   :  { %7285 = vtanh.f32 %v8456_v41 }
0x29dc   :  { %v4620_v44 = vpop.permute.xlu1 %4619 }
0x29dd   :  { %v7286_v43 = vpop.eup %7285  ;;  %v8460_v51 = vadd.f32 %v4620_v44, %v4612_v61 }
0x29de   :  { %4727 = vrot.lane.b32.xlu0 %v7286_v43, %s7531_s1 }
0x29df   :  { %7287 = vtanh.f32 %v8460_v51 }
0x29e9   :  { %v7288_v46 = vpop.eup %7287 }
0x29ea   :  { %4625 = vrot.lane.b32.xlu1 %v7288_v46, %s7531_s1 }
0x2a50   :  { %v4728_v47 = vpop.permute.xlu0 %4727 }
0x2a51   :  { %v4730_v4 = vmul.f32 %v7282_v32, %v4728_v47 }
0x2a53   :  { %4732 = vrot.lane.b32.xlu1 %v4730_v4, %s7521_s23 }
0x2a5c   :  { %v4626_v48 = vpop.permute.xlu1 %4625 }
0x2a5d   :  { %v4628_v49 = vmul.f32 %v7284_v37, %v4626_v48 }
0x2a5f   :  { %4736 = vrot.lane.b32.xlu0 %v4628_v49, %s7531_s1 }
0x2ac5   :  { %v4733_v52 = vpop.permute.xlu1 %4732 }
0x2ac6   :  { %6541 = vmatmul.mubr.msk.f32.vlgmr.msra.gmra.mrb[28].mxu1 %vm135_vm1, %v4733_v52 }
0x2ac7   :  { %6928 = vmatpush3.bf16.msra.mxu1 %v7994_v33  ;;  %6559 = vmatprep.mubr.msk.f32.mxu1 %vm7528_vm4, %v7529_v12 }
0x2ac8   :  { %6929 = vmatprep.subr.bf16.mxu1 %v7527_v8 }
0x2acb   :  { %6931 = vmatpush3.bf16.msra.mxu1 %v7997_v35 }
0x2acc   :  { %6932 = vmatprep.subr.bf16.mxu1 %v7527_v8 }
0x2acf   :  { %6934 = vmatpush3.bf16.msra.mxu1 %v8001_v38 }
0x2ad0   :  { %6935 = vmatprep.subr.bf16.mxu1 %v7527_v8 }
0x2ad1   :  { %v4737_v60 = vpop.permute.xlu0 %4736 }
0x2ad2   :  { %v4739_v53 = vsel %vm135_vm1, %v4733_v52, %v4737_v60 }
0x2ad3   :  { %6937 = vmatpush3.bf16.msra.mxu1 %v8006_v42  ;;  %6530 = vmatmul.mubr.msk.f32.vlgmr.msra.gmra.mrb[34].mxu0 %vm2242_vm6, %v4739_v53 }
0x2ad4   :  { %6956 = vmatprep.subr.bf16.mxu1 %v7527_v8  ;;  %6940 = vmatpush3.bf16.msra.mxu0 %v7903_v7 }
0x2ad5   :  { %6570 = vmatprep.mubr.msk.f32.mxu0 %vm7528_vm4, %v7529_v12  ;;  %6941 = vmatprep.subr.bf16.mxu0 %v7527_v8 }
0x2ad8   :  { %6943 = vmatpush3.bf16.msra.mxu0 %v7915_v11 }
0x2ad9   :  { %6944 = vmatprep.subr.bf16.mxu0 %v7527_v8 }
0x2b99   :  { %v4910_v54 = vpop.f32.mrb[28].mxu1 }
0x2b9a   :  { %v4914_v55 = vadd.f32 %v4910_v54, %v7981_v16  ;;  %v6542_v56 = vpop.f32.mrb[29].mxu1 }
0x2b9c   :  { %7289 = vtanh.f32 %v4914_v55  ;;  %v5683_v5 = vmul.f32 -1.442695, %v4914_v55 }
0x2ba6   :  { %v7290_v2 = vpop.eup %7289  ;;  %v4809_v57 = vpop.f32.mrb[34].mxu0 }
0x2ba7   :  { %4924 = vrot.lane.b32.xlu0 %v7290_v2, %s7531_s1  ;;  %v4810_v58 = vadd.f32 %v8337_v19, %v4809_v57  ;;  %v6531_v62 = vpop.f32.mrb[35].mxu0 }
0x2ba9   :  { %7291 = vtanh.f32 %v4810_v58  ;;  %v5681_v3 = vmul.f32 -1.442695, %v4810_v58 }
0x2baa   :  { %7293 = vpow2.f32 %v5683_v5 }
0x2bab   :  { %7295 = vpow2.f32 %v5681_v3 }
0x2bb3   :  { %v7292_v59 = vpop.eup %7291 }
0x2bb4   :  { %4822 = vrot.lane.b32.xlu1 %v7292_v59, %s7531_s1  ;;  %v7294_v50 = vpop.eup %7293 }
0x2bb5   :  { %v4918_v6 = vadd.f32 1.0, %v7294_v50  ;;  %v7296_v16 = vpop.eup %7295 }
0x2bb6   :  { %v4816_v10 = vadd.f32 1.0, %v7296_v16 }
0x2bb7   :  { %7297 = vrcp.f32 %v4918_v6 }
0x2bb8   :  { %7299 = vrcp.f32 %v4816_v10 }
0x2bc1   :  { %v7298_v9 = vpop.eup %7297 }
0x2bc2   :  { %v7300_v1 = vpop.eup %7299  ;;  %v4922_v22 = vmul.f32 %v7298_v9, %v8456_v41 }
0x2bc3   :  { %v4820_v26 = vmul.f32 %v7300_v1, %v8460_v51 }
0x2c19   :  { %v4925_v14 = vpop.permute.xlu0 %4924 }
0x2c1a   :  { %v4927_v15 = vmul.f32 %v7298_v9, %v4925_v14 }
0x2c1c   :  { %4929 = vrot.lane.b32.xlu0 %v4927_v15, %s7521_s23 }
0x2c26   :  { %v4823_v20 = vpop.permute.xlu1 %4822 }
0x2c27   :  { %v4825_v21 = vmul.f32 %v7300_v1, %v4823_v20 }
0x2c29   :  { %4827 = vrot.lane.b32.xlu1 %v4825_v21, %s7521_s23 }
0x2c8e   :  { %v4930_v23 = vpop.permute.xlu0 %4929 }
0x2c8f   :  { %v8493_v24 = vadd.f32 %v4930_v23, %v4922_v22 }
0x2c91   :  { %7301 = vtanh.f32 %v8493_v24 }
0x2c9b   :  { %v7302_v25 = vpop.eup %7301  ;;  %v4828_v45 = vpop.permute.xlu1 %4827 }
0x2c9c   :  { %4935 = vrot.lane.b32.xlu0 %v7302_v25, %s7531_s1  ;;  %v8498_v27 = vadd.f32 %v4828_v45, %v4820_v26 }
0x2c9e   :  { %7303 = vtanh.f32 %v8498_v27 }
0x2ca8   :  { %v7304_v28 = vpop.eup %7303 }
0x2ca9   :  { %4833 = vrot.lane.b32.xlu1 %v7304_v28, %s7531_s1 }
0x2d0e   :  { %v4936_v0 = vpop.permute.xlu0 %4935 }
0x2d0f   :  { %v4938_v30 = vmul.f32 %v7298_v9, %v4936_v0 }
0x2d11   :  { %4940 = vrot.lane.b32.xlu1 %v4938_v30, %s7521_s23 }
0x2d1b   :  { %v4834_v13 = vpop.permute.xlu1 %4833 }
0x2d1c   :  { %v4836_v31 = vmul.f32 %v7300_v1, %v4834_v13 }
0x2d1e   :  { %4944 = vrot.lane.b32.xlu0 %v4836_v31, %s7531_s1 }
0x2d83   :  { %v4941_v32 = vpop.permute.xlu1 %4940 }
0x2d84   :  { %6571 = vmatmul.mubr.msk.f32.vlgmr.msra.gmra.mrb[36].mxu0 %vm135_vm1, %v4941_v32 }
0x2d85   :  { %6946 = vmatpush3.bf16.msra.mxu0 %v7994_v33  ;;  %6589 = vmatprep.mubr.msk.f32.mxu0 %vm7528_vm4, %v7529_v12 }
0x2d86   :  { %6947 = vmatprep.subr.bf16.mxu0 %v7527_v8 }
0x2d89   :  { %6949 = vmatpush3.bf16.msra.mxu0 %v7997_v35 }
0x2d8a   :  { %6950 = vmatprep.subr.bf16.mxu0 %v7527_v8 }
0x2d8d   :  { %6952 = vmatpush3.bf16.msra.mxu0 %v8001_v38 }
0x2d8e   :  { %6953 = vmatprep.subr.bf16.mxu0 %v7527_v8 }
0x2d90   :  { %v4945_v34 = vpop.permute.xlu0 %4944 }
0x2d91   :  { %6955 = vmatpush3.bf16.msra.mxu0 %v8006_v42  ;;  %v4947_v36 = vsel %vm135_vm1, %v4941_v32, %v4945_v34 }
0x2d92   :  { %6560 = vmatmul.mubr.msk.f32.vlgmr.msra.gmra.mrb[30].mxu1 %vm2242_vm6, %v4947_v36 }
0x2d93   :  { %6958 = vmatpush3.bf16.msra.mxu1 %v7903_v7  ;;  %6600 = vmatprep.mubr.msk.f32.mxu1 %vm7528_vm4, %v7529_v12 }
0x2d94   :  { %6959 = vmatprep.subr.bf16.mxu1 %v7527_v8 }
0x2d97   :  { %6961 = vmatpush3.bf16.msra.mxu1 %v7915_v11 }
0x2d98   :  { %6962 = vmatprep.subr.bf16.mxu1 %v7527_v8 }
0x2e57   :  { %v5118_v37 = vpop.f32.mrb[36].mxu0 }
0x2e58   :  { %v5122_v39 = vadd.f32 %v5118_v37, %v7984_v17  ;;  %v6572_v29 = vpop.f32.mrb[37].mxu0 }
0x2e5a   :  { %7305 = vtanh.f32 %v5122_v39  ;;  %v5687_v43 = vmul.f32 -1.442695, %v5122_v39 }
0x2e64   :  { %v7306_v40 = vpop.eup %7305 }
0x2e65   :  { %5132 = vrot.lane.b32.xlu0 %v7306_v40, %s7531_s1  ;;  %v5017_v63 = vpop.f32.mrb[30].mxu1 }
0x2e66   :  { %v5018_v7 = vadd.f32 %v8337_v19, %v5017_v63  ;;  %v6561_v41 = vpop.f32.mrb[31].mxu1 }
0x2e68   :  { %7307 = vtanh.f32 %v5018_v7  ;;  %v5685_v44 = vmul.f32 -1.442695, %v5018_v7 }
0x2e69   :  { %7309 = vpow2.f32 %v5687_v43 }
0x2e6a   :  { %7311 = vpow2.f32 %v5685_v44 }
0x2e72   :  { %v7308_v61 = vpop.eup %7307 }
0x2e73   :  { %5030 = vrot.lane.b32.xlu1 %v7308_v61, %s7531_s1  ;;  %v7310_v11 = vpop.eup %7309 }
0x2e74   :  { %v5126_v51 = vadd.f32 1.0, %v7310_v11  ;;  %v7312_v17 = vpop.eup %7311 }
0x2e75   :  { %v5024_v48 = vadd.f32 1.0, %v7312_v17 }
0x2e76   :  { %7313 = vrcp.f32 %v5126_v51 }
0x2e77   :  { %7315 = vrcp.f32 %v5024_v48 }
0x2e80   :  { %v7314_v46 = vpop.eup %7313 }
0x2e81   :  { %v7316_v49 = vpop.eup %7315  ;;  %v5130_v53 = vmul.f32 %v7314_v46, %v8493_v24 }
0x2e82   :  { %v5028_v2 = vmul.f32 %v7316_v49, %v8498_v27 }
0x2ed7   :  { %v5133_v47 = vpop.permute.xlu0 %5132 }
0x2ed8   :  { %v5135_v4 = vmul.f32 %v7314_v46, %v5133_v47 }
0x2eda   :  { %5137 = vrot.lane.b32.xlu0 %v5135_v4, %s7521_s23 }
0x2ee5   :  { %v5031_v52 = vpop.permute.xlu1 %5030 }
0x2ee6   :  { %v5033_v60 = vmul.f32 %v7316_v49, %v5031_v52 }
0x2ee8   :  { %5035 = vrot.lane.b32.xlu1 %v5033_v60, %s7521_s23 }
0x2f4c   :  { %v5138_v54 = vpop.permute.xlu0 %5137 }
0x2f4d   :  { %v5140_v55 = vadd.f32 %v5138_v54, %v5130_v53 }
0x2f4f   :  { %7317 = vtanh.f32 %v5140_v55 }
0x2f59   :  { %v7318_v56 = vpop.eup %7317 }
0x2f5a   :  { %5143 = vrot.lane.b32.xlu0 %v7318_v56, %s7531_s1  ;;  %v5036_v57 = vpop.permute.xlu1 %5035 }
0x2f5b   :  { %v5038_v58 = vadd.f32 %v5036_v57, %v5028_v2 }
0x2f5d   :  { %7319 = vtanh.f32 %v5038_v58 }
0x2f67   :  { %v7320_v62 = vpop.eup %7319 }
0x2f68   :  { %5041 = vrot.lane.b32.xlu1 %v7320_v62, %s7531_s1 }
0x2fcc   :  { %v5144_v59 = vpop.permute.xlu0 %5143 }
0x2fcd   :  { %v5146_v5 = vmul.f32 %v7314_v46, %v5144_v59 }
0x2fcf   :  { %5148 = vrot.lane.b32.xlu1 %v5146_v5, %s7521_s23 }
0x2fda   :  { %v5042_v50 = vpop.permute.xlu1 %5041 }
0x2fdb   :  { %v5044_v3 = vmul.f32 %v7316_v49, %v5042_v50  ;;  %v5694_v49 = vld [vmem:[#allocation11] ss:$0 sm:$0xff] }
0x2fdd   :  { %5152 = vrot.lane.b32.xlu0 %v5044_v3, %s7531_s1 }
0x3041   :  { %v5149_v6 = vpop.permute.xlu1 %5148 }
0x3042   :  { %6601 = vmatmul.mubr.msk.f32.vlgmr.msra.gmra.mrb[32].mxu1 %vm135_vm1, %v5149_v6 }
0x3043   :  { %6964 = vmatpush3.bf16.msra.mxu1 %v7994_v33  ;;  %6619 = vmatprep.mubr.msk.f32.mxu1 %vm7528_vm4, %v7529_v12 }
0x3044   :  { %6965 = vmatprep.subr.bf16.mxu1 %v7527_v8 }
0x3047   :  { %6967 = vmatpush3.bf16.msra.mxu1 %v7997_v35 }
0x3048   :  { %6968 = vmatprep.subr.bf16.mxu1 %v7527_v8 }
0x304b   :  { %6970 = vmatpush3.bf16.msra.mxu1 %v8001_v38 }
0x304c   :  { %6971 = vmatprep.subr.bf16.mxu1 %v7527_v8 }
0x304f   :  { %6973 = vmatpush3.bf16.msra.mxu1 %v8006_v42  ;;  %v5153_v16 = vpop.permute.xlu0 %5152 }
0x3050   :  { %v5155_v9 = vsel %vm135_vm1, %v5149_v6, %v5153_v16 }
0x3051   :  { %6590 = vmatmul.mubr.msk.f32.vlgmr.msra.gmra.mrb[38].mxu0 %vm2242_vm6, %v5155_v9 }
0x3115   :  { %v5326_v33 = vpop.f32.mrb[32].mxu1 }
0x3116   :  { %v5330_v12 = vadd.f32 %v5326_v33, %v7987_v18  ;;  %v6602_v10 = vpop.f32.mrb[33].mxu1 }
0x3118   :  { %7321 = vtanh.f32 %v5330_v12  ;;  %v5691_v42 = vmul.f32 -1.442695, %v5330_v12 }
0x3122   :  { %v7322_v14 = vpop.eup %7321 }
0x3123   :  { %5340 = vrot.lane.b32.xlu0 %v7322_v14, %s7531_s1 }
0x3124   :  { %v5225_v35 = vpop.f32.mrb[38].mxu0 }
0x3125   :  { %v5226_v38 = vadd.f32 %v8337_v19, %v5225_v35  ;;  %v6591_v15 = vpop.f32.mrb[39].mxu0 }
0x3127   :  { %7323 = vtanh.f32 %v5226_v38  ;;  %v5689_v21 = vmul.f32 -1.442695, %v5226_v38 }
0x3128   :  { %7325 = vpow2.f32 %v5691_v42 }
0x3131   :  { %v7324_v8 = vpop.eup %7323 }
0x3132   :  { %5238 = vrot.lane.b32.xlu1 %v7324_v8, %s7531_s1  ;;  %v7326_v1 = vpop.eup %7325 }
0x3133   :  { %v5334_v20 = vadd.f32 1.0, %v7326_v1 }
0x3135   :  { %7327 = vrcp.f32 %v5334_v20 }
0x3136   :  { %7329 = vpow2.f32 %v5689_v21 }
0x313f   :  { %v7328_v18 = vpop.eup %7327 }
0x3140   :  { %v7330_v22 = vpop.eup %7329  ;;  %v5338_v28 = vmul.f32 %v7328_v18, %v5140_v55 }
0x3141   :  { %v5232_v25 = vadd.f32 1.0, %v7330_v22 }
0x3143   :  { %7331 = vrcp.f32 %v5232_v25 }
0x314d   :  { %v7332_v26 = vpop.eup %7331 }
0x314e   :  { %v5236_v31 = vmul.f32 %v7332_v26, %v5038_v58 }
0x3195   :  { %v5341_v23 = vpop.permute.xlu0 %5340 }
0x3196   :  { %v5343_v24 = vmul.f32 %v7328_v18, %v5341_v23 }
0x3198   :  { %5345 = vrot.lane.b32.xlu0 %v5343_v24, %s7521_s23 }
0x31a4   :  { %v5239_v45 = vpop.permute.xlu1 %5238 }
0x31a5   :  { %v5241_v27 = vmul.f32 %v7332_v26, %v5239_v45 }
0x31a7   :  { %5243 = vrot.lane.b32.xlu1 %v5241_v27, %s7521_s23 }
0x320a   :  { %v5346_v0 = vpop.permute.xlu0 %5345 }
0x320b   :  { %v5348_v30 = vadd.f32 %v5346_v0, %v5338_v28 }
0x320d   :  { %7333 = vtanh.f32 %v5348_v30 }
0x3217   :  { %v7334_v13 = vpop.eup %7333 }
0x3218   :  { %5351 = vrot.lane.b32.xlu0 %v7334_v13, %s7531_s1 }
0x3219   :  { %v5244_v32 = vpop.permute.xlu1 %5243 }
0x321a   :  { %v5246_v34 = vadd.f32 %v5244_v32, %v5236_v31 }
0x321c   :  { %7335 = vtanh.f32 %v5246_v34 }
0x3226   :  { %v7336_v36 = vpop.eup %7335 }
0x3227   :  { %5249 = vrot.lane.b32.xlu1 %v7336_v36, %s7531_s1 }
0x328a   :  { %v5352_v37 = vpop.permute.xlu0 %5351 }
0x328b   :  { %v5354_v39 = vmul.f32 %v7328_v18, %v5352_v37 }
0x328d   :  { %5356 = vrot.lane.b32.xlu1 %v5354_v39, %s7521_s23 }
0x3299   :  { %v5250_v29 = vpop.permute.xlu1 %5249 }
0x329a   :  { %v5252_v40 = vmul.f32 %v7332_v26, %v5250_v29 }
0x329c   :  { %5360 = vrot.lane.b32.xlu0 %v5252_v40, %s7531_s1 }
0x32ff   :  { %v5357_v63 = vpop.permute.xlu1 %5356 }
0x3300   :  { %5462 = vst.msk [vmem:[#allocation12] sm:$0x3] %vm5461_vm7, %v5357_v63 }
0x330e   :  { %v5361_v7 = vpop.permute.xlu0 %5360 }
0x330f   :  { %v5363_v41 = vsel %vm135_vm1, %v5357_v63, %v5361_v7 }
0x3310   :  { %6620 = vmatmul.mubr.msk.f32.vlgmr.msra.gmra.mrb[34].mxu1 %vm2242_vm6, %v5363_v41 }
0x33e3   :  { %v5433_v61 = vpop.f32.mrb[34].mxu1 }
0x33e4   :  { %v5434_v43 = vadd.f32 %v8337_v19, %v5433_v61  ;;  %v6621_v11 = vpop.f32.mrb[35].mxu1 }
0x33e6   :  { %7337 = vtanh.f32 %v5434_v43  ;;  %v5693_v51 = vmul.f32 -1.442695, %v5434_v43 }
0x33e8   :  { %7339 = vpow2.f32 %v5693_v51 }
0x33f0   :  { %v7338_v44 = vpop.eup %7337 }
0x33f1   :  { %5446 = vrot.lane.b32.xlu1 %v7338_v44, %s7531_s1 }
0x33f2   :  { %v7340_v17 = vpop.eup %7339 }
0x33f3   :  { %v5440_v46 = vadd.f32 1.0, %v7340_v17 }
0x33f5   :  { %7341 = vrcp.f32 %v5440_v46 }
0x33ff   :  { %v7342_v47 = vpop.eup %7341 }
0x3400   :  { %v5444_v52 = vmul.f32 %v7342_v47, %v5246_v34 }
0x3463   :  { %v5447_v4 = vpop.permute.xlu1 %5446 }
0x3464   :  { %v5449_v48 = vmul.f32 %v7342_v47, %v5447_v4 }
0x3466   :  { %5451 = vrot.lane.b32.xlu0 %v5449_v48, %s7521_s23 }
0x346a   :  { %5486 = vrot.lane.b32.xlu0 %v5694_v49, %s7530_s11 }
0x34d8   :  { %v5452_v19 = vpop.permute.xlu0 %5451 }
0x34d9   :  { %v5454_v60 = vadd.f32 %v5452_v19, %v5444_v52 }
0x34db   :  { %7343 = vtanh.f32 %v5454_v60 }
0x34dc   :  { %v5487_v55 = vpop.permute.xlu0 %5486 }
0x34e5   :  { %v7344_v53 = vpop.eup %7343 }
0x34e6   :  { %5457 = vrot.lane.b32.xlu1 %v7344_v53, %s7531_s1 }
0x3558   :  { %v5458_v54 = vpop.permute.xlu1 %5457 }
0x3559   :  { %v5460_v56 = vmul.f32 %v7342_v47, %v5458_v54 }
0x355b   :  { %v5489_v2 = vmul.f32 %v5487_v55, %v5460_v56 }
0x355d   :  { %5491 = vrot.lane.b32.xlu1 %v5489_v2, %s7521_s23 }
0x3561   :  { %5464 = vrot.lane.b32.xlu1 %v5460_v56, %s7521_s23 }
0x3565   :  { %5470 = vrot.lane.b32.xlu1 %v5348_v30, %s7530_s11 }
0x3569   :  { %5475 = vrot.lane.b32.xlu1 %v5454_v60, %s7530_s11 }
0x35cf   :  { %v5492_v57 = vpop.permute.xlu1 %5491 }
0x35d0   :  { %v5494_v58 = vsel %vm5461_vm7, %v5492_v57, 0.0 }
0x35d1   :  { %5495 = vadd.xlane.f32.xlu0 %v5494_v58 }
0x35d3   :  { %v5465_v62 = vpop.permute.xlu1 %5464 }
0x35d4   :  { %5468 = vst.msk [vmem:[#allocation12 + $0x2] sm:$0x3] %vm5461_vm7, %v5465_v62 }
0x35d7   :  { %v5471_v59 = vpop.permute.xlu1 %5470 }
0x35d8   :  { %5473 = vst.msk [vmem:[#allocation13] sm:$0x3] %vm5461_vm7, %v5471_v59 }
0x35db   :  { %v5476_v5 = vpop.permute.xlu1 %5475 }
0x35dc   :  { %5479 = vst.msk [vmem:[#allocation13 + $0x2] sm:$0x3] %vm5461_vm7, %v5476_v5 }
0x35dd   :  { %7471 = shalt.err (!%p7468_p2)
}
0x35de   :  { %s7472_s26 = scalar_lea.hbm %s8622_s19, 64 }
0x35df   :  { %p7473_p3 = scmp.ne.s32.totalorder %s8622_s19, %s7472_s26  ;;  %p7476_p4 = scmp.lt.u32.totalorder %s7472_s26, %s8622_s19 }
0x35e1   :  { %p7478_p5 = pnand %p7476_p4, %p7473_p3 }
0x35e3   :  { %7481 = shalt.err (!%p7478_p5)
}
0x35e4   :  { %s7534_s14 = smov 2   ;;  %s7482_s4 = scalar_lea.vmem %s5533_s30, 64 }
0x35e5   :  { %5526 = dma.vmem_to_hbm [thread:$0]  %s5521_s5, 64, %s8622_s19, [#allocation5], %s7521_s23, %s7521_s23, %s7534_s14  }
0x35e6   :  { %p7483_p6 = scmp.ne.s32.totalorder %s5533_s30, %s7482_s4  ;;  %p7487_p7 = scmp.lt.s32.totalorder %s5533_s30, %s5533_s30 }
0x35e7   :  { %p7488_p8 = scmp.lt.s32.totalorder %s7482_s4, %s7482_s4 }
0x35e9   :  { %p7489_p9 = por %p7488_p8, %p7487_p7 }
0x35eb   :  { %p7490_p10 = pnand %p7489_p9, %p7483_p6 }
0x35ed   :  { %7493 = shalt.err (!%p7490_p10)
}
0x35ee   :  { %s7494_s29 = scalar_lea.hbm %s8623_s20, 64 }
0x35ef   :  { %p7495_p11 = scmp.ne.s32.totalorder %s8623_s20, %s7494_s29  ;;  %p7498_p12 = scmp.lt.u32.totalorder %s7494_s29, %s8623_s20 }
0x35f1   :  { %p7500_p13 = pnand %p7498_p12, %p7495_p11 }
0x35f3   :  { %7503 = shalt.err (!%p7500_p13)
}
0x35f4   :  { %5538 = dma.vmem_to_hbm [thread:$0]  %s5533_s30, 64, %s8623_s20, [#allocation14], %s7521_s23, %s7521_s23, %s7534_s14   ;;  %v5695_v50 = vld [vmem:[#allocation2] ss:$0 sm:$0xff]  ;;  %vm5511_vm8 = vcmask 1024  }
0x365e   :  { %v5496_v3 = vpop.xlane.xlu0 %5495 }
0x365f   :  { %v5504_v6 = vadd.f32 %v5695_v50, %v5496_v3 }
0x3661   :  { %v5696_v16 = vmul.f32 -1.442695, %v5504_v6 }
0x3663   :  { %7345 = vpow2.f32 %v5696_v16 }
0x366d   :  { %v7346_v9 = vpop.eup %7345 }
0x366e   :  { %v5508_v33 = vadd.f32 1.0, %v7346_v9 }
0x3670   :  { %7347 = vrcp.f32 %v5508_v33 }
0x367a   :  { %v7348_v12 = vpop.eup %7347 }
0x367b   :  { %5512 = vst.msk [vmem:[%s8621_s18] sm:$0x3] %vm5511_vm8, %v7348_v12 }
0x367c   :  { %7510 = dma.done.wait [#allocation5], 64  }
0x367d   :  { %7511 = vsyncadd [#allocation5], 4294967232 }
0x367e   :  { %7512 = dma.done.wait [#allocation14], 64  }
0x367f   :  { %7513 = vsyncadd [#allocation14], 4294967232 }
0x3680   :  { %5547 = vsyncpa [#allocation4], 1 }
0x3681   :  { %5548 = vsyncpa [#allocation7], 1 }
0x3682   :  { %5549 = vsyncpa [#allocation10], 1 }
0x3683   :  { %5550 = vsyncpa [#allocation5], 1 }
0x3684   :  { %5551 = vsyncpa [#allocation14], 1 }

</bundles_post_ra>
